<compile_context>
chip_gen: v7x
topology: tpu7x:2x2x1
jax: 0.10.0
libtpu: 0.0.40
codegen_flags: <defaults>
</compile_context>

<pallas_src>
import functools

import jax
import jax.numpy as jnp
from jax.experimental import pallas as pl
from jax.experimental.pallas import tpu as pltpu


# ---------------------------- fused Pallas kernel ----------------------------

def _conv_bn_add_kernel(x_ref, w_ref, gl_ref, bl_ref, sel_ref, selt_ref, *rest,
                        n_res, N, H, W, Cin, Cout):
    """Fused: 3x3 conv (banded matmuls) + BatchNorm(train) + residual adds.

    x_ref:    (N*H, W*Cin)   lane-dense activations
    w_ref:    (3, W*Cin, W*Cout) banded weights, one slab per vertical tap dy
    gl_ref:   (1, W*Cout)    gamma broadcast to the packed lane layout
    bl_ref:   (1, W*Cout)    beta  broadcast to the packed lane layout
    sel_ref:  (W*Cout, Cout) per-channel gather matrix (lane -> channel)
    selt_ref: (Cout, W*Cout) per-channel scatter matrix (channel -> lane)
    rest:     n_res residual refs (N*H, W*Cout), then o_ref, then VMEM scratch.
    """
    res_refs = rest[:n_res]
    o_ref = rest[n_res]
    xpad_ref = rest[n_res + 1]
    Hp = H + 2

    # ---- vertical zero padding into VMEM scratch (horizontal padding is folded
    #      into the banded weight matrices, so rows stay exactly 128 lanes wide) ----
    xpad_ref[...] = jnp.zeros_like(xpad_ref)
    for n in range(N):
        xpad_ref[n * Hp + 1:n * Hp + 1 + H, :] = x_ref[n * H:(n + 1) * H, :]
    xpad = xpad_ref[...]                                        # (N*(H+2), W*Cin)

    # ---- 3x3 conv as 3 lane-dense MXU matmuls ----
    p0 = jnp.dot(xpad, w_ref[0], preferred_element_type=jnp.float32)
    p1 = jnp.dot(xpad, w_ref[1], preferred_element_type=jnp.float32)
    p2 = jnp.dot(xpad, w_ref[2], preferred_element_type=jnp.float32)
    per_image = []
    for n in range(N):
        b = n * Hp
        per_image.append(p0[b:b + H, :]
                         + p1[b + 1:b + 1 + H, :]
                         + p2[b + 2:b + 2 + H, :])
    conv = jnp.concatenate(per_image, axis=0)                   # (N*H, W*Cout), f32

    # ---- BatchNorm2d (training mode): biased batch stats over (N, H, W), eps=1e-5 ----
    inv_m = 1.0 / float(N * H * W)
    sel = sel_ref[...]
    selt = selt_ref[...]
    lane_sum = jnp.sum(conv, axis=0, keepdims=True)             # (1, W*Cout)
    mean_l = jnp.dot(jnp.dot(lane_sum, sel, preferred_element_type=jnp.float32),
                     selt, preferred_element_type=jnp.float32) * inv_m
    centered = conv - mean_l
    lane_ss = jnp.sum(centered * centered, axis=0, keepdims=True)
    var_l = jnp.dot(jnp.dot(lane_ss, sel, preferred_element_type=jnp.float32),
                    selt, preferred_element_type=jnp.float32) * inv_m
    y = centered * (gl_ref[...] * jax.lax.rsqrt(var_l + 1e-5)) + bl_ref[...]

    # ---- fused residual / mixed-op-sum adds ----
    for r in res_refs:
        y = y + r[...]
    o_ref[...] = y.astype(o_ref.dtype)


def conv_bn_add(x2d, big_w, gamma_l, beta_l, sel, selt, *residuals,
                N, H, W, Cin, Cout):
    """BN(conv3x3(x)) + sum(residuals), all in one pallas_call."""
    kernel = functools.partial(_conv_bn_add_kernel, n_res=len(residuals),
                               N=N, H=H, W=W, Cin=Cin, Cout=Cout)
    return pl.pallas_call(
        kernel,
        out_shape=jax.ShapeDtypeStruct((N * H, W * Cout), jnp.float32),
        scratch_shapes=[pltpu.VMEM((N * (H + 2), W * Cin), jnp.float32)],
    )(x2d, big_w, gamma_l, beta_l, sel, selt, *residuals)


# ---------------------------- parameter construction ----------------------------

def make_banded_weight(w, W):
    """(3, 3, Cin, Cout) conv weight -> (3, W*Cin, W*Cout) banded matmul weights.

    big[dy, wi*Cin+ci, wo*Cout+co] = w[dy, wi-wo+1, ci, co] when 0 <= wi-wo+1 < 3,
    else 0 — this folds im2col over the width dimension (and the horizontal zero
    padding) into the weight matrix so the conv becomes 3 dense matmuls.
    """
    KH, KW, Cin, Cout = w.shape
    k = jnp.arange(W * Cin)
    n = jnp.arange(W * Cout)
    wi, ci = k // Cin, k % Cin
    wo, co = n // Cout, n % Cout
    dx = wi[:, None] - wo[None, :] + 1
    valid = (dx >= 0) & (dx < KW)
    dxc = jnp.clip(dx, 0, KW - 1)
    big = w[:, dxc, ci[:, None], co[None, :]]                   # (3, W*Cin, W*Cout)
    return jnp.where(valid[None, :, :], big, 0.0).astype(jnp.float32)


def make_channel_selectors(W, C):
    lane = jnp.arange(W * C)
    ch = jnp.arange(C)
    sel = (lane[:, None] % C == ch[None, :]).astype(jnp.float32)   # (W*C, C)
    return sel, sel.T                                              # and (C, W*C)


def make_conv_bn_params(key, W, cin, cout):
    w = 0.1 * jax.random.normal(key, (3, 3, cin, cout), jnp.float32)
    gamma = jnp.ones((cout,), jnp.float32)
    beta = jnp.zeros((cout,), jnp.float32)
    return {
        "big_w": make_banded_weight(w, W),                         # (3, W*cin, W*cout)
        "gamma_l": jnp.tile(gamma, W).reshape(1, W * cout),        # lane-packed gamma
        "beta_l": jnp.tile(beta, W).reshape(1, W * cout),          # lane-packed beta
    }


# ---------------------------- model ----------------------------

# TODO(synk): PRIMITIVES / OPS are not defined in the reference snippet; a
# representative NAS candidate set (skip / conv3x3+bn / none) is used.
PRIMITIVES = ("skip_connect", "conv_3x3", "none")


class GroupExplore1:
    """Mirrors group_explore1.forward for the stride_first == 1 configuration
    (downsample = Identity, every MixedOp is out_planes->out_planes, stride 1)."""

    def __init__(self, in_planes, out_planes, stride_first, expansion, first, key,
                 batch, height, width):
        assert stride_first == 1 and in_planes == out_planes, "demo covers stride_first=1"
        self._steps1 = 4
        self.first = first
        self.expansion = expansion
        self.N, self.H, self.W, self.C = batch, height, width, out_planes

        n_mixed = sum(1 + i for i in range(self._steps1))          # = 10
        keys = jax.random.split(key, 4 + n_mixed)
        sel, selt = make_channel_selectors(self.W, self.C)
        self.params = {
            "main": [make_conv_bn_params(keys[i], self.W,
                                         in_planes if i == 0 else out_planes, out_planes)
                     for i in range(4)],
            "ops": [make_conv_bn_params(keys[4 + j], self.W, out_planes, out_planes)
                    for j in range(n_mixed)],
            "sel": sel,
            "selt": selt,
        }
        self._forward = jax.jit(self._forward_impl)

    # ----- jitted forward -----
    def _forward_impl(self, params, x_nhwc, group_arch_weights, sample_key):
        N, H, W, C = self.N, self.H, self.W, self.C
        x2d = x_nhwc.reshape(N * H, W * C)                         # lane-dense layout
        sel, selt = params["sel"], params["selt"]

        def cba(x, p, *res):
            return conv_bn_add(x, p["big_w"], p["gamma_l"], p["beta_l"], sel, selt,
                               *res, N=N, H=H, W=W, Cin=C, Cout=C)

        # binarize_path forward: softmax -> multinomial(1) -> one-hot gate.
        # One categorical draw per MixedOp; only the gated branch executes (lax.switch).
        op_idx = jax.random.categorical(sample_key, group_arch_weights, axis=-1)

        def mixed(i, h_state):
            return jax.lax.switch(
                op_idx[i],
                [lambda h: h,                                      # skip_connect
                 lambda h: cba(h, params["ops"][i]),               # conv_3x3 (+ BN)
                 lambda h: jnp.zeros_like(h)],                     # none
                h_state)

        def mixed_sum(states, offset):
            total = None
            for j, h_state in enumerate(states):
                y = mixed(offset + j, h_state)
                total = y if total is None else total + y          # XLA fuses these adds
            return total

        states = [x2d]
        identity_block0 = x2d                                      # downsample = Identity
        offset = 0

        ms = mixed_sum(states, offset)
        x_b0_l1 = cba(x2d, params["main"][0], ms)                  # BN0(conv0) + Σ ops
        offset += len(states)
        states.append(x_b0_l1)

        ms = mixed_sum(states, offset)
        x_b1_l0 = cba(x_b0_l1, params["main"][1], ms, identity_block0)
        offset += len(states)
        states.append(x_b1_l0)

        identity_block1 = x_b1_l0
        ms = mixed_sum(states, offset)
        x_b1_l1 = cba(x_b1_l0, params["main"][2], ms)
        offset += len(states)
        states.append(x_b1_l1)

        ms = mixed_sum(states, offset)
        group_out = cba(x_b1_l1, params["main"][3], ms, identity_block1)
        return group_out.reshape(N, H, W, C)

    def forward(self, x_nhwc, group_arch_weights, sample_key):
        return self._forward(self.params, x_nhwc, group_arch_weights, sample_key)


# ---------------------------- demo ----------------------------

if __name__ == "__main__":
    key = jax.random.PRNGKey(0)
    k_x, k_params, k_arch, k_sample = jax.random.split(key, 4)

    N, C, H, W = 2, 8, 16, 16                       # in_planes = out_planes = 8; W*C = 128
    x_nchw = jax.random.normal(k_x, (N, C, H, W), jnp.float32)   # PyTorch-style input
    x = jnp.transpose(x_nchw, (0, 2, 3, 1))                      # NCHW -> NHWC

    n_mixed = sum(1 + i for i in range(4))                       # 10 MixedOps
    group_arch_weights = jax.random.normal(k_arch, (n_mixed, len(PRIMITIVES)), jnp.float32)

    model = GroupExplore1(in_planes=C, out_planes=C, stride_first=1,
                          expansion=1, first=False, key=k_params,
                          batch=N, height=H, width=W)
    out = model.forward(x, group_arch_weights, k_sample)
    out = jax.block_until_ready(out)

    assert out.shape == (N, H, W, C) and out.dtype == jnp.float32
    assert bool(jnp.all(jnp.isfinite(out)))
    print("KERNEL_OK")
</pallas_src>

<mosaic_0001>
module attributes {stable_mosaic.version = 11 : i64} {
  func.func @_conv_bn_add_kernel(%arg0: memref<32x128xf32, #tpu.memory_space<vmem>>, %arg1: memref<3x128x128xf32, #tpu.memory_space<vmem>>, %arg2: memref<1x128xf32, #tpu.memory_space<vmem>>, %arg3: memref<1x128xf32, #tpu.memory_space<vmem>>, %arg4: memref<128x8xf32, #tpu.memory_space<vmem>>, %arg5: memref<8x128xf32, #tpu.memory_space<vmem>>, %arg6: memref<32x128xf32, #tpu.memory_space<vmem>>, %arg7: memref<32x128xf32, #tpu.memory_space<vmem>>, %arg8: memref<36x128xf32, #tpu.memory_space<vmem>>) attributes {dimension_semantics = [], scalar_prefetch = 0 : i64, scratch_operands = 1 : i64, tpu.core_type = #tpu.core_type<tc>} {
    %cst = arith.constant 0.000000e+00 : f32
    %0 = vector.broadcast %cst : f32 to vector<36x128xf32>
    %c0 = arith.constant 0 : index
    %c0_0 = arith.constant 0 : index
    %1 = vector.load %arg8[%c0, %c0_0] : memref<36x128xf32, #tpu.memory_space<vmem>>, vector<36x128xf32>
    tpu.vector_store %arg8[%c0, %c0_0], %0 {strides = array<i32>} : memref<36x128xf32, #tpu.memory_space<vmem>>, vector<36x128xf32>,
    %c0_1 = arith.constant 0 : index
    %c0_2 = arith.constant 0 : index
    %2 = vector.load %arg0[%c0_1, %c0_2] : memref<32x128xf32, #tpu.memory_space<vmem>>, vector<16x128xf32>
    %c1 = arith.constant 1 : index
    %c0_3 = arith.constant 0 : index
    %3 = vector.load %arg8[%c1, %c0_3] : memref<36x128xf32, #tpu.memory_space<vmem>>, vector<16x128xf32>
    tpu.vector_store %arg8[%c1, %c0_3], %2 {strides = array<i32>} : memref<36x128xf32, #tpu.memory_space<vmem>>, vector<16x128xf32>,
    %c16 = arith.constant 16 : index
    %c0_4 = arith.constant 0 : index
    %4 = vector.load %arg0[%c16, %c0_4] : memref<32x128xf32, #tpu.memory_space<vmem>>, vector<16x128xf32>
    %c19 = arith.constant 19 : index
    %c0_5 = arith.constant 0 : index
    %5 = vector.load %arg8[%c19, %c0_5] : memref<36x128xf32, #tpu.memory_space<vmem>>, vector<16x128xf32>
    tpu.vector_store %arg8[%c19, %c0_5], %4 {strides = array<i32>} : memref<36x128xf32, #tpu.memory_space<vmem>>, vector<16x128xf32>,
    %c0_6 = arith.constant 0 : index
    %c0_7 = arith.constant 0 : index
    %6 = vector.load %arg8[%c0_6, %c0_7] : memref<36x128xf32, #tpu.memory_space<vmem>>, vector<36x128xf32>
    %c0_8 = arith.constant 0 : index
    %c0_9 = arith.constant 0 : index
    %c0_10 = arith.constant 0 : index
    %7 = vector.load %arg1[%c0_8, %c0_9, %c0_10] : memref<3x128x128xf32, #tpu.memory_space<vmem>>, vector<1x128x128xf32>
    %8 = vector.shape_cast %7 : vector<1x128x128xf32> to vector<128x128xf32>
    %cst_11 = arith.constant dense<0.000000e+00> : vector<36x128xf32>
    %9 = tpu.matmul %6, %8, %cst_11 {dimension_numbers = #tpu.dot_dimension_numbers<[1], [0], [0], [1], [0, 0, 1, 1], [], []>} : vector<36x128xf32>, vector<128x128xf32>, vector<36x128xf32> -> vector<36x128xf32>
    %c1_12 = arith.constant 1 : index
    %c0_13 = arith.constant 0 : index
    %c0_14 = arith.constant 0 : index
    %10 = vector.load %arg1[%c1_12, %c0_13, %c0_14] : memref<3x128x128xf32, #tpu.memory_space<vmem>>, vector<1x128x128xf32>
    %11 = vector.shape_cast %10 : vector<1x128x128xf32> to vector<128x128xf32>
    %cst_15 = arith.constant dense<0.000000e+00> : vector<36x128xf32>
    %12 = tpu.matmul %6, %11, %cst_15 {dimension_numbers = #tpu.dot_dimension_numbers<[1], [0], [0], [1], [0, 0, 1, 1], [], []>} : vector<36x128xf32>, vector<128x128xf32>, vector<36x128xf32> -> vector<36x128xf32>
    %c2 = arith.constant 2 : index
    %c0_16 = arith.constant 0 : index
    %c0_17 = arith.constant 0 : index
    %13 = vector.load %arg1[%c2, %c0_16, %c0_17] : memref<3x128x128xf32, #tpu.memory_space<vmem>>, vector<1x128x128xf32>
    %14 = vector.shape_cast %13 : vector<1x128x128xf32> to vector<128x128xf32>
    %cst_18 = arith.constant dense<0.000000e+00> : vector<36x128xf32>
    %15 = tpu.matmul %6, %14, %cst_18 {dimension_numbers = #tpu.dot_dimension_numbers<[1], [0], [0], [1], [0, 0, 1, 1], [], []>} : vector<36x128xf32>, vector<128x128xf32>, vector<36x128xf32> -> vector<36x128xf32>
    %16 = vector.extract_strided_slice %9 {offsets = [0, 0], sizes = [16, 128], strides = [1, 1]} : vector<36x128xf32> to vector<16x128xf32>
    %17 = vector.extract_strided_slice %12 {offsets = [1, 0], sizes = [16, 128], strides = [1, 1]} : vector<36x128xf32> to vector<16x128xf32>
    %18 = arith.addf %16, %17 : vector<16x128xf32>
    %19 = vector.extract_strided_slice %15 {offsets = [2, 0], sizes = [16, 128], strides = [1, 1]} : vector<36x128xf32> to vector<16x128xf32>
    %20 = arith.addf %18, %19 : vector<16x128xf32>
    %21 = vector.extract_strided_slice %9 {offsets = [18, 0], sizes = [16, 128], strides = [1, 1]} : vector<36x128xf32> to vector<16x128xf32>
    %22 = vector.extract_strided_slice %12 {offsets = [19, 0], sizes = [16, 128], strides = [1, 1]} : vector<36x128xf32> to vector<16x128xf32>
    %23 = arith.addf %21, %22 : vector<16x128xf32>
    %24 = vector.extract_strided_slice %15 {offsets = [20, 0], sizes = [16, 128], strides = [1, 1]} : vector<36x128xf32> to vector<16x128xf32>
    %25 = arith.addf %23, %24 : vector<16x128xf32>
    %26 = tpu.concatenate %20, %25 in 0 : vector<16x128xf32>, vector<16x128xf32> -> vector<32x128xf32>
    %c0_19 = arith.constant 0 : index
    %c0_20 = arith.constant 0 : index
    %27 = vector.load %arg4[%c0_19, %c0_20] : memref<128x8xf32, #tpu.memory_space<vmem>>, vector<128x8xf32>
    %c0_21 = arith.constant 0 : index
    %c0_22 = arith.constant 0 : index
    %28 = vector.load %arg5[%c0_21, %c0_22] : memref<8x128xf32, #tpu.memory_space<vmem>>, vector<8x128xf32>
    %cst_23 = arith.constant dense<0.000000e+00> : vector<128xf32>
    %29 = vector.multi_reduction <add>, %26, %cst_23 [0] : vector<32x128xf32> to vector<128xf32>
    %30 = vector.shape_cast %29 : vector<128xf32> to vector<1x128xf32>
    %cst_24 = arith.constant dense<0.000000e+00> : vector<1x8xf32>
    %31 = tpu.matmul %30, %27, %cst_24 {dimension_numbers = #tpu.dot_dimension_numbers<[1], [0], [0], [1], [0, 0, 1, 1], [], []>} : vector<1x128xf32>, vector<128x8xf32>, vector<1x8xf32> -> vector<1x8xf32>
    %cst_25 = arith.constant dense<0.000000e+00> : vector<1x128xf32>
    %32 = tpu.matmul %31, %28, %cst_25 {dimension_numbers = #tpu.dot_dimension_numbers<[1], [0], [0], [1], [0, 0, 1, 1], [], []>} : vector<1x8xf32>, vector<8x128xf32>, vector<1x128xf32> -> vector<1x128xf32>
    %cst_26 = arith.constant 0.001953125 : f32
    %33 = vector.broadcast %cst_26 : f32 to vector<1x128xf32>
    %34 = arith.mulf %32, %33 : vector<1x128xf32>
    %35 = vector.broadcast %34 : vector<1x128xf32> to vector<32x128xf32>
    %36 = arith.subf %26, %35 : vector<32x128xf32>
    %37 = arith.mulf %36, %36 : vector<32x128xf32>
    %cst_27 = arith.constant dense<0.000000e+00> : vector<128xf32>
    %38 = vector.multi_reduction <add>, %37, %cst_27 [0] : vector<32x128xf32> to vector<128xf32>
    %39 = vector.shape_cast %38 : vector<128xf32> to vector<1x128xf32>
    %cst_28 = arith.constant dense<0.000000e+00> : vector<1x8xf32>
    %40 = tpu.matmul %39, %27, %cst_28 {dimension_numbers = #tpu.dot_dimension_numbers<[1], [0], [0], [1], [0, 0, 1, 1], [], []>} : vector<1x128xf32>, vector<128x8xf32>, vector<1x8xf32> -> vector<1x8xf32>
    %cst_29 = arith.constant dense<0.000000e+00> : vector<1x128xf32>
    %41 = tpu.matmul %40, %28, %cst_29 {dimension_numbers = #tpu.dot_dimension_numbers<[1], [0], [0], [1], [0, 0, 1, 1], [], []>} : vector<1x8xf32>, vector<8x128xf32>, vector<1x128xf32> -> vector<1x128xf32>
    %cst_30 = arith.constant 0.001953125 : f32
    %42 = vector.broadcast %cst_30 : f32 to vector<1x128xf32>
    %43 = arith.mulf %41, %42 : vector<1x128xf32>
    %c0_31 = arith.constant 0 : index
    %c0_32 = arith.constant 0 : index
    %44 = vector.load %arg2[%c0_31, %c0_32] : memref<1x128xf32, #tpu.memory_space<vmem>>, vector<1x128xf32>
    %cst_33 = arith.constant 9.99999974E-6 : f32
    %45 = vector.broadcast %cst_33 : f32 to vector<1x128xf32>
    %46 = arith.addf %43, %45 : vector<1x128xf32>
    %47 = math.rsqrt %46 : vector<1x128xf32>
    %48 = arith.mulf %44, %47 : vector<1x128xf32>
    %49 = vector.broadcast %48 : vector<1x128xf32> to vector<32x128xf32>
    %50 = arith.mulf %36, %49 : vector<32x128xf32>
    %c0_34 = arith.constant 0 : index
    %c0_35 = arith.constant 0 : index
    %51 = vector.load %arg3[%c0_34, %c0_35] : memref<1x128xf32, #tpu.memory_space<vmem>>, vector<1x128xf32>
    %52 = vector.broadcast %51 : vector<1x128xf32> to vector<32x128xf32>
    %53 = arith.addf %50, %52 : vector<32x128xf32>
    %c0_36 = arith.constant 0 : index
    %c0_37 = arith.constant 0 : index
    %54 = vector.load %arg6[%c0_36, %c0_37] : memref<32x128xf32, #tpu.memory_space<vmem>>, vector<32x128xf32>
    %55 = arith.addf %53, %54 : vector<32x128xf32>
    %c0_38 = arith.constant 0 : index
    %c0_39 = arith.constant 0 : index
    %56 = vector.load %arg7[%c0_38, %c0_39] : memref<32x128xf32, #tpu.memory_space<vmem>>, vector<32x128xf32>
    tpu.vector_store %arg7[%c0_38, %c0_39], %55 {strides = array<i32>} : memref<32x128xf32, #tpu.memory_space<vmem>>, vector<32x128xf32>,
    return
  }
}

module attributes {stable_mosaic.version = 11 : i64} {
  func.func @_conv_bn_add_kernel(%arg0: memref<32x128xf32, #tpu.memory_space<vmem>>, %arg1: memref<3x128x128xf32, #tpu.memory_space<vmem>>, %arg2: memref<1x128xf32, #tpu.memory_space<vmem>>, %arg3: memref<1x128xf32, #tpu.memory_space<vmem>>, %arg4: memref<128x8xf32, #tpu.memory_space<vmem>>, %arg5: memref<8x128xf32, #tpu.memory_space<vmem>>, %arg6: memref<32x128xf32, #tpu.memory_space<vmem>>, %arg7: memref<36x128xf32, #tpu.memory_space<vmem>>) attributes {dimension_semantics = [], scalar_prefetch = 0 : i64, scratch_operands = 1 : i64, tpu.core_type = #tpu.core_type<tc>} {
    %cst = arith.constant 0.000000e+00 : f32
    %0 = vector.broadcast %cst : f32 to vector<36x128xf32>
    %c0 = arith.constant 0 : index
    %c0_0 = arith.constant 0 : index
    %1 = vector.load %arg7[%c0, %c0_0] : memref<36x128xf32, #tpu.memory_space<vmem>>, vector<36x128xf32>
    tpu.vector_store %arg7[%c0, %c0_0], %0 {strides = array<i32>} : memref<36x128xf32, #tpu.memory_space<vmem>>, vector<36x128xf32>,
    %c0_1 = arith.constant 0 : index
    %c0_2 = arith.constant 0 : index
    %2 = vector.load %arg0[%c0_1, %c0_2] : memref<32x128xf32, #tpu.memory_space<vmem>>, vector<16x128xf32>
    %c1 = arith.constant 1 : index
    %c0_3 = arith.constant 0 : index
    %3 = vector.load %arg7[%c1, %c0_3] : memref<36x128xf32, #tpu.memory_space<vmem>>, vector<16x128xf32>
    tpu.vector_store %arg7[%c1, %c0_3], %2 {strides = array<i32>} : memref<36x128xf32, #tpu.memory_space<vmem>>, vector<16x128xf32>,
    %c16 = arith.constant 16 : index
    %c0_4 = arith.constant 0 : index
    %4 = vector.load %arg0[%c16, %c0_4] : memref<32x128xf32, #tpu.memory_space<vmem>>, vector<16x128xf32>
    %c19 = arith.constant 19 : index
    %c0_5 = arith.constant 0 : index
    %5 = vector.load %arg7[%c19, %c0_5] : memref<36x128xf32, #tpu.memory_space<vmem>>, vector<16x128xf32>
    tpu.vector_store %arg7[%c19, %c0_5], %4 {strides = array<i32>} : memref<36x128xf32, #tpu.memory_space<vmem>>, vector<16x128xf32>,
    %c0_6 = arith.constant 0 : index
    %c0_7 = arith.constant 0 : index
    %6 = vector.load %arg7[%c0_6, %c0_7] : memref<36x128xf32, #tpu.memory_space<vmem>>, vector<36x128xf32>
    %c0_8 = arith.constant 0 : index
    %c0_9 = arith.constant 0 : index
    %c0_10 = arith.constant 0 : index
    %7 = vector.load %arg1[%c0_8, %c0_9, %c0_10] : memref<3x128x128xf32, #tpu.memory_space<vmem>>, vector<1x128x128xf32>
    %8 = vector.shape_cast %7 : vector<1x128x128xf32> to vector<128x128xf32>
    %cst_11 = arith.constant dense<0.000000e+00> : vector<36x128xf32>
    %9 = tpu.matmul %6, %8, %cst_11 {dimension_numbers = #tpu.dot_dimension_numbers<[1], [0], [0], [1], [0, 0, 1, 1], [], []>} : vector<36x128xf32>, vector<128x128xf32>, vector<36x128xf32> -> vector<36x128xf32>
    %c1_12 = arith.constant 1 : index
    %c0_13 = arith.constant 0 : index
    %c0_14 = arith.constant 0 : index
    %10 = vector.load %arg1[%c1_12, %c0_13, %c0_14] : memref<3x128x128xf32, #tpu.memory_space<vmem>>, vector<1x128x128xf32>
    %11 = vector.shape_cast %10 : vector<1x128x128xf32> to vector<128x128xf32>
    %cst_15 = arith.constant dense<0.000000e+00> : vector<36x128xf32>
    %12 = tpu.matmul %6, %11, %cst_15 {dimension_numbers = #tpu.dot_dimension_numbers<[1], [0], [0], [1], [0, 0, 1, 1], [], []>} : vector<36x128xf32>, vector<128x128xf32>, vector<36x128xf32> -> vector<36x128xf32>
    %c2 = arith.constant 2 : index
    %c0_16 = arith.constant 0 : index
    %c0_17 = arith.constant 0 : index
    %13 = vector.load %arg1[%c2, %c0_16, %c0_17] : memref<3x128x128xf32, #tpu.memory_space<vmem>>, vector<1x128x128xf32>
    %14 = vector.shape_cast %13 : vector<1x128x128xf32> to vector<128x128xf32>
    %cst_18 = arith.constant dense<0.000000e+00> : vector<36x128xf32>
    %15 = tpu.matmul %6, %14, %cst_18 {dimension_numbers = #tpu.dot_dimension_numbers<[1], [0], [0], [1], [0, 0, 1, 1], [], []>} : vector<36x128xf32>, vector<128x128xf32>, vector<36x128xf32> -> vector<36x128xf32>
    %16 = vector.extract_strided_slice %9 {offsets = [0, 0], sizes = [16, 128], strides = [1, 1]} : vector<36x128xf32> to vector<16x128xf32>
    %17 = vector.extract_strided_slice %12 {offsets = [1, 0], sizes = [16, 128], strides = [1, 1]} : vector<36x128xf32> to vector<16x128xf32>
    %18 = arith.addf %16, %17 : vector<16x128xf32>
    %19 = vector.extract_strided_slice %15 {offsets = [2, 0], sizes = [16, 128], strides = [1, 1]} : vector<36x128xf32> to vector<16x128xf32>
    %20 = arith.addf %18, %19 : vector<16x128xf32>
    %21 = vector.extract_strided_slice %9 {offsets = [18, 0], sizes = [16, 128], strides = [1, 1]} : vector<36x128xf32> to vector<16x128xf32>
    %22 = vector.extract_strided_slice %12 {offsets = [19, 0], sizes = [16, 128], strides = [1, 1]} : vector<36x128xf32> to vector<16x128xf32>
    %23 = arith.addf %21, %22 : vector<16x128xf32>
    %24 = vector.extract_strided_slice %15 {offsets = [20, 0], sizes = [16, 128], strides = [1, 1]} : vector<36x128xf32> to vector<16x128xf32>
    %25 = arith.addf %23, %24 : vector<16x128xf32>
    %26 = tpu.concatenate %20, %25 in 0 : vector<16x128xf32>, vector<16x128xf32> -> vector<32x128xf32>
    %c0_19 = arith.constant 0 : index
    %c0_20 = arith.constant 0 : index
    %27 = vector.load %arg4[%c0_19, %c0_20] : memref<128x8xf32, #tpu.memory_space<vmem>>, vector<128x8xf32>
    %c0_21 = arith.constant 0 : index
    %c0_22 = arith.constant 0 : index
    %28 = vector.load %arg5[%c0_21, %c0_22] : memref<8x128xf32, #tpu.memory_space<vmem>>, vector<8x128xf32>
    %cst_23 = arith.constant dense<0.000000e+00> : vector<128xf32>
    %29 = vector.multi_reduction <add>, %26, %cst_23 [0] : vector<32x128xf32> to vector<128xf32>
    %30 = vector.shape_cast %29 : vector<128xf32> to vector<1x128xf32>
    %cst_24 = arith.constant dense<0.000000e+00> : vector<1x8xf32>
    %31 = tpu.matmul %30, %27, %cst_24 {dimension_numbers = #tpu.dot_dimension_numbers<[1], [0], [0], [1], [0, 0, 1, 1], [], []>} : vector<1x128xf32>, vector<128x8xf32>, vector<1x8xf32> -> vector<1x8xf32>
    %cst_25 = arith.constant dense<0.000000e+00> : vector<1x128xf32>
    %32 = tpu.matmul %31, %28, %cst_25 {dimension_numbers = #tpu.dot_dimension_numbers<[1], [0], [0], [1], [0, 0, 1, 1], [], []>} : vector<1x8xf32>, vector<8x128xf32>, vector<1x128xf32> -> vector<1x128xf32>
    %cst_26 = arith.constant 0.001953125 : f32
    %33 = vector.broadcast %cst_26 : f32 to vector<1x128xf32>
    %34 = arith.mulf %32, %33 : vector<1x128xf32>
    %35 = vector.broadcast %34 : vector<1x128xf32> to vector<32x128xf32>
    %36 = arith.subf %26, %35 : vector<32x128xf32>
    %37 = arith.mulf %36, %36 : vector<32x128xf32>
    %cst_27 = arith.constant dense<0.000000e+00> : vector<128xf32>
    %38 = vector.multi_reduction <add>, %37, %cst_27 [0] : vector<32x128xf32> to vector<128xf32>
    %39 = vector.shape_cast %38 : vector<128xf32> to vector<1x128xf32>
    %cst_28 = arith.constant dense<0.000000e+00> : vector<1x8xf32>
    %40 = tpu.matmul %39, %27, %cst_28 {dimension_numbers = #tpu.dot_dimension_numbers<[1], [0], [0], [1], [0, 0, 1, 1], [], []>} : vector<1x128xf32>, vector<128x8xf32>, vector<1x8xf32> -> vector<1x8xf32>
    %cst_29 = arith.constant dense<0.000000e+00> : vector<1x128xf32>
    %41 = tpu.matmul %40, %28, %cst_29 {dimension_numbers = #tpu.dot_dimension_numbers<[1], [0], [0], [1], [0, 0, 1, 1], [], []>} : vector<1x8xf32>, vector<8x128xf32>, vector<1x128xf32> -> vector<1x128xf32>
    %cst_30 = arith.constant 0.001953125 : f32
    %42 = vector.broadcast %cst_30 : f32 to vector<1x128xf32>
    %43 = arith.mulf %41, %42 : vector<1x128xf32>
    %c0_31 = arith.constant 0 : index
    %c0_32 = arith.constant 0 : index
    %44 = vector.load %arg2[%c0_31, %c0_32] : memref<1x128xf32, #tpu.memory_space<vmem>>, vector<1x128xf32>
    %cst_33 = arith.constant 9.99999974E-6 : f32
    %45 = vector.broadcast %cst_33 : f32 to vector<1x128xf32>
    %46 = arith.addf %43, %45 : vector<1x128xf32>
    %47 = math.rsqrt %46 : vector<1x128xf32>
    %48 = arith.mulf %44, %47 : vector<1x128xf32>
    %49 = vector.broadcast %48 : vector<1x128xf32> to vector<32x128xf32>
    %50 = arith.mulf %36, %49 : vector<32x128xf32>
    %c0_34 = arith.constant 0 : index
    %c0_35 = arith.constant 0 : index
    %51 = vector.load %arg3[%c0_34, %c0_35] : memref<1x128xf32, #tpu.memory_space<vmem>>, vector<1x128xf32>
    %52 = vector.broadcast %51 : vector<1x128xf32> to vector<32x128xf32>
    %53 = arith.addf %50, %52 : vector<32x128xf32>
    %c0_36 = arith.constant 0 : index
    %c0_37 = arith.constant 0 : index
    %54 = vector.load %arg6[%c0_36, %c0_37] : memref<32x128xf32, #tpu.memory_space<vmem>>, vector<32x128xf32>
    tpu.vector_store %arg6[%c0_36, %c0_37], %53 {strides = array<i32>} : memref<32x128xf32, #tpu.memory_space<vmem>>, vector<32x128xf32>,
    return
  }
}

module attributes {stable_mosaic.version = 11 : i64} {
  func.func @_conv_bn_add_kernel(%arg0: memref<32x128xf32, #tpu.memory_space<vmem>>, %arg1: memref<3x128x128xf32, #tpu.memory_space<vmem>>, %arg2: memref<1x128xf32, #tpu.memory_space<vmem>>, %arg3: memref<1x128xf32, #tpu.memory_space<vmem>>, %arg4: memref<128x8xf32, #tpu.memory_space<vmem>>, %arg5: memref<8x128xf32, #tpu.memory_space<vmem>>, %arg6: memref<32x128xf32, #tpu.memory_space<vmem>>, %arg7: memref<36x128xf32, #tpu.memory_space<vmem>>) attributes {dimension_semantics = [], scalar_prefetch = 0 : i64, scratch_operands = 1 : i64, tpu.core_type = #tpu.core_type<tc>} {
    %cst = arith.constant 0.000000e+00 : f32
    %0 = vector.broadcast %cst : f32 to vector<36x128xf32>
    %c0 = arith.constant 0 : index
    %c0_0 = arith.constant 0 : index
    %1 = vector.load %arg7[%c0, %c0_0] : memref<36x128xf32, #tpu.memory_space<vmem>>, vector<36x128xf32>
    tpu.vector_store %arg7[%c0, %c0_0], %0 {strides = array<i32>} : memref<36x128xf32, #tpu.memory_space<vmem>>, vector<36x128xf32>,
    %c0_1 = arith.constant 0 : index
    %c0_2 = arith.constant 0 : index
    %2 = vector.load %arg0[%c0_1, %c0_2] : memref<32x128xf32, #tpu.memory_space<vmem>>, vector<16x128xf32>
    %c1 = arith.constant 1 : index
    %c0_3 = arith.constant 0 : index
    %3 = vector.load %arg7[%c1, %c0_3] : memref<36x128xf32, #tpu.memory_space<vmem>>, vector<16x128xf32>
    tpu.vector_store %arg7[%c1, %c0_3], %2 {strides = array<i32>} : memref<36x128xf32, #tpu.memory_space<vmem>>, vector<16x128xf32>,
    %c16 = arith.constant 16 : index
    %c0_4 = arith.constant 0 : index
    %4 = vector.load %arg0[%c16, %c0_4] : memref<32x128xf32, #tpu.memory_space<vmem>>, vector<16x128xf32>
    %c19 = arith.constant 19 : index
    %c0_5 = arith.constant 0 : index
    %5 = vector.load %arg7[%c19, %c0_5] : memref<36x128xf32, #tpu.memory_space<vmem>>, vector<16x128xf32>
    tpu.vector_store %arg7[%c19, %c0_5], %4 {strides = array<i32>} : memref<36x128xf32, #tpu.memory_space<vmem>>, vector<16x128xf32>,
    %c0_6 = arith.constant 0 : index
    %c0_7 = arith.constant 0 : index
    %6 = vector.load %arg7[%c0_6, %c0_7] : memref<36x128xf32, #tpu.memory_space<vmem>>, vector<36x128xf32>
    %c0_8 = arith.constant 0 : index
    %c0_9 = arith.constant 0 : index
    %c0_10 = arith.constant 0 : index
    %7 = vector.load %arg1[%c0_8, %c0_9, %c0_10] : memref<3x128x128xf32, #tpu.memory_space<vmem>>, vector<1x128x128xf32>
    %8 = vector.shape_cast %7 : vector<1x128x128xf32> to vector<128x128xf32>
    %cst_11 = arith.constant dense<0.000000e+00> : vector<36x128xf32>
    %9 = tpu.matmul %6, %8, %cst_11 {dimension_numbers = #tpu.dot_dimension_numbers<[1], [0], [0], [1], [0, 0, 1, 1], [], []>} : vector<36x128xf32>, vector<128x128xf32>, vector<36x128xf32> -> vector<36x128xf32>
    %c1_12 = arith.constant 1 : index
    %c0_13 = arith.constant 0 : index
    %c0_14 = arith.constant 0 : index
    %10 = vector.load %arg1[%c1_12, %c0_13, %c0_14] : memref<3x128x128xf32, #tpu.memory_space<vmem>>, vector<1x128x128xf32>
    %11 = vector.shape_cast %10 : vector<1x128x128xf32> to vector<128x128xf32>
    %cst_15 = arith.constant dense<0.000000e+00> : vector<36x128xf32>
    %12 = tpu.matmul %6, %11, %cst_15 {dimension_numbers = #tpu.dot_dimension_numbers<[1], [0], [0], [1], [0, 0, 1, 1], [], []>} : vector<36x128xf32>, vector<128x128xf32>, vector<36x128xf32> -> vector<36x128xf32>
    %c2 = arith.constant 2 : index
    %c0_16 = arith.constant 0 : index
    %c0_17 = arith.constant 0 : index
    %13 = vector.load %arg1[%c2, %c0_16, %c0_17] : memref<3x128x128xf32, #tpu.memory_space<vmem>>, vector<1x128x128xf32>
    %14 = vector.shape_cast %13 : vector<1x128x128xf32> to vector<128x128xf32>
    %cst_18 = arith.constant dense<0.000000e+00> : vector<36x128xf32>
    %15 = tpu.matmul %6, %14, %cst_18 {dimension_numbers = #tpu.dot_dimension_numbers<[1], [0], [0], [1], [0, 0, 1, 1], [], []>} : vector<36x128xf32>, vector<128x128xf32>, vector<36x128xf32> -> vector<36x128xf32>
    %16 = vector.extract_strided_slice %9 {offsets = [0, 0], sizes = [16, 128], strides = [1, 1]} : vector<36x128xf32> to vector<16x128xf32>
    %17 = vector.extract_strided_slice %12 {offsets = [1, 0], sizes = [16, 128], strides = [1, 1]} : vector<36x128xf32> to vector<16x128xf32>
    %18 = arith.addf %16, %17 : vector<16x128xf32>
    %19 = vector.extract_strided_slice %15 {offsets = [2, 0], sizes = [16, 128], strides = [1, 1]} : vector<36x128xf32> to vector<16x128xf32>
    %20 = arith.addf %18, %19 : vector<16x128xf32>
    %21 = vector.extract_strided_slice %9 {offsets = [18, 0], sizes = [16, 128], strides = [1, 1]} : vector<36x128xf32> to vector<16x128xf32>
    %22 = vector.extract_strided_slice %12 {offsets = [19, 0], sizes = [16, 128], strides = [1, 1]} : vector<36x128xf32> to vector<16x128xf32>
    %23 = arith.addf %21, %22 : vector<16x128xf32>
    %24 = vector.extract_strided_slice %15 {offsets = [20, 0], sizes = [16, 128], strides = [1, 1]} : vector<36x128xf32> to vector<16x128xf32>
    %25 = arith.addf %23, %24 : vector<16x128xf32>
    %26 = tpu.concatenate %20, %25 in 0 : vector<16x128xf32>, vector<16x128xf32> -> vector<32x128xf32>
    %c0_19 = arith.constant 0 : index
    %c0_20 = arith.constant 0 : index
    %27 = vector.load %arg4[%c0_19, %c0_20] : memref<128x8xf32, #tpu.memory_space<vmem>>, vector<128x8xf32>
    %c0_21 = arith.constant 0 : index
    %c0_22 = arith.constant 0 : index
    %28 = vector.load %arg5[%c0_21, %c0_22] : memref<8x128xf32, #tpu.memory_space<vmem>>, vector<8x128xf32>
    %cst_23 = arith.constant dense<0.000000e+00> : vector<128xf32>
    %29 = vector.multi_reduction <add>, %26, %cst_23 [0] : vector<32x128xf32> to vector<128xf32>
    %30 = vector.shape_cast %29 : vector<128xf32> to vector<1x128xf32>
    %cst_24 = arith.constant dense<0.000000e+00> : vector<1x8xf32>
    %31 = tpu.matmul %30, %27, %cst_24 {dimension_numbers = #tpu.dot_dimension_numbers<[1], [0], [0], [1], [0, 0, 1, 1], [], []>} : vector<1x128xf32>, vector<128x8xf32>, vector<1x8xf32> -> vector<1x8xf32>
    %cst_25 = arith.constant dense<0.000000e+00> : vector<1x128xf32>
    %32 = tpu.matmul %31, %28, %cst_25 {dimension_numbers = #tpu.dot_dimension_numbers<[1], [0], [0], [1], [0, 0, 1, 1], [], []>} : vector<1x8xf32>, vector<8x128xf32>, vector<1x128xf32> -> vector<1x128xf32>
    %cst_26 = arith.constant 0.001953125 : f32
    %33 = vector.broadcast %cst_26 : f32 to vector<1x128xf32>
    %34 = arith.mulf %32, %33 : vector<1x128xf32>
    %35 = vector.broadcast %34 : vector<1x128xf32> to vector<32x128xf32>
    %36 = arith.subf %26, %35 : vector<32x128xf32>
    %37 = arith.mulf %36, %36 : vector<32x128xf32>
    %cst_27 = arith.constant dense<0.000000e+00> : vector<128xf32>
    %38 = vector.multi_reduction <add>, %37, %cst_27 [0] : vector<32x128xf32> to vector<128xf32>
    %39 = vector.shape_cast %38 : vector<128xf32> to vector<1x128xf32>
    %cst_28 = arith.constant dense<0.000000e+00> : vector<1x8xf32>
    %40 = tpu.matmul %39, %27, %cst_28 {dimension_numbers = #tpu.dot_dimension_numbers<[1], [0], [0], [1], [0, 0, 1, 1], [], []>} : vector<1x128xf32>, vector<128x8xf32>, vector<1x8xf32> -> vector<1x8xf32>
    %cst_29 = arith.constant dense<0.000000e+00> : vector<1x128xf32>
    %41 = tpu.matmul %40, %28, %cst_29 {dimension_numbers = #tpu.dot_dimension_numbers<[1], [0], [0], [1], [0, 0, 1, 1], [], []>} : vector<1x8xf32>, vector<8x128xf32>, vector<1x128xf32> -> vector<1x128xf32>
    %cst_30 = arith.constant 0.001953125 : f32
    %42 = vector.broadcast %cst_30 : f32 to vector<1x128xf32>
    %43 = arith.mulf %41, %42 : vector<1x128xf32>
    %c0_31 = arith.constant 0 : index
    %c0_32 = arith.constant 0 : index
    %44 = vector.load %arg2[%c0_31, %c0_32] : memref<1x128xf32, #tpu.memory_space<vmem>>, vector<1x128xf32>
    %cst_33 = arith.constant 9.99999974E-6 : f32
    %45 = vector.broadcast %cst_33 : f32 to vector<1x128xf32>
    %46 = arith.addf %43, %45 : vector<1x128xf32>
    %47 = math.rsqrt %46 : vector<1x128xf32>
    %48 = arith.mulf %44, %47 : vector<1x128xf32>
    %49 = vector.broadcast %48 : vector<1x128xf32> to vector<32x128xf32>
    %50 = arith.mulf %36, %49 : vector<32x128xf32>
    %c0_34 = arith.constant 0 : index
    %c0_35 = arith.constant 0 : index
    %51 = vector.load %arg3[%c0_34, %c0_35] : memref<1x128xf32, #tpu.memory_space<vmem>>, vector<1x128xf32>
    %52 = vector.broadcast %51 : vector<1x128xf32> to vector<32x128xf32>
    %53 = arith.addf %50, %52 : vector<32x128xf32>
    %c0_36 = arith.constant 0 : index
    %c0_37 = arith.constant 0 : index
    %54 = vector.load %arg6[%c0_36, %c0_37] : memref<32x128xf32, #tpu.memory_space<vmem>>, vector<32x128xf32>
    tpu.vector_store %arg6[%c0_36, %c0_37], %53 {strides = array<i32>} : memref<32x128xf32, #tpu.memory_space<vmem>>, vector<32x128xf32>,
    return
  }
}

module attributes {stable_mosaic.version = 11 : i64} {
  func.func @_conv_bn_add_kernel(%arg0: memref<32x128xf32, #tpu.memory_space<vmem>>, %arg1: memref<3x128x128xf32, #tpu.memory_space<vmem>>, %arg2: memref<1x128xf32, #tpu.memory_space<vmem>>, %arg3: memref<1x128xf32, #tpu.memory_space<vmem>>, %arg4: memref<128x8xf32, #tpu.memory_space<vmem>>, %arg5: memref<8x128xf32, #tpu.memory_space<vmem>>, %arg6: memref<32x128xf32, #tpu.memory_space<vmem>>, %arg7: memref<32x128xf32, #tpu.memory_space<vmem>>, %arg8: memref<32x128xf32, #tpu.memory_space<vmem>>, %arg9: memref<36x128xf32, #tpu.memory_space<vmem>>) attributes {dimension_semantics = [], scalar_prefetch = 0 : i64, scratch_operands = 1 : i64, tpu.core_type = #tpu.core_type<tc>} {
    %cst = arith.constant 0.000000e+00 : f32
    %0 = vector.broadcast %cst : f32 to vector<36x128xf32>
    %c0 = arith.constant 0 : index
    %c0_0 = arith.constant 0 : index
    %1 = vector.load %arg9[%c0, %c0_0] : memref<36x128xf32, #tpu.memory_space<vmem>>, vector<36x128xf32>
    tpu.vector_store %arg9[%c0, %c0_0], %0 {strides = array<i32>} : memref<36x128xf32, #tpu.memory_space<vmem>>, vector<36x128xf32>,
    %c0_1 = arith.constant 0 : index
    %c0_2 = arith.constant 0 : index
    %2 = vector.load %arg0[%c0_1, %c0_2] : memref<32x128xf32, #tpu.memory_space<vmem>>, vector<16x128xf32>
    %c1 = arith.constant 1 : index
    %c0_3 = arith.constant 0 : index
    %3 = vector.load %arg9[%c1, %c0_3] : memref<36x128xf32, #tpu.memory_space<vmem>>, vector<16x128xf32>
    tpu.vector_store %arg9[%c1, %c0_3], %2 {strides = array<i32>} : memref<36x128xf32, #tpu.memory_space<vmem>>, vector<16x128xf32>,
    %c16 = arith.constant 16 : index
    %c0_4 = arith.constant 0 : index
    %4 = vector.load %arg0[%c16, %c0_4] : memref<32x128xf32, #tpu.memory_space<vmem>>, vector<16x128xf32>
    %c19 = arith.constant 19 : index
    %c0_5 = arith.constant 0 : index
    %5 = vector.load %arg9[%c19, %c0_5] : memref<36x128xf32, #tpu.memory_space<vmem>>, vector<16x128xf32>
    tpu.vector_store %arg9[%c19, %c0_5], %4 {strides = array<i32>} : memref<36x128xf32, #tpu.memory_space<vmem>>, vector<16x128xf32>,
    %c0_6 = arith.constant 0 : index
    %c0_7 = arith.constant 0 : index
    %6 = vector.load %arg9[%c0_6, %c0_7] : memref<36x128xf32, #tpu.memory_space<vmem>>, vector<36x128xf32>
    %c0_8 = arith.constant 0 : index
    %c0_9 = arith.constant 0 : index
    %c0_10 = arith.constant 0 : index
    %7 = vector.load %arg1[%c0_8, %c0_9, %c0_10] : memref<3x128x128xf32, #tpu.memory_space<vmem>>, vector<1x128x128xf32>
    %8 = vector.shape_cast %7 : vector<1x128x128xf32> to vector<128x128xf32>
    %cst_11 = arith.constant dense<0.000000e+00> : vector<36x128xf32>
    %9 = tpu.matmul %6, %8, %cst_11 {dimension_numbers = #tpu.dot_dimension_numbers<[1], [0], [0], [1], [0, 0, 1, 1], [], []>} : vector<36x128xf32>, vector<128x128xf32>, vector<36x128xf32> -> vector<36x128xf32>
    %c1_12 = arith.constant 1 : index
    %c0_13 = arith.constant 0 : index
    %c0_14 = arith.constant 0 : index
    %10 = vector.load %arg1[%c1_12, %c0_13, %c0_14] : memref<3x128x128xf32, #tpu.memory_space<vmem>>, vector<1x128x128xf32>
    %11 = vector.shape_cast %10 : vector<1x128x128xf32> to vector<128x128xf32>
    %cst_15 = arith.constant dense<0.000000e+00> : vector<36x128xf32>
    %12 = tpu.matmul %6, %11, %cst_15 {dimension_numbers = #tpu.dot_dimension_numbers<[1], [0], [0], [1], [0, 0, 1, 1], [], []>} : vector<36x128xf32>, vector<128x128xf32>, vector<36x128xf32> -> vector<36x128xf32>
    %c2 = arith.constant 2 : index
    %c0_16 = arith.constant 0 : index
    %c0_17 = arith.constant 0 : index
    %13 = vector.load %arg1[%c2, %c0_16, %c0_17] : memref<3x128x128xf32, #tpu.memory_space<vmem>>, vector<1x128x128xf32>
    %14 = vector.shape_cast %13 : vector<1x128x128xf32> to vector<128x128xf32>
    %cst_18 = arith.constant dense<0.000000e+00> : vector<36x128xf32>
    %15 = tpu.matmul %6, %14, %cst_18 {dimension_numbers = #tpu.dot_dimension_numbers<[1], [0], [0], [1], [0, 0, 1, 1], [], []>} : vector<36x128xf32>, vector<128x128xf32>, vector<36x128xf32> -> vector<36x128xf32>
    %16 = vector.extract_strided_slice %9 {offsets = [0, 0], sizes = [16, 128], strides = [1, 1]} : vector<36x128xf32> to vector<16x128xf32>
    %17 = vector.extract_strided_slice %12 {offsets = [1, 0], sizes = [16, 128], strides = [1, 1]} : vector<36x128xf32> to vector<16x128xf32>
    %18 = arith.addf %16, %17 : vector<16x128xf32>
    %19 = vector.extract_strided_slice %15 {offsets = [2, 0], sizes = [16, 128], strides = [1, 1]} : vector<36x128xf32> to vector<16x128xf32>
    %20 = arith.addf %18, %19 : vector<16x128xf32>
    %21 = vector.extract_strided_slice %9 {offsets = [18, 0], sizes = [16, 128], strides = [1, 1]} : vector<36x128xf32> to vector<16x128xf32>
    %22 = vector.extract_strided_slice %12 {offsets = [19, 0], sizes = [16, 128], strides = [1, 1]} : vector<36x128xf32> to vector<16x128xf32>
    %23 = arith.addf %21, %22 : vector<16x128xf32>
    %24 = vector.extract_strided_slice %15 {offsets = [20, 0], sizes = [16, 128], strides = [1, 1]} : vector<36x128xf32> to vector<16x128xf32>
    %25 = arith.addf %23, %24 : vector<16x128xf32>
    %26 = tpu.concatenate %20, %25 in 0 : vector<16x128xf32>, vector<16x128xf32> -> vector<32x128xf32>
    %c0_19 = arith.constant 0 : index
    %c0_20 = arith.constant 0 : index
    %27 = vector.load %arg4[%c0_19, %c0_20] : memref<128x8xf32, #tpu.memory_space<vmem>>, vector<128x8xf32>
    %c0_21 = arith.constant 0 : index
    %c0_22 = arith.constant 0 : index
    %28 = vector.load %arg5[%c0_21, %c0_22] : memref<8x128xf32, #tpu.memory_space<vmem>>, vector<8x128xf32>
    %cst_23 = arith.constant dense<0.000000e+00> : vector<128xf32>
    %29 = vector.multi_reduction <add>, %26, %cst_23 [0] : vector<32x128xf32> to vector<128xf32>
    %30 = vector.shape_cast %29 : vector<128xf32> to vector<1x128xf32>
    %cst_24 = arith.constant dense<0.000000e+00> : vector<1x8xf32>
    %31 = tpu.matmul %30, %27, %cst_24 {dimension_numbers = #tpu.dot_dimension_numbers<[1], [0], [0], [1], [0, 0, 1, 1], [], []>} : vector<1x128xf32>, vector<128x8xf32>, vector<1x8xf32> -> vector<1x8xf32>
    %cst_25 = arith.constant dense<0.000000e+00> : vector<1x128xf32>
    %32 = tpu.matmul %31, %28, %cst_25 {dimension_numbers = #tpu.dot_dimension_numbers<[1], [0], [0], [1], [0, 0, 1, 1], [], []>} : vector<1x8xf32>, vector<8x128xf32>, vector<1x128xf32> -> vector<1x128xf32>
    %cst_26 = arith.constant 0.001953125 : f32
    %33 = vector.broadcast %cst_26 : f32 to vector<1x128xf32>
    %34 = arith.mulf %32, %33 : vector<1x128xf32>
    %35 = vector.broadcast %34 : vector<1x128xf32> to vector<32x128xf32>
    %36 = arith.subf %26, %35 : vector<32x128xf32>
    %37 = arith.mulf %36, %36 : vector<32x128xf32>
    %cst_27 = arith.constant dense<0.000000e+00> : vector<128xf32>
    %38 = vector.multi_reduction <add>, %37, %cst_27 [0] : vector<32x128xf32> to vector<128xf32>
    %39 = vector.shape_cast %38 : vector<128xf32> to vector<1x128xf32>
    %cst_28 = arith.constant dense<0.000000e+00> : vector<1x8xf32>
    %40 = tpu.matmul %39, %27, %cst_28 {dimension_numbers = #tpu.dot_dimension_numbers<[1], [0], [0], [1], [0, 0, 1, 1], [], []>} : vector<1x128xf32>, vector<128x8xf32>, vector<1x8xf32> -> vector<1x8xf32>
    %cst_29 = arith.constant dense<0.000000e+00> : vector<1x128xf32>
    %41 = tpu.matmul %40, %28, %cst_29 {dimension_numbers = #tpu.dot_dimension_numbers<[1], [0], [0], [1], [0, 0, 1, 1], [], []>} : vector<1x8xf32>, vector<8x128xf32>, vector<1x128xf32> -> vector<1x128xf32>
    %cst_30 = arith.constant 0.001953125 : f32
    %42 = vector.broadcast %cst_30 : f32 to vector<1x128xf32>
    %43 = arith.mulf %41, %42 : vector<1x128xf32>
    %c0_31 = arith.constant 0 : index
    %c0_32 = arith.constant 0 : index
    %44 = vector.load %arg2[%c0_31, %c0_32] : memref<1x128xf32, #tpu.memory_space<vmem>>, vector<1x128xf32>
    %cst_33 = arith.constant 9.99999974E-6 : f32
    %45 = vector.broadcast %cst_33 : f32 to vector<1x128xf32>
    %46 = arith.addf %43, %45 : vector<1x128xf32>
    %47 = math.rsqrt %46 : vector<1x128xf32>
    %48 = arith.mulf %44, %47 : vector<1x128xf32>
    %49 = vector.broadcast %48 : vector<1x128xf32> to vector<32x128xf32>
    %50 = arith.mulf %36, %49 : vector<32x128xf32>
    %c0_34 = arith.constant 0 : index
    %c0_35 = arith.constant 0 : index
    %51 = vector.load %arg3[%c0_34, %c0_35] : memref<1x128xf32, #tpu.memory_space<vmem>>, vector<1x128xf32>
    %52 = vector.broadcast %51 : vector<1x128xf32> to vector<32x128xf32>
    %53 = arith.addf %50, %52 : vector<32x128xf32>
    %c0_36 = arith.constant 0 : index
    %c0_37 = arith.constant 0 : index
    %54 = vector.load %arg6[%c0_36, %c0_37] : memref<32x128xf32, #tpu.memory_space<vmem>>, vector<32x128xf32>
    %55 = arith.addf %53, %54 : vector<32x128xf32>
    %c0_38 = arith.constant 0 : index
    %c0_39 = arith.constant 0 : index
    %56 = vector.load %arg7[%c0_38, %c0_39] : memref<32x128xf32, #tpu.memory_space<vmem>>, vector<32x128xf32>
    %57 = arith.addf %55, %56 : vector<32x128xf32>
    %c0_40 = arith.constant 0 : index
    %c0_41 = arith.constant 0 : index
    %58 = vector.load %arg8[%c0_40, %c0_41] : memref<32x128xf32, #tpu.memory_space<vmem>>, vector<32x128xf32>
    tpu.vector_store %arg8[%c0_40, %c0_41], %57 {strides = array<i32>} : memref<32x128xf32, #tpu.memory_space<vmem>>, vector<32x128xf32>,
    return
  }
}

module attributes {stable_mosaic.version = 11 : i64} {
  func.func @_conv_bn_add_kernel(%arg0: memref<32x128xf32, #tpu.memory_space<vmem>>, %arg1: memref<3x128x128xf32, #tpu.memory_space<vmem>>, %arg2: memref<1x128xf32, #tpu.memory_space<vmem>>, %arg3: memref<1x128xf32, #tpu.memory_space<vmem>>, %arg4: memref<128x8xf32, #tpu.memory_space<vmem>>, %arg5: memref<8x128xf32, #tpu.memory_space<vmem>>, %arg6: memref<32x128xf32, #tpu.memory_space<vmem>>, %arg7: memref<32x128xf32, #tpu.memory_space<vmem>>, %arg8: memref<36x128xf32, #tpu.memory_space<vmem>>) attributes {dimension_semantics = [], scalar_prefetch = 0 : i64, scratch_operands = 1 : i64, tpu.core_type = #tpu.core_type<tc>} {
    %cst = arith.constant 0.000000e+00 : f32
    %0 = vector.broadcast %cst : f32 to vector<36x128xf32>
    %c0 = arith.constant 0 : index
    %c0_0 = arith.constant 0 : index
    %1 = vector.load %arg8[%c0, %c0_0] : memref<36x128xf32, #tpu.memory_space<vmem>>, vector<36x128xf32>
    tpu.vector_store %arg8[%c0, %c0_0], %0 {strides = array<i32>} : memref<36x128xf32, #tpu.memory_space<vmem>>, vector<36x128xf32>,
    %c0_1 = arith.constant 0 : index
    %c0_2 = arith.constant 0 : index
    %2 = vector.load %arg0[%c0_1, %c0_2] : memref<32x128xf32, #tpu.memory_space<vmem>>, vector<16x128xf32>
    %c1 = arith.constant 1 : index
    %c0_3 = arith.constant 0 : index
    %3 = vector.load %arg8[%c1, %c0_3] : memref<36x128xf32, #tpu.memory_space<vmem>>, vector<16x128xf32>
    tpu.vector_store %arg8[%c1, %c0_3], %2 {strides = array<i32>} : memref<36x128xf32, #tpu.memory_space<vmem>>, vector<16x128xf32>,
    %c16 = arith.constant 16 : index
    %c0_4 = arith.constant 0 : index
    %4 = vector.load %arg0[%c16, %c0_4] : memref<32x128xf32, #tpu.memory_space<vmem>>, vector<16x128xf32>
    %c19 = arith.constant 19 : index
    %c0_5 = arith.constant 0 : index
    %5 = vector.load %arg8[%c19, %c0_5] : memref<36x128xf32, #tpu.memory_space<vmem>>, vector<16x128xf32>
    tpu.vector_store %arg8[%c19, %c0_5], %4 {strides = array<i32>} : memref<36x128xf32, #tpu.memory_space<vmem>>, vector<16x128xf32>,
    %c0_6 = arith.constant 0 : index
    %c0_7 = arith.constant 0 : index
    %6 = vector.load %arg8[%c0_6, %c0_7] : memref<36x128xf32, #tpu.memory_space<vmem>>, vector<36x128xf32>
    %c0_8 = arith.constant 0 : index
    %c0_9 = arith.constant 0 : index
    %c0_10 = arith.constant 0 : index
    %7 = vector.load %arg1[%c0_8, %c0_9, %c0_10] : memref<3x128x128xf32, #tpu.memory_space<vmem>>, vector<1x128x128xf32>
    %8 = vector.shape_cast %7 : vector<1x128x128xf32> to vector<128x128xf32>
    %cst_11 = arith.constant dense<0.000000e+00> : vector<36x128xf32>
    %9 = tpu.matmul %6, %8, %cst_11 {dimension_numbers = #tpu.dot_dimension_numbers<[1], [0], [0], [1], [0, 0, 1, 1], [], []>} : vector<36x128xf32>, vector<128x128xf32>, vector<36x128xf32> -> vector<36x128xf32>
    %c1_12 = arith.constant 1 : index
    %c0_13 = arith.constant 0 : index
    %c0_14 = arith.constant 0 : index
    %10 = vector.load %arg1[%c1_12, %c0_13, %c0_14] : memref<3x128x128xf32, #tpu.memory_space<vmem>>, vector<1x128x128xf32>
    %11 = vector.shape_cast %10 : vector<1x128x128xf32> to vector<128x128xf32>
    %cst_15 = arith.constant dense<0.000000e+00> : vector<36x128xf32>
    %12 = tpu.matmul %6, %11, %cst_15 {dimension_numbers = #tpu.dot_dimension_numbers<[1], [0], [0], [1], [0, 0, 1, 1], [], []>} : vector<36x128xf32>, vector<128x128xf32>, vector<36x128xf32> -> vector<36x128xf32>
    %c2 = arith.constant 2 : index
    %c0_16 = arith.constant 0 : index
    %c0_17 = arith.constant 0 : index
    %13 = vector.load %arg1[%c2, %c0_16, %c0_17] : memref<3x128x128xf32, #tpu.memory_space<vmem>>, vector<1x128x128xf32>
    %14 = vector.shape_cast %13 : vector<1x128x128xf32> to vector<128x128xf32>
    %cst_18 = arith.constant dense<0.000000e+00> : vector<36x128xf32>
    %15 = tpu.matmul %6, %14, %cst_18 {dimension_numbers = #tpu.dot_dimension_numbers<[1], [0], [0], [1], [0, 0, 1, 1], [], []>} : vector<36x128xf32>, vector<128x128xf32>, vector<36x128xf32> -> vector<36x128xf32>
    %16 = vector.extract_strided_slice %9 {offsets = [0, 0], sizes = [16, 128], strides = [1, 1]} : vector<36x128xf32> to vector<16x128xf32>
    %17 = vector.extract_strided_slice %12 {offsets = [1, 0], sizes = [16, 128], strides = [1, 1]} : vector<36x128xf32> to vector<16x128xf32>
    %18 = arith.addf %16, %17 : vector<16x128xf32>
    %19 = vector.extract_strided_slice %15 {offsets = [2, 0], sizes = [16, 128], strides = [1, 1]} : vector<36x128xf32> to vector<16x128xf32>
    %20 = arith.addf %18, %19 : vector<16x128xf32>
    %21 = vector.extract_strided_slice %9 {offsets = [18, 0], sizes = [16, 128], strides = [1, 1]} : vector<36x128xf32> to vector<16x128xf32>
    %22 = vector.extract_strided_slice %12 {offsets = [19, 0], sizes = [16, 128], strides = [1, 1]} : vector<36x128xf32> to vector<16x128xf32>
    %23 = arith.addf %21, %22 : vector<16x128xf32>
    %24 = vector.extract_strided_slice %15 {offsets = [20, 0], sizes = [16, 128], strides = [1, 1]} : vector<36x128xf32> to vector<16x128xf32>
    %25 = arith.addf %23, %24 : vector<16x128xf32>
    %26 = tpu.concatenate %20, %25 in 0 : vector<16x128xf32>, vector<16x128xf32> -> vector<32x128xf32>
    %c0_19 = arith.constant 0 : index
    %c0_20 = arith.constant 0 : index
    %27 = vector.load %arg4[%c0_19, %c0_20] : memref<128x8xf32, #tpu.memory_space<vmem>>, vector<128x8xf32>
    %c0_21 = arith.constant 0 : index
    %c0_22 = arith.constant 0 : index
    %28 = vector.load %arg5[%c0_21, %c0_22] : memref<8x128xf32, #tpu.memory_space<vmem>>, vector<8x128xf32>
    %cst_23 = arith.constant dense<0.000000e+00> : vector<128xf32>
    %29 = vector.multi_reduction <add>, %26, %cst_23 [0] : vector<32x128xf32> to vector<128xf32>
    %30 = vector.shape_cast %29 : vector<128xf32> to vector<1x128xf32>
    %cst_24 = arith.constant dense<0.000000e+00> : vector<1x8xf32>
    %31 = tpu.matmul %30, %27, %cst_24 {dimension_numbers = #tpu.dot_dimension_numbers<[1], [0], [0], [1], [0, 0, 1, 1], [], []>} : vector<1x128xf32>, vector<128x8xf32>, vector<1x8xf32> -> vector<1x8xf32>
    %cst_25 = arith.constant dense<0.000000e+00> : vector<1x128xf32>
    %32 = tpu.matmul %31, %28, %cst_25 {dimension_numbers = #tpu.dot_dimension_numbers<[1], [0], [0], [1], [0, 0, 1, 1], [], []>} : vector<1x8xf32>, vector<8x128xf32>, vector<1x128xf32> -> vector<1x128xf32>
    %cst_26 = arith.constant 0.001953125 : f32
    %33 = vector.broadcast %cst_26 : f32 to vector<1x128xf32>
    %34 = arith.mulf %32, %33 : vector<1x128xf32>
    %35 = vector.broadcast %34 : vector<1x128xf32> to vector<32x128xf32>
    %36 = arith.subf %26, %35 : vector<32x128xf32>
    %37 = arith.mulf %36, %36 : vector<32x128xf32>
    %cst_27 = arith.constant dense<0.000000e+00> : vector<128xf32>
    %38 = vector.multi_reduction <add>, %37, %cst_27 [0] : vector<32x128xf32> to vector<128xf32>
    %39 = vector.shape_cast %38 : vector<128xf32> to vector<1x128xf32>
    %cst_28 = arith.constant dense<0.000000e+00> : vector<1x8xf32>
    %40 = tpu.matmul %39, %27, %cst_28 {dimension_numbers = #tpu.dot_dimension_numbers<[1], [0], [0], [1], [0, 0, 1, 1], [], []>} : vector<1x128xf32>, vector<128x8xf32>, vector<1x8xf32> -> vector<1x8xf32>
    %cst_29 = arith.constant dense<0.000000e+00> : vector<1x128xf32>
    %41 = tpu.matmul %40, %28, %cst_29 {dimension_numbers = #tpu.dot_dimension_numbers<[1], [0], [0], [1], [0, 0, 1, 1], [], []>} : vector<1x8xf32>, vector<8x128xf32>, vector<1x128xf32> -> vector<1x128xf32>
    %cst_30 = arith.constant 0.001953125 : f32
    %42 = vector.broadcast %cst_30 : f32 to vector<1x128xf32>
    %43 = arith.mulf %41, %42 : vector<1x128xf32>
    %c0_31 = arith.constant 0 : index
    %c0_32 = arith.constant 0 : index
    %44 = vector.load %arg2[%c0_31, %c0_32] : memref<1x128xf32, #tpu.memory_space<vmem>>, vector<1x128xf32>
    %cst_33 = arith.constant 9.99999974E-6 : f32
    %45 = vector.broadcast %cst_33 : f32 to vector<1x128xf32>
    %46 = arith.addf %43, %45 : vector<1x128xf32>
    %47 = math.rsqrt %46 : vector<1x128xf32>
    %48 = arith.mulf %44, %47 : vector<1x128xf32>
    %49 = vector.broadcast %48 : vector<1x128xf32> to vector<32x128xf32>
    %50 = arith.mulf %36, %49 : vector<32x128xf32>
    %c0_34 = arith.constant 0 : index
    %c0_35 = arith.constant 0 : index
    %51 = vector.load %arg3[%c0_34, %c0_35] : memref<1x128xf32, #tpu.memory_space<vmem>>, vector<1x128xf32>
    %52 = vector.broadcast %51 : vector<1x128xf32> to vector<32x128xf32>
    %53 = arith.addf %50, %52 : vector<32x128xf32>
    %c0_36 = arith.constant 0 : index
    %c0_37 = arith.constant 0 : index
    %54 = vector.load %arg6[%c0_36, %c0_37] : memref<32x128xf32, #tpu.memory_space<vmem>>, vector<32x128xf32>
    %55 = arith.addf %53, %54 : vector<32x128xf32>
    %c0_38 = arith.constant 0 : index
    %c0_39 = arith.constant 0 : index
    %56 = vector.load %arg7[%c0_38, %c0_39] : memref<32x128xf32, #tpu.memory_space<vmem>>, vector<32x128xf32>
    tpu.vector_store %arg7[%c0_38, %c0_39], %55 {strides = array<i32>} : memref<32x128xf32, #tpu.memory_space<vmem>>, vector<32x128xf32>,
    return
  }
}

module attributes {stable_mosaic.version = 11 : i64} {
  func.func @_conv_bn_add_kernel(%arg0: memref<32x128xf32, #tpu.memory_space<vmem>>, %arg1: memref<3x128x128xf32, #tpu.memory_space<vmem>>, %arg2: memref<1x128xf32, #tpu.memory_space<vmem>>, %arg3: memref<1x128xf32, #tpu.memory_space<vmem>>, %arg4: memref<128x8xf32, #tpu.memory_space<vmem>>, %arg5: memref<8x128xf32, #tpu.memory_space<vmem>>, %arg6: memref<32x128xf32, #tpu.memory_space<vmem>>, %arg7: memref<32x128xf32, #tpu.memory_space<vmem>>, %arg8: memref<32x128xf32, #tpu.memory_space<vmem>>, %arg9: memref<36x128xf32, #tpu.memory_space<vmem>>) attributes {dimension_semantics = [], scalar_prefetch = 0 : i64, scratch_operands = 1 : i64, tpu.core_type = #tpu.core_type<tc>} {
    %cst = arith.constant 0.000000e+00 : f32
    %0 = vector.broadcast %cst : f32 to vector<36x128xf32>
    %c0 = arith.constant 0 : index
    %c0_0 = arith.constant 0 : index
    %1 = vector.load %arg9[%c0, %c0_0] : memref<36x128xf32, #tpu.memory_space<vmem>>, vector<36x128xf32>
    tpu.vector_store %arg9[%c0, %c0_0], %0 {strides = array<i32>} : memref<36x128xf32, #tpu.memory_space<vmem>>, vector<36x128xf32>,
    %c0_1 = arith.constant 0 : index
    %c0_2 = arith.constant 0 : index
    %2 = vector.load %arg0[%c0_1, %c0_2] : memref<32x128xf32, #tpu.memory_space<vmem>>, vector<16x128xf32>
    %c1 = arith.constant 1 : index
    %c0_3 = arith.constant 0 : index
    %3 = vector.load %arg9[%c1, %c0_3] : memref<36x128xf32, #tpu.memory_space<vmem>>, vector<16x128xf32>
    tpu.vector_store %arg9[%c1, %c0_3], %2 {strides = array<i32>} : memref<36x128xf32, #tpu.memory_space<vmem>>, vector<16x128xf32>,
    %c16 = arith.constant 16 : index
    %c0_4 = arith.constant 0 : index
    %4 = vector.load %arg0[%c16, %c0_4] : memref<32x128xf32, #tpu.memory_space<vmem>>, vector<16x128xf32>
    %c19 = arith.constant 19 : index
    %c0_5 = arith.constant 0 : index
    %5 = vector.load %arg9[%c19, %c0_5] : memref<36x128xf32, #tpu.memory_space<vmem>>, vector<16x128xf32>
    tpu.vector_store %arg9[%c19, %c0_5], %4 {strides = array<i32>} : memref<36x128xf32, #tpu.memory_space<vmem>>, vector<16x128xf32>,
    %c0_6 = arith.constant 0 : index
    %c0_7 = arith.constant 0 : index
    %6 = vector.load %arg9[%c0_6, %c0_7] : memref<36x128xf32, #tpu.memory_space<vmem>>, vector<36x128xf32>
    %c0_8 = arith.constant 0 : index
    %c0_9 = arith.constant 0 : index
    %c0_10 = arith.constant 0 : index
    %7 = vector.load %arg1[%c0_8, %c0_9, %c0_10] : memref<3x128x128xf32, #tpu.memory_space<vmem>>, vector<1x128x128xf32>
    %8 = vector.shape_cast %7 : vector<1x128x128xf32> to vector<128x128xf32>
    %cst_11 = arith.constant dense<0.000000e+00> : vector<36x128xf32>
    %9 = tpu.matmul %6, %8, %cst_11 {dimension_numbers = #tpu.dot_dimension_numbers<[1], [0], [0], [1], [0, 0, 1, 1], [], []>} : vector<36x128xf32>, vector<128x128xf32>, vector<36x128xf32> -> vector<36x128xf32>
    %c1_12 = arith.constant 1 : index
    %c0_13 = arith.constant 0 : index
    %c0_14 = arith.constant 0 : index
    %10 = vector.load %arg1[%c1_12, %c0_13, %c0_14] : memref<3x128x128xf32, #tpu.memory_space<vmem>>, vector<1x128x128xf32>
    %11 = vector.shape_cast %10 : vector<1x128x128xf32> to vector<128x128xf32>
    %cst_15 = arith.constant dense<0.000000e+00> : vector<36x128xf32>
    %12 = tpu.matmul %6, %11, %cst_15 {dimension_numbers = #tpu.dot_dimension_numbers<[1], [0], [0], [1], [0, 0, 1, 1], [], []>} : vector<36x128xf32>, vector<128x128xf32>, vector<36x128xf32> -> vector<36x128xf32>
    %c2 = arith.constant 2 : index
    %c0_16 = arith.constant 0 : index
    %c0_17 = arith.constant 0 : index
    %13 = vector.load %arg1[%c2, %c0_16, %c0_17] : memref<3x128x128xf32, #tpu.memory_space<vmem>>, vector<1x128x128xf32>
    %14 = vector.shape_cast %13 : vector<1x128x128xf32> to vector<128x128xf32>
    %cst_18 = arith.constant dense<0.000000e+00> : vector<36x128xf32>
    %15 = tpu.matmul %6, %14, %cst_18 {dimension_numbers = #tpu.dot_dimension_numbers<[1], [0], [0], [1], [0, 0, 1, 1], [], []>} : vector<36x128xf32>, vector<128x128xf32>, vector<36x128xf32> -> vector<36x128xf32>
    %16 = vector.extract_strided_slice %9 {offsets = [0, 0], sizes = [16, 128], strides = [1, 1]} : vector<36x128xf32> to vector<16x128xf32>
    %17 = vector.extract_strided_slice %12 {offsets = [1, 0], sizes = [16, 128], strides = [1, 1]} : vector<36x128xf32> to vector<16x128xf32>
    %18 = arith.addf %16, %17 : vector<16x128xf32>
    %19 = vector.extract_strided_slice %15 {offsets = [2, 0], sizes = [16, 128], strides = [1, 1]} : vector<36x128xf32> to vector<16x128xf32>
    %20 = arith.addf %18, %19 : vector<16x128xf32>
    %21 = vector.extract_strided_slice %9 {offsets = [18, 0], sizes = [16, 128], strides = [1, 1]} : vector<36x128xf32> to vector<16x128xf32>
    %22 = vector.extract_strided_slice %12 {offsets = [19, 0], sizes = [16, 128], strides = [1, 1]} : vector<36x128xf32> to vector<16x128xf32>
    %23 = arith.addf %21, %22 : vector<16x128xf32>
    %24 = vector.extract_strided_slice %15 {offsets = [20, 0], sizes = [16, 128], strides = [1, 1]} : vector<36x128xf32> to vector<16x128xf32>
    %25 = arith.addf %23, %24 : vector<16x128xf32>
    %26 = tpu.concatenate %20, %25 in 0 : vector<16x128xf32>, vector<16x128xf32> -> vector<32x128xf32>
    %c0_19 = arith.constant 0 : index
    %c0_20 = arith.constant 0 : index
    %27 = vector.load %arg4[%c0_19, %c0_20] : memref<128x8xf32, #tpu.memory_space<vmem>>, vector<128x8xf32>
    %c0_21 = arith.constant 0 : index
    %c0_22 = arith.constant 0 : index
    %28 = vector.load %arg5[%c0_21, %c0_22] : memref<8x128xf32, #tpu.memory_space<vmem>>, vector<8x128xf32>
    %cst_23 = arith.constant dense<0.000000e+00> : vector<128xf32>
    %29 = vector.multi_reduction <add>, %26, %cst_23 [0] : vector<32x128xf32> to vector<128xf32>
    %30 = vector.shape_cast %29 : vector<128xf32> to vector<1x128xf32>
    %cst_24 = arith.constant dense<0.000000e+00> : vector<1x8xf32>
    %31 = tpu.matmul %30, %27, %cst_24 {dimension_numbers = #tpu.dot_dimension_numbers<[1], [0], [0], [1], [0, 0, 1, 1], [], []>} : vector<1x128xf32>, vector<128x8xf32>, vector<1x8xf32> -> vector<1x8xf32>
    %cst_25 = arith.constant dense<0.000000e+00> : vector<1x128xf32>
    %32 = tpu.matmul %31, %28, %cst_25 {dimension_numbers = #tpu.dot_dimension_numbers<[1], [0], [0], [1], [0, 0, 1, 1], [], []>} : vector<1x8xf32>, vector<8x128xf32>, vector<1x128xf32> -> vector<1x128xf32>
    %cst_26 = arith.constant 0.001953125 : f32
    %33 = vector.broadcast %cst_26 : f32 to vector<1x128xf32>
    %34 = arith.mulf %32, %33 : vector<1x128xf32>
    %35 = vector.broadcast %34 : vector<1x128xf32> to vector<32x128xf32>
    %36 = arith.subf %26, %35 : vector<32x128xf32>
    %37 = arith.mulf %36, %36 : vector<32x128xf32>
    %cst_27 = arith.constant dense<0.000000e+00> : vector<128xf32>
    %38 = vector.multi_reduction <add>, %37, %cst_27 [0] : vector<32x128xf32> to vector<128xf32>
    %39 = vector.shape_cast %38 : vector<128xf32> to vector<1x128xf32>
    %cst_28 = arith.constant dense<0.000000e+00> : vector<1x8xf32>
    %40 = tpu.matmul %39, %27, %cst_28 {dimension_numbers = #tpu.dot_dimension_numbers<[1], [0], [0], [1], [0, 0, 1, 1], [], []>} : vector<1x128xf32>, vector<128x8xf32>, vector<1x8xf32> -> vector<1x8xf32>
    %cst_29 = arith.constant dense<0.000000e+00> : vector<1x128xf32>
    %41 = tpu.matmul %40, %28, %cst_29 {dimension_numbers = #tpu.dot_dimension_numbers<[1], [0], [0], [1], [0, 0, 1, 1], [], []>} : vector<1x8xf32>, vector<8x128xf32>, vector<1x128xf32> -> vector<1x128xf32>
    %cst_30 = arith.constant 0.001953125 : f32
    %42 = vector.broadcast %cst_30 : f32 to vector<1x128xf32>
    %43 = arith.mulf %41, %42 : vector<1x128xf32>
    %c0_31 = arith.constant 0 : index
    %c0_32 = arith.constant 0 : index
    %44 = vector.load %arg2[%c0_31, %c0_32] : memref<1x128xf32, #tpu.memory_space<vmem>>, vector<1x128xf32>
    %cst_33 = arith.constant 9.99999974E-6 : f32
    %45 = vector.broadcast %cst_33 : f32 to vector<1x128xf32>
    %46 = arith.addf %43, %45 : vector<1x128xf32>
    %47 = math.rsqrt %46 : vector<1x128xf32>
    %48 = arith.mulf %44, %47 : vector<1x128xf32>
    %49 = vector.broadcast %48 : vector<1x128xf32> to vector<32x128xf32>
    %50 = arith.mulf %36, %49 : vector<32x128xf32>
    %c0_34 = arith.constant 0 : index
    %c0_35 = arith.constant 0 : index
    %51 = vector.load %arg3[%c0_34, %c0_35] : memref<1x128xf32, #tpu.memory_space<vmem>>, vector<1x128xf32>
    %52 = vector.broadcast %51 : vector<1x128xf32> to vector<32x128xf32>
    %53 = arith.addf %50, %52 : vector<32x128xf32>
    %c0_36 = arith.constant 0 : index
    %c0_37 = arith.constant 0 : index
    %54 = vector.load %arg6[%c0_36, %c0_37] : memref<32x128xf32, #tpu.memory_space<vmem>>, vector<32x128xf32>
    %55 = arith.addf %53, %54 : vector<32x128xf32>
    %c0_38 = arith.constant 0 : index
    %c0_39 = arith.constant 0 : index
    %56 = vector.load %arg7[%c0_38, %c0_39] : memref<32x128xf32, #tpu.memory_space<vmem>>, vector<32x128xf32>
    %57 = arith.addf %55, %56 : vector<32x128xf32>
    %c0_40 = arith.constant 0 : index
    %c0_41 = arith.constant 0 : index
    %58 = vector.load %arg8[%c0_40, %c0_41] : memref<32x128xf32, #tpu.memory_space<vmem>>, vector<32x128xf32>
    tpu.vector_store %arg8[%c0_40, %c0_41], %57 {strides = array<i32>} : memref<32x128xf32, #tpu.memory_space<vmem>>, vector<32x128xf32>,
    return
  }
}

</mosaic_0001>

<bundles_post_ra>
// kernel: _forward_impl.4
= control target key start
LH: loop header
LB: loop body
LE: loop exit
PB: predicated region body
PF: predicated region fallthrough
CT: control target
= control target key end

     0   :  { %12 = vsyncpa [#allocation4], 0  ;;  %s1850_s0 = inlined_call_operand.hbm [shape: f32[32,128], index: 0, kind: input, shape index: {}]   ;;  %s1851_s1 = inlined_call_operand.vmem [shape: f32[3,128,128], index: 1, kind: input, shape index: {}]   ;;  %s1852_s2 = inlined_call_operand.vmem [shape: f32[1,128], index: 2, kind: input, shape index: {}]   ;;  %s1853_s3 = inlined_call_operand.vmem [shape: f32[1,128], index: 3, kind: input, shape index: {}]   ;;  %s1854_s4 = inlined_call_operand.vmem [shape: f32[128,8], index: 4, kind: input, shape index: {}]   ;;  %s1855_s5 = inlined_call_operand.hbm [shape: f32[8,128], index: 5, kind: input, shape index: {}]   ;;  %s1856_s6 = inlined_call_operand.hbm [shape: f32[32,128], index: 6, kind: input, shape index: {}]   ;;  %s1857_s7 = inlined_call_operand.hbm [shape: f32[32,128], index: 7, kind: output, shape index: {}]  }
   0x1   :  { %13 = vsyncpa [#allocation7], 0 }
   0x2   :  { %14 = vsyncpa [#allocation5], 0  ;;  %s1437_s24 = smov [#allocation6]   ;;  %s1438_s26 = smov [#allocation3]  }
   0x3   :  { %s41_s25 = sshll.u32 %s1437_s24, 4  ;;  %s20_s27 = sshll.u32 %s1438_s26, 4  ;;  %s42_s25 = int_to_ptr.vmem [resolvable:$true] %s41_s25  ;;  %s1486_s27 = int_to_ptr.vmem [resolvable:$true] %s20_s27 }
   0x4   :  { %s1343_s30 = scalar_lea.hbm %s1855_s5, 128 }
   0x5   :  { %p1344_p0 = scmp.ne.s32.totalorder %s1855_s5, %s1343_s30  ;;  %p1347_p1 = scmp.lt.u32.totalorder %s1343_s30, %s1855_s5 }
   0x7   :  { %p1349_p2 = pnand %p1347_p1, %p1344_p0 }
   0x9   :  { %1352 = shalt.err (!%p1349_p2)
}
   0xa   :  { %s1353_s12 = scalar_lea.vmem %s42_s25, 128  ;;  %p1358_p4 = scmp.lt.s32.totalorder %s42_s25, %s42_s25 }
   0xb   :  { %p1354_p3 = scmp.ne.s32.totalorder %s42_s25, %s1353_s12  ;;  %p1359_p5 = scmp.lt.s32.totalorder %s1353_s12, %s1353_s12 }
   0xd   :  { %p1360_p6 = por %p1359_p5, %p1358_p4 }
   0xf   :  { %p1361_p7 = pnand %p1360_p6, %p1354_p3 }
  0x11   :  { %1364 = shalt.err (!%p1361_p7)
}
  0x12   :  { %44 = dma.hbm_to_vmem [thread:$0]  %s1855_s5, 128, %s42_s25, [#allocation7]  }
  0x13   :  { %s1365_s17 = scalar_lea.hbm %s1850_s0, 512 }
  0x14   :  { %p1366_p8 = scmp.ne.s32.totalorder %s1850_s0, %s1365_s17  ;;  %p1369_p9 = scmp.lt.u32.totalorder %s1365_s17, %s1850_s0 }
  0x16   :  { %p1371_p10 = pnand %p1369_p9, %p1366_p8 }
  0x18   :  { %1374 = shalt.err (!%p1371_p10)
}
  0x19   :  { %s1375_s22 = scalar_lea.vmem %s1486_s27, 512  ;;  %p1380_p12 = scmp.lt.s32.totalorder %s1486_s27, %s1486_s27 }
  0x1a   :  { %p1376_p11 = scmp.ne.s32.totalorder %s1486_s27, %s1375_s22  ;;  %p1381_p13 = scmp.lt.s32.totalorder %s1375_s22, %s1375_s22 }
  0x1c   :  { %p1382_p0 = por %p1381_p13, %p1380_p12 }
  0x1e   :  { %p1383_p1 = pnand %p1382_p0, %p1376_p11 }
  0x20   :  { %1386 = shalt.err (!%p1383_p1)
}
  0x21   :  { %s1439_s5 = smov 128   ;;  %s1440_s23 = smov 8  }
  0x22   :  { %26 = dma.hbm_to_vmem [thread:$0]  %s1850_s0, 512, %s1486_s27, [#allocation4], %s1439_s5, %s1439_s5, %s1440_s23  }
  0x23   :  { %s1441_s26 = smov [#allocation8]   ;;  %s1387_s8 = scalar_lea.hbm %s1856_s6, 512 }
  0x24   :  { %s50_s28 = sshll.u32 %s1441_s26, 4  ;;  %p1388_p2 = scmp.ne.s32.totalorder %s1856_s6, %s1387_s8  ;;  %s51_s28 = int_to_ptr.vmem [resolvable:$true] %s50_s28 }
  0x25   :  { %p1391_p3 = scmp.lt.u32.totalorder %s1387_s8, %s1856_s6 }
  0x27   :  { %p1393_p4 = pnand %p1391_p3, %p1388_p2 }
  0x29   :  { %1396 = shalt.err (!%p1393_p4)
}
  0x2a   :  { %s1397_s13 = scalar_lea.vmem %s51_s28, 512  ;;  %p1402_p6 = scmp.lt.s32.totalorder %s51_s28, %s51_s28 }
  0x2b   :  { %p1398_p5 = scmp.ne.s32.totalorder %s51_s28, %s1397_s13  ;;  %p1403_p7 = scmp.lt.s32.totalorder %s1397_s13, %s1397_s13 }
  0x2d   :  { %p1404_p8 = por %p1403_p7, %p1402_p6 }
  0x2f   :  { %p1405_p9 = pnand %p1404_p8, %p1398_p5 }
  0x31   :  { %1408 = shalt.err (!%p1405_p9)
}
  0x32   :  { %56 = dma.hbm_to_vmem [thread:$0]  %s1856_s6, 512, %s51_s28, [#allocation7], %s1439_s5, %s1439_s5, %s1440_s23  }
  0x33   :  { %1431 = dma.done.wait [#allocation4], 512  }
  0x34   :  { %1432 = vsyncadd [#allocation4], 4294966784 }
  0x35   :  { %1433 = dma.done.wait [#allocation7], 640  }
  0x36   :  { %1434 = vsyncadd [#allocation7], 4294966656  ;;  %v1442_v0 = vmov 0.0|0.0   ;;  %v1443_v1 = vmov 0.0   ;;  %vm1444_vm0 = vmmov 0   ;;  %v84_v2 = vld [vmem:[%s1851_s1] sm:$0xff] }
  0x37   :  { %1212 = vmatprep.subr.bf16.mxu0 %v1442_v0  ;;  %1236 = vmatprep.subr.bf16.mxu1 %v1442_v0  ;;  %66 = vst [vmem:[#allocation2] sm:$0xff] %v1443_v1  ;;  %67 = vst [vmem:[#allocation2 + $0x8] sm:$0xff] %v1443_v1  ;;  %v85_v3 = vld [vmem:[%s1851_s1 + $0x8] sm:$0xff]  ;;  %v855_v4 = vld [vmem:[%s1851_s1 + $0x80] sm:$0xff]  ;;  %vm407_vm1 = vcmask 1046528   ;;  %vm420_vm2 = vcmask 1045504  }
  0x38   :  { %68 = vst [vmem:[#allocation2 + $0x10] sm:$0xff] %v1443_v1  ;;  %69 = vst [vmem:[#allocation2 + $0x18] sm:$0xff] %v1443_v1  ;;  %1023 = vmatprep.mubr.msk.f32.mxu0 %vm1444_vm0, %v1443_v1  ;;  %1070 = vmatprep.mubr.msk.f32.mxu1 %vm1444_vm0, %v1443_v1  ;;  %v1213_v5 = vpack.c.bf16 %v85_v3, %v84_v2  ;;  %v856_v6 = vld [vmem:[%s1851_s1 + $0x88] sm:$0xff]  ;;  %v86_v7 = vld [vmem:[%s1851_s1 + $0x10] sm:$0xff]  ;;  %vm560_vm3 = vcmask 64512   ;;  %s1445_s22 = smov [#allocation9]  }
  0x39   :  { %70 = vst [vmem:[#allocation2 + $0x20] sm:$0xf] %v1443_v1  ;;  %v87_v8 = vld [vmem:[%s1851_s1 + $0x18] sm:$0xff]  ;;  %v1237_v9 = vpack.c.bf16 %v856_v6, %v855_v4  ;;  %v857_v10 = vld [vmem:[%s1851_s1 + $0x90] sm:$0xff]  ;;  %v88_v14 = vld [vmem:[%s1851_s1 + $0x20] sm:$0xff]  ;;  %s842_s24 = sshll.u32 %s1445_s22, 4  ;;  %s843_s24 = int_to_ptr.vmem [resolvable:$true] %s842_s24 }
  0x3a   :  { %v858_v11 = vld [vmem:[%s1851_s1 + $0x98] sm:$0xff]  ;;  %1214 = vmatpush3.bf16.msra.mxu0 %v1213_v5  ;;  %v1216_v12 = vpack.c.bf16 %v87_v8, %v86_v7  ;;  %v89_v15 = vld [vmem:[%s1851_s1 + $0x28] sm:$0xff]  ;;  %v859_v16 = vld [vmem:[%s1851_s1 + $0xa0] sm:$0xff]  ;;  %p1414_p11 = scmp.lt.s32.totalorder %s843_s24, %s843_s24 }
  0x3b   :  { %1238 = vmatpush3.bf16.msra.mxu1 %v1237_v9  ;;  %1215 = vmatprep.subr.bf16.mxu0 %v1442_v0  ;;  %v1240_v13 = vpack.c.bf16 %v858_v11, %v857_v10  ;;  %v860_v17 = vld [vmem:[%s1851_s1 + $0xa8] sm:$0xff]  ;;  %v1219_v18 = vpack.c.bf16 %v89_v15, %v88_v14  ;;  %v90_v20 = vld [vmem:[%s1851_s1 + $0x30] sm:$0xff]  ;;  %v91_v21 = vld [vmem:[%s1851_s1 + $0x38] sm:$0xff] }
  0x3c   :  { %1239 = vmatprep.subr.bf16.mxu1 %v1442_v0  ;;  %v1243_v19 = vpack.c.bf16 %v860_v17, %v859_v16  ;;  %v861_v22 = vld [vmem:[%s1851_s1 + $0xb0] sm:$0xff]  ;;  %v862_v23 = vld [vmem:[%s1851_s1 + $0xb8] sm:$0xff]  ;;  %v71_v24 = vld [vmem:[#allocation3] sm:$0xff]  ;;  %v1222_v25 = vpack.c.bf16 %v91_v21, %v90_v20 }
  0x3d   :  { %73 = vst [vmem:[#allocation2 + $0x1] sm:$0xff] %v71_v24  ;;  %v72_v26 = vld [vmem:[#allocation3 + $0x8] sm:$0xff]  ;;  %v1246_v27 = vpack.c.bf16 %v862_v23, %v861_v22  ;;  %v92_v28 = vld [vmem:[%s1851_s1 + $0x40] sm:$0xff]  ;;  %v93_v29 = vld [vmem:[%s1851_s1 + $0x48] sm:$0xff] }
  0x3e   :  { %1217 = vmatpush3.bf16.msra.mxu0 %v1216_v12  ;;  %74 = vst [vmem:[#allocation2 + $0x9] sm:$0xff] %v72_v26  ;;  %v863_v30 = vld [vmem:[%s1851_s1 + $0xc0] sm:$0xff]  ;;  %v864_v31 = vld [vmem:[%s1851_s1 + $0xc8] sm:$0xff]  ;;  %v75_v32 = vld [vmem:[#allocation3 + $0x10] sm:$0xff]  ;;  %v1225_v34 = vpack.c.bf16 %v93_v29, %v92_v28 }
  0x3f   :  { %1241 = vmatpush3.bf16.msra.mxu1 %v1240_v13  ;;  %1218 = vmatprep.subr.bf16.mxu0 %v1442_v0  ;;  %77 = vst [vmem:[#allocation2 + $0x13] sm:$0xff] %v75_v32  ;;  %v76_v33 = vld [vmem:[#allocation3 + $0x18] sm:$0xff]  ;;  %v1249_v35 = vpack.c.bf16 %v864_v31, %v863_v30  ;;  %v94_v36 = vld [vmem:[%s1851_s1 + $0x50] sm:$0xff]  ;;  %v95_v37 = vld [vmem:[%s1851_s1 + $0x58] sm:$0xff] }
  0x40   :  { %1242 = vmatprep.subr.bf16.mxu1 %v1442_v0  ;;  %78 = vst [vmem:[#allocation2 + $0x1b] sm:$0xff] %v76_v33  ;;  %v865_v38 = vld [vmem:[%s1851_s1 + $0xd0] sm:$0xff]  ;;  %v866_v39 = vld [vmem:[%s1851_s1 + $0xd8] sm:$0xff]  ;;  %v1228_v40 = vpack.c.bf16 %v95_v37, %v94_v36  ;;  %v96_v42 = vld [vmem:[%s1851_s1 + $0x60] sm:$0xff] }
  0x41   :  { %v1252_v41 = vpack.c.bf16 %v866_v39, %v865_v38  ;;  %v97_v43 = vld [vmem:[%s1851_s1 + $0x68] sm:$0xff]  ;;  %v867_v44 = vld [vmem:[%s1851_s1 + $0xe0] sm:$0xff]  ;;  %v98_v48 = vld [vmem:[%s1851_s1 + $0x70] sm:$0xff] }
  0x42   :  { %1220 = vmatpush3.bf16.msra.mxu0 %v1219_v18  ;;  %v868_v45 = vld [vmem:[%s1851_s1 + $0xe8] sm:$0xff]  ;;  %v1231_v46 = vpack.c.bf16 %v97_v43, %v96_v42  ;;  %v99_v49 = vld [vmem:[%s1851_s1 + $0x78] sm:$0xff]  ;;  %v869_v50 = vld [vmem:[%s1851_s1 + $0xf0] sm:$0xff] }
  0x43   :  { %1244 = vmatpush3.bf16.msra.mxu1 %v1243_v19  ;;  %1221 = vmatprep.subr.bf16.mxu0 %v1442_v0  ;;  %v1255_v47 = vpack.c.bf16 %v868_v45, %v867_v44  ;;  %v870_v51 = vld [vmem:[%s1851_s1 + $0xf8] sm:$0xff]  ;;  %v1234_v52 = vpack.c.bf16 %v99_v49, %v98_v48  ;;  %v871_v54 = vld [vmem:[%s1851_s1 + $0x100] sm:$0xff]  ;;  %v872_v55 = vld [vmem:[%s1851_s1 + $0x108] sm:$0xff] }
  0x44   :  { %1245 = vmatprep.subr.bf16.mxu1 %v1442_v0  ;;  %v1258_v53 = vpack.c.bf16 %v870_v51, %v869_v50  ;;  %v1662_v56 = vld [vmem:[#allocation2] sm:$0xff]  ;;  %v1261_v57 = vpack.c.bf16 %v872_v55, %v871_v54  ;;  %v873_v58 = vld [vmem:[%s1851_s1 + $0x110] sm:$0xff]  ;;  %v874_v59 = vld [vmem:[%s1851_s1 + $0x118] sm:$0xff] }
  0x45   :  { %v1264_v60 = vpack.c.bf16 %v874_v59, %v873_v58  ;;  %v80_v61 = vld [vmem:[#allocation2 + $0x8] sm:$0xff]  ;;  %v875_v62 = vld [vmem:[%s1851_s1 + $0x120] sm:$0xff]  ;;  %v877_v4 = vld [vmem:[%s1851_s1 + $0x130] sm:$0xff] }
  0x46   :  { %1223 = vmatpush3.bf16.msra.mxu0 %v1222_v25  ;;  %v876_v63 = vld [vmem:[%s1851_s1 + $0x128] sm:$0xff]  ;;  %v81_v3 = vld [vmem:[#allocation2 + $0x10] sm:$0xff]  ;;  %v878_v5 = vld [vmem:[%s1851_s1 + $0x138] sm:$0xff] }
  0x47   :  { %1247 = vmatpush3.bf16.msra.mxu1 %v1246_v27  ;;  %1224 = vmatprep.subr.bf16.mxu0 %v1442_v0  ;;  %v1267_v2 = vpack.c.bf16 %v876_v63, %v875_v62  ;;  %v1270_v6 = vpack.c.bf16 %v878_v5, %v877_v4  ;;  %v82_v7 = vld [vmem:[#allocation2 + $0x18] sm:$0xff]  ;;  %v879_v8 = vld [vmem:[%s1851_s1 + $0x140] sm:$0xff]  ;;  %v880_v9 = vld [vmem:[%s1851_s1 + $0x148] sm:$0xff] }
  0x48   :  { %1248 = vmatprep.subr.bf16.mxu1 %v1442_v0  ;;  %v1273_v10 = vpack.c.bf16 %v880_v9, %v879_v8  ;;  %v83_v11 = vld [vmem:[#allocation2 + $0x20] sm:$0xf]  ;;  %v881_v12 = vld [vmem:[%s1851_s1 + $0x150] sm:$0xff]  ;;  %v882_v13 = vld [vmem:[%s1851_s1 + $0x158] sm:$0xff] }
  0x49   :  { %v1276_v14 = vpack.c.bf16 %v882_v13, %v881_v12  ;;  %v883_v15 = vld [vmem:[%s1851_s1 + $0x160] sm:$0xff]  ;;  %v884_v16 = vld [vmem:[%s1851_s1 + $0x168] sm:$0xff]  ;;  %v885_v18 = vld [vmem:[%s1851_s1 + $0x170] sm:$0xff] }
  0x4a   :  { %1226 = vmatpush3.bf16.msra.mxu0 %v1225_v34  ;;  %v1279_v17 = vpack.c.bf16 %v884_v16, %v883_v15  ;;  %v886_v19 = vld [vmem:[%s1851_s1 + $0x178] sm:$0xff]  ;;  %v464_v21 = vld [vmem:[%s1854_s4] sm:$0xff]  ;;  %v465_v22 = vld [vmem:[%s1854_s4 + $0x8] sm:$0xff] }
  0x4b   :  { %1250 = vmatpush3.bf16.msra.mxu1 %v1249_v35  ;;  %1227 = vmatprep.subr.bf16.mxu0 %v1442_v0  ;;  %v1282_v20 = vpack.c.bf16 %v886_v19, %v885_v18  ;;  %v1285_v23 = vpack.c.bf16 %v465_v22, %v464_v21  ;;  %v466_v24 = vld [vmem:[%s1854_s4 + $0x10] sm:$0xff]  ;;  %v467_v25 = vld [vmem:[%s1854_s4 + $0x18] sm:$0xff]  ;;  %v468_v27 = vld [vmem:[%s1854_s4 + $0x20] sm:$0xff] }
  0x4c   :  { %1251 = vmatprep.subr.bf16.mxu1 %v1442_v0  ;;  %v1288_v26 = vpack.c.bf16 %v467_v25, %v466_v24  ;;  %v469_v28 = vld [vmem:[%s1854_s4 + $0x28] sm:$0xff]  ;;  %v470_v30 = vld [vmem:[%s1854_s4 + $0x30] sm:$0xff]  ;;  %v471_v31 = vld [vmem:[%s1854_s4 + $0x38] sm:$0xff] }
  0x4d   :  { %v1291_v29 = vpack.c.bf16 %v469_v28, %v468_v27  ;;  %v1294_v32 = vpack.c.bf16 %v471_v31, %v470_v30  ;;  %v472_v33 = vld [vmem:[%s1854_s4 + $0x40] sm:$0xff]  ;;  %v473_v34 = vld [vmem:[%s1854_s4 + $0x48] sm:$0xff]  ;;  %v474_v36 = vld [vmem:[%s1854_s4 + $0x50] sm:$0xff] }
  0x4e   :  { %1229 = vmatpush3.bf16.msra.mxu0 %v1228_v40  ;;  %v1297_v35 = vpack.c.bf16 %v473_v34, %v472_v33  ;;  %v475_v37 = vld [vmem:[%s1854_s4 + $0x58] sm:$0xff]  ;;  %v476_v39 = vld [vmem:[%s1854_s4 + $0x60] sm:$0xff]  ;;  %v477_v40 = vld [vmem:[%s1854_s4 + $0x68] sm:$0xff] }
  0x4f   :  { %1253 = vmatpush3.bf16.msra.mxu1 %v1252_v41  ;;  %1230 = vmatprep.subr.bf16.mxu0 %v1442_v0  ;;  %v1300_v38 = vpack.c.bf16 %v475_v37, %v474_v36  ;;  %v1303_v41 = vpack.c.bf16 %v477_v40, %v476_v39  ;;  %v478_v42 = vld [vmem:[%s1854_s4 + $0x70] sm:$0xff]  ;;  %v479_v43 = vld [vmem:[%s1854_s4 + $0x78] sm:$0xff] }
  0x50   :  { %1254 = vmatprep.subr.bf16.mxu1 %v1442_v0  ;;  %v1306_v44 = vpack.c.bf16 %v479_v43, %v478_v42 }
  0x52   :  { %1232 = vmatpush3.bf16.msra.mxu0 %v1231_v46 }
  0x53   :  { %1256 = vmatpush3.bf16.msra.mxu1 %v1255_v47  ;;  %1233 = vmatprep.subr.bf16.mxu0 %v1442_v0 }
  0x54   :  { %1257 = vmatprep.subr.bf16.mxu1 %v1442_v0 }
  0x56   :  { %1235 = vmatpush3.bf16.msra.mxu0 %v1234_v52 }
  0x57   :  { %1259 = vmatpush3.bf16.msra.mxu1 %v1258_v53  ;;  %1260 = vmatprep.subr.bf16.mxu0 %v1442_v0 }
  0x58   :  { %1284 = vmatprep.subr.bf16.mxu1 %v1442_v0 }
  0x59   :  { %1024 = vmatmul.mubr.f32.vlgmr.msra.gmra.mrb[0].mxu0 %v1662_v56 }
  0x5a   :  { %1071 = vmatmul.mubr.f32.vlgmr.msra.gmra.mrb[0].mxu1 %v1662_v56  ;;  %1262 = vmatpush3.bf16.msra.mxu0 %v1261_v57 }
  0x5b   :  { %1073 = vmatprep.mubr.msk.f32.mxu1 %vm1444_vm0, %v1443_v1  ;;  %1263 = vmatprep.subr.bf16.mxu0 %v1442_v0 }
  0x5c   :  { %1026 = vmatprep.mubr.msk.f32.mxu0 %vm1444_vm0, %v1443_v1  ;;  %1286 = vmatpush3.bf16.msra.mxu1 %v1285_v23 }
  0x5d   :  { %1027 = vmatmul.mubr.f32.gmra.mrb[2].mxu0 %v80_v61  ;;  %1287 = vmatprep.subr.bf16.mxu1 %v1442_v0 }
  0x5e   :  { %1074 = vmatmul.mubr.f32.gmra.mrb[2].mxu1 %v80_v61  ;;  %1265 = vmatpush3.bf16.msra.mxu0 %v1264_v60 }
  0x5f   :  { %1266 = vmatprep.subr.bf16.mxu0 %v1442_v0  ;;  %1076 = vmatprep.mubr.msk.f32.mxu1 %vm1444_vm0, %v1443_v1 }
  0x60   :  { %1029 = vmatprep.mubr.msk.f32.mxu0 %vm1444_vm0, %v1443_v1  ;;  %1289 = vmatpush3.bf16.msra.mxu1 %v1288_v26 }
  0x61   :  { %1030 = vmatmul.mubr.f32.gmra.mrb[4].mxu0 %v81_v3  ;;  %1290 = vmatprep.subr.bf16.mxu1 %v1442_v0 }
  0x62   :  { %1268 = vmatpush3.bf16.msra.mxu0 %v1267_v2  ;;  %1077 = vmatmul.mubr.f32.gmra.mrb[4].mxu1 %v81_v3 }
  0x63   :  { %1269 = vmatprep.subr.bf16.mxu0 %v1442_v0  ;;  %1079 = vmatprep.mubr.msk.f32.mxu1 %vm1444_vm0, %v1443_v1 }
  0x64   :  { %1032 = vmatprep.mubr.msk.f32.mxu0 %vm1444_vm0, %v1443_v1  ;;  %1292 = vmatpush3.bf16.msra.mxu1 %v1291_v29 }
  0x65   :  { %1033 = vmatmul.mubr.f32.gmra.mrb[6].mxu0 %v82_v7  ;;  %1293 = vmatprep.subr.bf16.mxu1 %v1442_v0 }
  0x66   :  { %1271 = vmatpush3.bf16.msra.mxu0 %v1270_v6  ;;  %1080 = vmatmul.mubr.f32.gmra.mrb[6].mxu1 %v82_v7 }
  0x67   :  { %1272 = vmatprep.subr.bf16.mxu0 %v1442_v0  ;;  %1082 = vmatprep.mubr.msk.f32.mxu1 %vm1444_vm0, %v1443_v1 }
  0x68   :  { %1035 = vmatprep.mubr.msk.f32.mxu0 %vm1444_vm0, %v1443_v1  ;;  %1295 = vmatpush3.bf16.msra.mxu1 %v1294_v32 }
  0x69   :  { %1036 = vmatmul.mubr.f32.gmra.mrb[8].mxu0 %v83_v11  ;;  %1296 = vmatprep.subr.bf16.mxu1 %v1442_v0 }
  0x6a   :  { %1274 = vmatpush3.bf16.msra.mxu0 %v1273_v10  ;;  %1083 = vmatmul.mubr.f32.gmra.mrb[8].mxu1 %v83_v11 }
  0x6b   :  { %1275 = vmatprep.subr.bf16.mxu0 %v1442_v0  ;;  %1117 = vmatprep.mubr.msk.f32.mxu0 %vm1444_vm0, %v1443_v1 }
  0x6c   :  { %1164 = vmatprep.mubr.msk.f32.mxu1 %vm1444_vm0, %v1443_v1  ;;  %1298 = vmatpush3.bf16.msra.mxu1 %v1297_v35 }
  0x6d   :  { %1299 = vmatprep.subr.bf16.mxu1 %v1442_v0 }
  0x6e   :  { %1277 = vmatpush3.bf16.msra.mxu0 %v1276_v14 }
  0x6f   :  { %1278 = vmatprep.subr.bf16.mxu0 %v1442_v0 }
  0x70   :  { %1301 = vmatpush3.bf16.msra.mxu1 %v1300_v38 }
  0x71   :  { %1302 = vmatprep.subr.bf16.mxu1 %v1442_v0 }
  0x72   :  { %1280 = vmatpush3.bf16.msra.mxu0 %v1279_v17 }
  0x73   :  { %1281 = vmatprep.subr.bf16.mxu0 %v1442_v0 }
  0x74   :  { %1304 = vmatpush3.bf16.msra.mxu1 %v1303_v41 }
  0x75   :  { %1305 = vmatprep.subr.bf16.mxu1 %v1442_v0 }
  0x76   :  { %1283 = vmatpush3.bf16.msra.mxu0 %v1282_v20 }
  0x77   :  { %1308 = vmatprep.subr.bf16.mxu0 %v1442_v0 }
  0x78   :  { %1307 = vmatpush3.bf16.msra.mxu1 %v1306_v44 }
  0x79   :  { %1118 = vmatmul.mubr.f32.vlgmr.msra.gmra.mrb[10].mxu0 %v1662_v56  ;;  %1167 = vmatprep.subr.mxu1 %v1443_v1 }
  0x7a   :  { %1120 = vmatprep.mubr.msk.f32.mxu0 %vm1444_vm0, %v1443_v1  ;;  %1310 = vmatpush3.bf16.msra.mxu0 %v1285_v23 }
  0x7b   :  { %1311 = vmatprep.subr.bf16.mxu0 %v1442_v0 }
  0x7d   :  { %1121 = vmatmul.mubr.f32.gmra.mrb[12].mxu0 %v80_v61 }
  0x7e   :  { %1123 = vmatprep.mubr.msk.f32.mxu0 %vm1444_vm0, %v1443_v1  ;;  %1313 = vmatpush3.bf16.msra.mxu0 %v1288_v26 }
  0x7f   :  { %1314 = vmatprep.subr.bf16.mxu0 %v1442_v0 }
  0x81   :  { %1124 = vmatmul.mubr.f32.gmra.mrb[14].mxu0 %v81_v3 }
  0x82   :  { %1126 = vmatprep.mubr.msk.f32.mxu0 %vm1444_vm0, %v1443_v1  ;;  %1316 = vmatpush3.bf16.msra.mxu0 %v1291_v29 }
  0x83   :  { %1317 = vmatprep.subr.bf16.mxu0 %v1442_v0 }
  0x85   :  { %1127 = vmatmul.mubr.f32.gmra.mrb[16].mxu0 %v82_v7 }
  0x86   :  { %1129 = vmatprep.mubr.msk.f32.mxu0 %vm1444_vm0, %v1443_v1  ;;  %1319 = vmatpush3.bf16.msra.mxu0 %v1294_v32 }
  0x87   :  { %1320 = vmatprep.subr.bf16.mxu0 %v1442_v0 }
  0x89   :  { %1130 = vmatmul.mubr.f32.gmra.mrb[18].mxu0 %v83_v11 }
  0x8a   :  { %1204 = vmatprep.mubr.msk.f32.mxu0 %vm1444_vm0, %v1443_v1  ;;  %1322 = vmatpush3.bf16.msra.mxu0 %v1297_v35 }
  0x8b   :  { %1323 = vmatprep.subr.bf16.mxu0 %v1442_v0 }
  0x8e   :  { %1325 = vmatpush3.bf16.msra.mxu0 %v1300_v38 }
  0x8f   :  { %1326 = vmatprep.subr.bf16.mxu0 %v1442_v0 }
  0x92   :  { %1328 = vmatpush3.bf16.msra.mxu0 %v1303_v41 }
  0x93   :  { %1329 = vmatprep.subr.bf16.mxu0 %v1442_v0 }
  0x96   :  { %1331 = vmatpush3.bf16.msra.mxu0 %v1306_v44 }
 0x12c   :  { %v166_v45 = vpop.f32.mrb[0].mxu0 }
 0x12d   :  { %v1025_v46 = vpop.f32.mrb[1].mxu0  ;;  %v273_v47 = vpop.f32.mrb[0].mxu1 }
 0x12e   :  { %v1072_v48 = vpop.f32.mrb[1].mxu1  ;;  %v408_v49 = vrot.slane %v273_v47, 1 }
 0x130   :  { %v171_v50 = vpop.f32.mrb[2].mxu0 }
 0x131   :  { %v278_v51 = vpop.f32.mrb[2].mxu1  ;;  %v1028_v52 = vpop.f32.mrb[3].mxu0 }
 0x132   :  { %v409_v53 = vrot.slane %v278_v51, 1  ;;  %v1075_v54 = vpop.f32.mrb[3].mxu1 }
 0x133   :  { %v480_v54 = vld [vmem:[#allocation6] sm:$0xff] }
 0x134   :  { %v410_v55 = vsel %vm407_vm1, %v408_v49, %v409_v53  ;;  %v176_v56 = vpop.f32.mrb[4].mxu0 }
 0x135   :  { %v415_v57 = vadd.f32 %v410_v55, %v166_v45  ;;  %v283_v0 = vpop.f32.mrb[4].mxu1  ;;  %v1031_v58 = vpop.f32.mrb[5].mxu0 }
 0x136   :  { %v411_v59 = vrot.slane %v283_v0, 1  ;;  %v1078_v60 = vpop.f32.mrb[5].mxu1 }
 0x138   :  { %v412_v61 = vsel %vm407_vm1, %v409_v53, %v411_v59  ;;  %v181_v62 = vpop.f32.mrb[6].mxu0 }
 0x139   :  { %v416_v63 = vadd.f32 %v412_v61, %v171_v50  ;;  %v288_v2 = vpop.f32.mrb[6].mxu1  ;;  %v1034_v3 = vpop.f32.mrb[7].mxu0 }
 0x13a   :  { %v432_v4 = vrot.slane %v288_v2, 1  ;;  %v1081_v5 = vpop.f32.mrb[7].mxu1 }
 0x13c   :  { %v433_v6 = vsel %vm407_vm1, %v411_v59, %v432_v4  ;;  %v186_v7 = vpop.f32.mrb[8].mxu0 }
 0x13d   :  { %v439_v8 = vadd.f32 %v433_v6, %v176_v56  ;;  %v293_v9 = vpop.f32.mrb[8].mxu1  ;;  %v1037_v10 = vpop.f32.mrb[9].mxu0 }
 0x13e   :  { %v434_v11 = vrot.slane %v293_v9, 1  ;;  %v1084_v12 = vpop.f32.mrb[9].mxu1 }
 0x140   :  { %v435_v13 = vsel %vm407_vm1, %v432_v4, %v434_v11  ;;  %v441_v14 = vadd.f32 %v434_v11, %v186_v7 }
 0x141   :  { %v440_v15 = vadd.f32 %v435_v13, %v181_v62 }
 0x14c   :  { %v380_v16 = vpop.f32.mrb[10].mxu0 }
 0x14d   :  { %v1119_v17 = vpop.f32.mrb[11].mxu0  ;;  %v421_v19 = vrot.slane %v380_v16, 2 }
 0x150   :  { %v385_v18 = vpop.f32.mrb[12].mxu0 }
 0x151   :  { %v422_v20 = vrot.slane %v385_v18, 2  ;;  %v1122_v21 = vpop.f32.mrb[13].mxu0 }
 0x153   :  { %v423_v22 = vsel %vm420_vm2, %v421_v19, %v422_v20 }
 0x154   :  { %v428_v23 = vadd.f32 %v423_v22, %v415_v57  ;;  %v390_v24 = vpop.f32.mrb[14].mxu0  ;;  %v635_v57 = vlaneseq }
 0x155   :  { %v424_v25 = vrot.slane %v390_v24, 2  ;;  %v1125_v26 = vpop.f32.mrb[15].mxu0 }
 0x156   :  { %v636_v0 = vshrl.u32 %v635_v57, 7 }
 0x157   :  { %v425_v27 = vsel %vm420_vm2, %v422_v20, %v424_v25 }
 0x158   :  { %v429_v28 = vadd.f32 %v425_v27, %v416_v63  ;;  %v395_v29 = vpop.f32.mrb[16].mxu0  ;;  %v637_v58 = vsub.s32 0, %v636_v0  ;;  %v889_v27 = vld [vmem:[%s1853_s3] ss:$0 sm:$0xff] }
 0x159   :  { %v444_v30 = vrot.slane %v395_v29, 2  ;;  %v1128_v31 = vpop.f32.mrb[17].mxu0 }
 0x15a   :  { %v481_v43 = vadd.f32 %v429_v28, %v428_v23 }
 0x15b   :  { %v445_v32 = vsel %vm420_vm2, %v424_v25, %v444_v30 }
 0x15c   :  { %v451_v33 = vadd.f32 %v445_v32, %v439_v8  ;;  %v400_v34 = vpop.f32.mrb[18].mxu0  ;;  %v825_v32 = vld [vmem:[#allocation8] sm:$0xff] }
 0x15d   :  { %v446_v35 = vrot.slane %v400_v34, 2  ;;  %v1131_v36 = vpop.f32.mrb[19].mxu0  ;;  %v827_v34 = vld [vmem:[#allocation8 + $0x10] sm:$0xff] }
 0x15e   :  { %v457_v41 = vrot.slane %v451_v33, 2  ;;  %v826_v33 = vld [vmem:[#allocation8 + $0x8] sm:$0xff] }
 0x15f   :  { %v447_v37 = vsel %vm420_vm2, %v444_v30, %v446_v35  ;;  %v453_v38 = vadd.f32 %v446_v35, %v441_v14  ;;  %v828_v35 = vld [vmem:[#allocation8 + $0x18] sm:$0xff] }
 0x160   :  { %v452_v39 = vadd.f32 %v447_v37, %v440_v15 }
 0x161   :  { %v460_v40 = vrot.slane %v453_v38, 2 }
 0x162   :  { %v458_v42 = vrot.slane %v452_v39, 2 }
 0x164   :  { %v459_v44 = vsel %vm420_vm2, %v457_v41, %v458_v42  ;;  %v461_v45 = vsel %vm420_vm2, %v458_v42, %v460_v40 }
 0x165   :  { %v482_v46 = vadd.f32 %v481_v43, %v459_v44 }
 0x167   :  { %v483_v47 = vadd.f32 %v482_v46, %v461_v45 }
 0x169   :  { %v484_v48 = vrot.slane %v483_v47, 4 }
 0x16b   :  { %v485_v49 = vadd.f32 %v484_v48, %v483_v47 }
 0x16d   :  { %v486_v50 = vrot.slane %v485_v49, 2 }
 0x16f   :  { %v487_v51 = vadd.f32 %v486_v50, %v485_v49 }
 0x171   :  { %v488_v52 = vrot.slane %v487_v51, 1 }
 0x173   :  { %v489_v53 = vadd.f32 %v488_v52, %v487_v51 }
 0x175   :  { %1165 = vmatmul.mubr.f32.vlgmr.msra.gmra.mrb[10].mxu1 %v489_v53 }
 0x176   :  { %1168 = vmatpush3.msra.mxu1 %v480_v54  ;;  %1169 = vmatprep.mubr.msk.f32.mxu1 %vm1444_vm0, %v1443_v1 }
 0x177   :  { %1207 = vmatprep.subr.mxu1 %v1443_v1 }
 0x248   :  { %v556_v55 = vpop.f32.mrb[10].mxu1 }
 0x249   :  { %v1166_v56 = vpop.f32.mrb[11].mxu1  ;;  %1170 = vmatmul.mubr.msk.f32.vlgmr.msra.gmra.mrb[12].mxu1 %vm560_vm3, %v556_v55 }
 0x24a   :  { %1208 = vmatpush3.msra.mxu1 %v480_v54  ;;  %1209 = vmatprep.mubr.msk.f32.mxu1 %vm1444_vm0, %v1443_v1 }
 0x31c   :  { %v630_v59 = vpop.f32.mrb[12].mxu1 }
 0x31d   :  { %v634_v60 = vmul.f32 0.001953125, %v630_v59  ;;  %v1171_v61 = vpop.f32.mrb[13].mxu1 }
 0x31f   :  { %v638_v62 = vrot.slane %v634_v60, %v637_v58 }
 0x321   :  { %v639_v63 = vsub.f32 %v428_v23, %v638_v62  ;;  %v640_v2 = vsub.f32 %v429_v28, %v638_v62  ;;  %v641_v3 = vsub.f32 %v459_v44, %v638_v62  ;;  %v642_v4 = vsub.f32 %v461_v45, %v638_v62  ;;  %v800_v23 = vld [vmem:[%s1852_s2] sm:$0x1]  ;;  %s1409_s2 = scalar_lea.vmem %s843_s24, 512 }
 0x322   :  { %p1410_p10 = scmp.ne.s32.totalorder %s843_s24, %s1409_s2  ;;  %p1415_p12 = scmp.lt.s32.totalorder %s1409_s2, %s1409_s2 }
 0x323   :  { %v643_v5 = vmul.f32 %v639_v63, %v639_v63  ;;  %v644_v6 = vmul.f32 %v640_v2, %v640_v2  ;;  %v645_v7 = vmul.f32 %v641_v3, %v641_v3  ;;  %v646_v9 = vmul.f32 %v642_v4, %v642_v4 }
 0x324   :  { %p1416_p13 = por %p1415_p12, %p1414_p11 }
 0x325   :  { %v647_v8 = vadd.f32 %v644_v6, %v643_v5 }
 0x326   :  { %p1417_p0 = pnand %p1416_p13, %p1410_p10 }
 0x327   :  { %v648_v10 = vadd.f32 %v647_v8, %v645_v7 }
 0x329   :  { %v649_v11 = vadd.f32 %v648_v10, %v646_v9 }
 0x32b   :  { %v650_v12 = vrot.slane %v649_v11, 4 }
 0x32d   :  { %v651_v1 = vadd.f32 %v650_v12, %v649_v11 }
 0x32f   :  { %v652_v13 = vrot.slane %v651_v1, 2 }
 0x331   :  { %v653_v14 = vadd.f32 %v652_v13, %v651_v1 }
 0x333   :  { %v654_v15 = vrot.slane %v653_v14, 1 }
 0x335   :  { %v655_v16 = vadd.f32 %v654_v15, %v653_v14 }
 0x337   :  { %1205 = vmatmul.mubr.f32.vlgmr.msra.gmra.mrb[20].mxu0 %v655_v16 }
 0x40a   :  { %v722_v17 = vpop.f32.mrb[20].mxu0 }
 0x40b   :  { %v1206_v18 = vpop.f32.mrb[21].mxu0  ;;  %1210 = vmatmul.mubr.msk.f32.vlgmr.msra.gmra.mrb[14].mxu1 %vm560_vm3, %v722_v17 }
 0x4de   :  { %v795_v19 = vpop.f32.mrb[14].mxu1 }
 0x4df   :  { %v799_v20 = vmul.f32 0.001953125, %v795_v19  ;;  %v1211_v21 = vpop.f32.mrb[15].mxu1 }
 0x4e1   :  { %v801_v22 = vadd.f32 1e-05, %v799_v20 }
 0x4e3   :  { %1341 = vrsqrt.f32 %v801_v22 }
 0x4ed   :  { %v1342_v24 = vpop.eup %1341 }
 0x4ee   :  { %v803_v25 = vmul.f32 %v1342_v24, %v800_v23 }
 0x4f0   :  { %v808_v26 = vrot.slane %v803_v25, %v637_v58 }
 0x4f2   :  { %v810_v28 = vmul.f32 %v808_v26, %v639_v63  ;;  %v811_v29 = vmul.f32 %v808_v26, %v640_v2  ;;  %v812_v30 = vmul.f32 %v808_v26, %v641_v3  ;;  %v813_v31 = vmul.f32 %v808_v26, %v642_v4 }
 0x4f4   :  { %v821_v36 = vadd.f32 %v889_v27, %v810_v28  ;;  %v822_v37 = vadd.f32 %v889_v27, %v811_v29  ;;  %v823_v38 = vadd.f32 %v889_v27, %v812_v30  ;;  %v824_v39 = vadd.f32 %v889_v27, %v813_v31 }
 0x4f6   :  { %v829_v40 = vadd.f32 %v825_v32, %v821_v36  ;;  %v830_v41 = vadd.f32 %v826_v33, %v822_v37  ;;  %v831_v42 = vadd.f32 %v827_v34, %v823_v38  ;;  %v832_v43 = vadd.f32 %v828_v35, %v824_v39 }
 0x4f8   :  { %833 = vst [vmem:[#allocation9] sm:$0xff] %v829_v40  ;;  %834 = vst [vmem:[#allocation9 + $0x8] sm:$0xff] %v830_v41 }
 0x4f9   :  { %835 = vst [vmem:[#allocation9 + $0x10] sm:$0xff] %v831_v42  ;;  %836 = vst [vmem:[#allocation9 + $0x18] sm:$0xff] %v832_v43 }
 0x4fa   :  { %1420 = shalt.err (!%p1417_p0)
}
 0x4fb   :  { %s1421_s26 = scalar_lea.hbm %s1857_s7, 512 }
 0x4fc   :  { %p1422_p1 = scmp.ne.s32.totalorder %s1857_s7, %s1421_s26  ;;  %p1425_p2 = scmp.lt.u32.totalorder %s1421_s26, %s1857_s7 }
 0x4fe   :  { %p1427_p3 = pnand %p1425_p2, %p1422_p1 }
 0x500   :  { %1430 = shalt.err (!%p1427_p3)
}
 0x501   :  { %848 = dma.vmem_to_hbm [thread:$0]  %s843_s24, 512, %s1857_s7, [#allocation5], %s1439_s5, %s1439_s5, %s1440_s23  }
 0x502   :  { %1435 = dma.done.wait [#allocation5], 512  }
 0x503   :  { %1436 = vsyncadd [#allocation5], 4294966784 }
 0x504   :  { %852 = vsyncpa [#allocation4], 1 }
 0x505   :  { %853 = vsyncpa [#allocation7], 1 }
 0x506   :  { %854 = vsyncpa [#allocation5], 1 }

// kernel: branch_1_fun.12
= control target key start
LH: loop header
LB: loop body
LE: loop exit
PB: predicated region body
PF: predicated region fallthrough
CT: control target
= control target key end

     0   :  { %11 = vsyncpa [#allocation4], 0  ;;  %s1775_s0 = inlined_call_operand.hbm [shape: f32[32,128], index: 0, kind: input, shape index: {}]   ;;  %s1776_s1 = inlined_call_operand.vmem [shape: f32[3,128,128], index: 1, kind: input, shape index: {}]   ;;  %s1777_s2 = inlined_call_operand.vmem [shape: f32[1,128], index: 2, kind: input, shape index: {}]   ;;  %s1778_s3 = inlined_call_operand.vmem [shape: f32[1,128], index: 3, kind: input, shape index: {}]   ;;  %s1779_s4 = inlined_call_operand.vmem [shape: f32[128,8], index: 4, kind: input, shape index: {}]   ;;  %s1780_s5 = inlined_call_operand.hbm [shape: f32[8,128], index: 5, kind: input, shape index: {}]   ;;  %s1781_s6 = inlined_call_operand.hbm [shape: f32[32,128], index: 6, kind: output, shape index: {}]  }
   0x1   :  { %12 = vsyncpa [#allocation7], 0 }
   0x2   :  { %13 = vsyncpa [#allocation5], 0  ;;  %s1390_s21 = smov [#allocation3]   ;;  %s1318_s25 = scalar_lea.hbm %s1775_s0, 512 }
   0x3   :  { %s19_s22 = sshll.u32 %s1390_s21, 4  ;;  %p1319_p0 = scmp.ne.s32.totalorder %s1775_s0, %s1318_s25  ;;  %s20_s22 = int_to_ptr.vmem [resolvable:$true] %s19_s22 }
   0x4   :  { %p1322_p1 = scmp.lt.u32.totalorder %s1318_s25, %s1775_s0 }
   0x6   :  { %p1324_p2 = pnand %p1322_p1, %p1319_p0 }
   0x8   :  { %1327 = shalt.err (!%p1324_p2)
}
   0x9   :  { %s1328_s30 = scalar_lea.vmem %s20_s22, 512  ;;  %p1333_p4 = scmp.lt.s32.totalorder %s20_s22, %s20_s22 }
   0xa   :  { %p1329_p3 = scmp.ne.s32.totalorder %s20_s22, %s1328_s30  ;;  %p1334_p5 = scmp.lt.s32.totalorder %s1328_s30, %s1328_s30 }
   0xc   :  { %p1335_p6 = por %p1334_p5, %p1333_p4 }
   0xe   :  { %p1336_p7 = pnand %p1335_p6, %p1329_p3 }
  0x10   :  { %1339 = shalt.err (!%p1336_p7)
}
  0x11   :  { %s1391_s7 = smov 128   ;;  %s1392_s8 = smov 8  }
  0x12   :  { %25 = dma.hbm_to_vmem [thread:$0]  %s1775_s0, 512, %s20_s22, [#allocation4], %s1391_s7, %s1391_s7, %s1392_s8  }
  0x13   :  { %s1393_s11 = smov [#allocation6]   ;;  %s1340_s15 = scalar_lea.hbm %s1780_s5, 128 }
  0x14   :  { %s40_s12 = sshll.u32 %s1393_s11, 4  ;;  %p1341_p8 = scmp.ne.s32.totalorder %s1780_s5, %s1340_s15  ;;  %s41_s12 = int_to_ptr.vmem [resolvable:$true] %s40_s12 }
  0x15   :  { %p1344_p9 = scmp.lt.u32.totalorder %s1340_s15, %s1780_s5 }
  0x17   :  { %p1346_p10 = pnand %p1344_p9, %p1341_p8 }
  0x19   :  { %1349 = shalt.err (!%p1346_p10)
}
  0x1a   :  { %s1350_s20 = scalar_lea.vmem %s41_s12, 128  ;;  %p1355_p12 = scmp.lt.s32.totalorder %s41_s12, %s41_s12 }
  0x1b   :  { %p1351_p11 = scmp.ne.s32.totalorder %s41_s12, %s1350_s20  ;;  %p1356_p13 = scmp.lt.s32.totalorder %s1350_s20, %s1350_s20 }
  0x1d   :  { %p1357_p0 = por %p1356_p13, %p1355_p12 }
  0x1f   :  { %p1358_p1 = pnand %p1357_p0, %p1351_p11 }
  0x21   :  { %1361 = shalt.err (!%p1358_p1)
}
  0x22   :  { %43 = dma.hbm_to_vmem [thread:$0]  %s1780_s5, 128, %s41_s12, [#allocation7]  }
  0x23   :  { %1384 = dma.done.wait [#allocation4], 512  }
  0x24   :  { %1385 = vsyncadd [#allocation4], 4294966784 }
  0x25   :  { %1386 = dma.done.wait [#allocation7], 128  }
  0x26   :  { %1387 = vsyncadd [#allocation7], 4294967168  ;;  %v1394_v0 = vmov 0.0|0.0   ;;  %v1395_v1 = vmov 0.0   ;;  %vm1396_vm0 = vmmov 0   ;;  %v68_v2 = vld [vmem:[%s1776_s1] sm:$0xff] }
  0x27   :  { %1188 = vmatprep.subr.bf16.mxu0 %v1394_v0  ;;  %1212 = vmatprep.subr.bf16.mxu1 %v1394_v0  ;;  %50 = vst [vmem:[#allocation2] sm:$0xff] %v1395_v1  ;;  %51 = vst [vmem:[#allocation2 + $0x8] sm:$0xff] %v1395_v1  ;;  %v69_v3 = vld [vmem:[%s1776_s1 + $0x8] sm:$0xff]  ;;  %v831_v4 = vld [vmem:[%s1776_s1 + $0x80] sm:$0xff]  ;;  %vm391_vm1 = vcmask 1046528   ;;  %vm404_vm2 = vcmask 1045504  }
  0x28   :  { %52 = vst [vmem:[#allocation2 + $0x10] sm:$0xff] %v1395_v1  ;;  %53 = vst [vmem:[#allocation2 + $0x18] sm:$0xff] %v1395_v1  ;;  %999 = vmatprep.mubr.msk.f32.mxu0 %vm1396_vm0, %v1395_v1  ;;  %1046 = vmatprep.mubr.msk.f32.mxu1 %vm1396_vm0, %v1395_v1  ;;  %v1189_v5 = vpack.c.bf16 %v69_v3, %v68_v2  ;;  %v832_v6 = vld [vmem:[%s1776_s1 + $0x88] sm:$0xff]  ;;  %v70_v7 = vld [vmem:[%s1776_s1 + $0x10] sm:$0xff]  ;;  %vm544_vm3 = vcmask 64512   ;;  %s1397_s30 = smov [#allocation8]  }
  0x29   :  { %54 = vst [vmem:[#allocation2 + $0x20] sm:$0xf] %v1395_v1  ;;  %v71_v8 = vld [vmem:[%s1776_s1 + $0x18] sm:$0xff]  ;;  %v1213_v9 = vpack.c.bf16 %v832_v6, %v831_v4  ;;  %v833_v10 = vld [vmem:[%s1776_s1 + $0x90] sm:$0xff]  ;;  %v72_v14 = vld [vmem:[%s1776_s1 + $0x20] sm:$0xff]  ;;  %s818_s9 = sshll.u32 %s1397_s30, 4  ;;  %s819_s9 = int_to_ptr.vmem [resolvable:$true] %s818_s9 }
  0x2a   :  { %v834_v11 = vld [vmem:[%s1776_s1 + $0x98] sm:$0xff]  ;;  %1190 = vmatpush3.bf16.msra.mxu0 %v1189_v5  ;;  %v1192_v12 = vpack.c.bf16 %v71_v8, %v70_v7  ;;  %v73_v15 = vld [vmem:[%s1776_s1 + $0x28] sm:$0xff]  ;;  %v835_v16 = vld [vmem:[%s1776_s1 + $0xa0] sm:$0xff]  ;;  %p1367_p3 = scmp.lt.s32.totalorder %s819_s9, %s819_s9 }
  0x2b   :  { %1214 = vmatpush3.bf16.msra.mxu1 %v1213_v9  ;;  %1191 = vmatprep.subr.bf16.mxu0 %v1394_v0  ;;  %v1216_v13 = vpack.c.bf16 %v834_v11, %v833_v10  ;;  %v836_v17 = vld [vmem:[%s1776_s1 + $0xa8] sm:$0xff]  ;;  %v1195_v18 = vpack.c.bf16 %v73_v15, %v72_v14  ;;  %v74_v20 = vld [vmem:[%s1776_s1 + $0x30] sm:$0xff]  ;;  %v75_v21 = vld [vmem:[%s1776_s1 + $0x38] sm:$0xff] }
  0x2c   :  { %1215 = vmatprep.subr.bf16.mxu1 %v1394_v0  ;;  %v1219_v19 = vpack.c.bf16 %v836_v17, %v835_v16  ;;  %v837_v22 = vld [vmem:[%s1776_s1 + $0xb0] sm:$0xff]  ;;  %v838_v23 = vld [vmem:[%s1776_s1 + $0xb8] sm:$0xff]  ;;  %v55_v24 = vld [vmem:[#allocation3] sm:$0xff]  ;;  %v1198_v25 = vpack.c.bf16 %v75_v21, %v74_v20 }
  0x2d   :  { %57 = vst [vmem:[#allocation2 + $0x1] sm:$0xff] %v55_v24  ;;  %v56_v26 = vld [vmem:[#allocation3 + $0x8] sm:$0xff]  ;;  %v1222_v27 = vpack.c.bf16 %v838_v23, %v837_v22  ;;  %v76_v28 = vld [vmem:[%s1776_s1 + $0x40] sm:$0xff]  ;;  %v77_v29 = vld [vmem:[%s1776_s1 + $0x48] sm:$0xff] }
  0x2e   :  { %1193 = vmatpush3.bf16.msra.mxu0 %v1192_v12  ;;  %58 = vst [vmem:[#allocation2 + $0x9] sm:$0xff] %v56_v26  ;;  %v839_v30 = vld [vmem:[%s1776_s1 + $0xc0] sm:$0xff]  ;;  %v840_v31 = vld [vmem:[%s1776_s1 + $0xc8] sm:$0xff]  ;;  %v59_v32 = vld [vmem:[#allocation3 + $0x10] sm:$0xff]  ;;  %v1201_v34 = vpack.c.bf16 %v77_v29, %v76_v28 }
  0x2f   :  { %1217 = vmatpush3.bf16.msra.mxu1 %v1216_v13  ;;  %1194 = vmatprep.subr.bf16.mxu0 %v1394_v0  ;;  %61 = vst [vmem:[#allocation2 + $0x13] sm:$0xff] %v59_v32  ;;  %v60_v33 = vld [vmem:[#allocation3 + $0x18] sm:$0xff]  ;;  %v1225_v35 = vpack.c.bf16 %v840_v31, %v839_v30  ;;  %v78_v36 = vld [vmem:[%s1776_s1 + $0x50] sm:$0xff]  ;;  %v79_v37 = vld [vmem:[%s1776_s1 + $0x58] sm:$0xff] }
  0x30   :  { %1218 = vmatprep.subr.bf16.mxu1 %v1394_v0  ;;  %62 = vst [vmem:[#allocation2 + $0x1b] sm:$0xff] %v60_v33  ;;  %v841_v38 = vld [vmem:[%s1776_s1 + $0xd0] sm:$0xff]  ;;  %v842_v39 = vld [vmem:[%s1776_s1 + $0xd8] sm:$0xff]  ;;  %v1204_v40 = vpack.c.bf16 %v79_v37, %v78_v36  ;;  %v80_v42 = vld [vmem:[%s1776_s1 + $0x60] sm:$0xff] }
  0x31   :  { %v1228_v41 = vpack.c.bf16 %v842_v39, %v841_v38  ;;  %v81_v43 = vld [vmem:[%s1776_s1 + $0x68] sm:$0xff]  ;;  %v843_v44 = vld [vmem:[%s1776_s1 + $0xe0] sm:$0xff]  ;;  %v82_v48 = vld [vmem:[%s1776_s1 + $0x70] sm:$0xff] }
  0x32   :  { %1196 = vmatpush3.bf16.msra.mxu0 %v1195_v18  ;;  %v844_v45 = vld [vmem:[%s1776_s1 + $0xe8] sm:$0xff]  ;;  %v1207_v46 = vpack.c.bf16 %v81_v43, %v80_v42  ;;  %v83_v49 = vld [vmem:[%s1776_s1 + $0x78] sm:$0xff]  ;;  %v845_v50 = vld [vmem:[%s1776_s1 + $0xf0] sm:$0xff] }
  0x33   :  { %1220 = vmatpush3.bf16.msra.mxu1 %v1219_v19  ;;  %1197 = vmatprep.subr.bf16.mxu0 %v1394_v0  ;;  %v1231_v47 = vpack.c.bf16 %v844_v45, %v843_v44  ;;  %v846_v51 = vld [vmem:[%s1776_s1 + $0xf8] sm:$0xff]  ;;  %v1210_v52 = vpack.c.bf16 %v83_v49, %v82_v48  ;;  %v847_v54 = vld [vmem:[%s1776_s1 + $0x100] sm:$0xff]  ;;  %v848_v55 = vld [vmem:[%s1776_s1 + $0x108] sm:$0xff] }
  0x34   :  { %1221 = vmatprep.subr.bf16.mxu1 %v1394_v0  ;;  %v1234_v53 = vpack.c.bf16 %v846_v51, %v845_v50  ;;  %v1587_v56 = vld [vmem:[#allocation2] sm:$0xff]  ;;  %v1237_v57 = vpack.c.bf16 %v848_v55, %v847_v54  ;;  %v849_v58 = vld [vmem:[%s1776_s1 + $0x110] sm:$0xff]  ;;  %v850_v59 = vld [vmem:[%s1776_s1 + $0x118] sm:$0xff] }
  0x35   :  { %v1240_v60 = vpack.c.bf16 %v850_v59, %v849_v58  ;;  %v64_v61 = vld [vmem:[#allocation2 + $0x8] sm:$0xff]  ;;  %v851_v62 = vld [vmem:[%s1776_s1 + $0x120] sm:$0xff]  ;;  %v853_v4 = vld [vmem:[%s1776_s1 + $0x130] sm:$0xff] }
  0x36   :  { %1199 = vmatpush3.bf16.msra.mxu0 %v1198_v25  ;;  %v852_v63 = vld [vmem:[%s1776_s1 + $0x128] sm:$0xff]  ;;  %v65_v3 = vld [vmem:[#allocation2 + $0x10] sm:$0xff]  ;;  %v854_v5 = vld [vmem:[%s1776_s1 + $0x138] sm:$0xff] }
  0x37   :  { %1223 = vmatpush3.bf16.msra.mxu1 %v1222_v27  ;;  %1200 = vmatprep.subr.bf16.mxu0 %v1394_v0  ;;  %v1243_v2 = vpack.c.bf16 %v852_v63, %v851_v62  ;;  %v1246_v6 = vpack.c.bf16 %v854_v5, %v853_v4  ;;  %v66_v7 = vld [vmem:[#allocation2 + $0x18] sm:$0xff]  ;;  %v855_v8 = vld [vmem:[%s1776_s1 + $0x140] sm:$0xff]  ;;  %v856_v9 = vld [vmem:[%s1776_s1 + $0x148] sm:$0xff] }
  0x38   :  { %1224 = vmatprep.subr.bf16.mxu1 %v1394_v0  ;;  %v1249_v10 = vpack.c.bf16 %v856_v9, %v855_v8  ;;  %v67_v11 = vld [vmem:[#allocation2 + $0x20] sm:$0xf]  ;;  %v857_v12 = vld [vmem:[%s1776_s1 + $0x150] sm:$0xff]  ;;  %v858_v13 = vld [vmem:[%s1776_s1 + $0x158] sm:$0xff] }
  0x39   :  { %v1252_v14 = vpack.c.bf16 %v858_v13, %v857_v12  ;;  %v859_v15 = vld [vmem:[%s1776_s1 + $0x160] sm:$0xff]  ;;  %v860_v16 = vld [vmem:[%s1776_s1 + $0x168] sm:$0xff]  ;;  %v861_v18 = vld [vmem:[%s1776_s1 + $0x170] sm:$0xff] }
  0x3a   :  { %1202 = vmatpush3.bf16.msra.mxu0 %v1201_v34  ;;  %v1255_v17 = vpack.c.bf16 %v860_v16, %v859_v15  ;;  %v862_v19 = vld [vmem:[%s1776_s1 + $0x178] sm:$0xff]  ;;  %v448_v21 = vld [vmem:[%s1779_s4] sm:$0xff]  ;;  %v449_v22 = vld [vmem:[%s1779_s4 + $0x8] sm:$0xff] }
  0x3b   :  { %1226 = vmatpush3.bf16.msra.mxu1 %v1225_v35  ;;  %1203 = vmatprep.subr.bf16.mxu0 %v1394_v0  ;;  %v1258_v20 = vpack.c.bf16 %v862_v19, %v861_v18  ;;  %v1261_v23 = vpack.c.bf16 %v449_v22, %v448_v21  ;;  %v450_v24 = vld [vmem:[%s1779_s4 + $0x10] sm:$0xff]  ;;  %v451_v25 = vld [vmem:[%s1779_s4 + $0x18] sm:$0xff]  ;;  %v452_v27 = vld [vmem:[%s1779_s4 + $0x20] sm:$0xff] }
  0x3c   :  { %1227 = vmatprep.subr.bf16.mxu1 %v1394_v0  ;;  %v1264_v26 = vpack.c.bf16 %v451_v25, %v450_v24  ;;  %v453_v28 = vld [vmem:[%s1779_s4 + $0x28] sm:$0xff]  ;;  %v454_v30 = vld [vmem:[%s1779_s4 + $0x30] sm:$0xff]  ;;  %v455_v31 = vld [vmem:[%s1779_s4 + $0x38] sm:$0xff] }
  0x3d   :  { %v1267_v29 = vpack.c.bf16 %v453_v28, %v452_v27  ;;  %v1270_v32 = vpack.c.bf16 %v455_v31, %v454_v30  ;;  %v456_v33 = vld [vmem:[%s1779_s4 + $0x40] sm:$0xff]  ;;  %v457_v34 = vld [vmem:[%s1779_s4 + $0x48] sm:$0xff]  ;;  %v458_v36 = vld [vmem:[%s1779_s4 + $0x50] sm:$0xff] }
  0x3e   :  { %1205 = vmatpush3.bf16.msra.mxu0 %v1204_v40  ;;  %v1273_v35 = vpack.c.bf16 %v457_v34, %v456_v33  ;;  %v459_v37 = vld [vmem:[%s1779_s4 + $0x58] sm:$0xff]  ;;  %v460_v39 = vld [vmem:[%s1779_s4 + $0x60] sm:$0xff]  ;;  %v461_v40 = vld [vmem:[%s1779_s4 + $0x68] sm:$0xff] }
  0x3f   :  { %1229 = vmatpush3.bf16.msra.mxu1 %v1228_v41  ;;  %1206 = vmatprep.subr.bf16.mxu0 %v1394_v0  ;;  %v1276_v38 = vpack.c.bf16 %v459_v37, %v458_v36  ;;  %v1279_v41 = vpack.c.bf16 %v461_v40, %v460_v39  ;;  %v462_v42 = vld [vmem:[%s1779_s4 + $0x70] sm:$0xff]  ;;  %v463_v43 = vld [vmem:[%s1779_s4 + $0x78] sm:$0xff] }
  0x40   :  { %1230 = vmatprep.subr.bf16.mxu1 %v1394_v0  ;;  %v1282_v44 = vpack.c.bf16 %v463_v43, %v462_v42 }
  0x42   :  { %1208 = vmatpush3.bf16.msra.mxu0 %v1207_v46 }
  0x43   :  { %1232 = vmatpush3.bf16.msra.mxu1 %v1231_v47  ;;  %1209 = vmatprep.subr.bf16.mxu0 %v1394_v0 }
  0x44   :  { %1233 = vmatprep.subr.bf16.mxu1 %v1394_v0 }
  0x46   :  { %1211 = vmatpush3.bf16.msra.mxu0 %v1210_v52 }
  0x47   :  { %1235 = vmatpush3.bf16.msra.mxu1 %v1234_v53  ;;  %1236 = vmatprep.subr.bf16.mxu0 %v1394_v0 }
  0x48   :  { %1260 = vmatprep.subr.bf16.mxu1 %v1394_v0 }
  0x49   :  { %1000 = vmatmul.mubr.f32.vlgmr.msra.gmra.mrb[0].mxu0 %v1587_v56 }
  0x4a   :  { %1047 = vmatmul.mubr.f32.vlgmr.msra.gmra.mrb[0].mxu1 %v1587_v56  ;;  %1238 = vmatpush3.bf16.msra.mxu0 %v1237_v57 }
  0x4b   :  { %1049 = vmatprep.mubr.msk.f32.mxu1 %vm1396_vm0, %v1395_v1  ;;  %1239 = vmatprep.subr.bf16.mxu0 %v1394_v0 }
  0x4c   :  { %1002 = vmatprep.mubr.msk.f32.mxu0 %vm1396_vm0, %v1395_v1  ;;  %1262 = vmatpush3.bf16.msra.mxu1 %v1261_v23 }
  0x4d   :  { %1003 = vmatmul.mubr.f32.gmra.mrb[2].mxu0 %v64_v61  ;;  %1263 = vmatprep.subr.bf16.mxu1 %v1394_v0 }
  0x4e   :  { %1050 = vmatmul.mubr.f32.gmra.mrb[2].mxu1 %v64_v61  ;;  %1241 = vmatpush3.bf16.msra.mxu0 %v1240_v60 }
  0x4f   :  { %1242 = vmatprep.subr.bf16.mxu0 %v1394_v0  ;;  %1052 = vmatprep.mubr.msk.f32.mxu1 %vm1396_vm0, %v1395_v1 }
  0x50   :  { %1005 = vmatprep.mubr.msk.f32.mxu0 %vm1396_vm0, %v1395_v1  ;;  %1265 = vmatpush3.bf16.msra.mxu1 %v1264_v26 }
  0x51   :  { %1006 = vmatmul.mubr.f32.gmra.mrb[4].mxu0 %v65_v3  ;;  %1266 = vmatprep.subr.bf16.mxu1 %v1394_v0 }
  0x52   :  { %1244 = vmatpush3.bf16.msra.mxu0 %v1243_v2  ;;  %1053 = vmatmul.mubr.f32.gmra.mrb[4].mxu1 %v65_v3 }
  0x53   :  { %1245 = vmatprep.subr.bf16.mxu0 %v1394_v0  ;;  %1055 = vmatprep.mubr.msk.f32.mxu1 %vm1396_vm0, %v1395_v1 }
  0x54   :  { %1008 = vmatprep.mubr.msk.f32.mxu0 %vm1396_vm0, %v1395_v1  ;;  %1268 = vmatpush3.bf16.msra.mxu1 %v1267_v29 }
  0x55   :  { %1009 = vmatmul.mubr.f32.gmra.mrb[6].mxu0 %v66_v7  ;;  %1269 = vmatprep.subr.bf16.mxu1 %v1394_v0 }
  0x56   :  { %1247 = vmatpush3.bf16.msra.mxu0 %v1246_v6  ;;  %1056 = vmatmul.mubr.f32.gmra.mrb[6].mxu1 %v66_v7 }
  0x57   :  { %1248 = vmatprep.subr.bf16.mxu0 %v1394_v0  ;;  %1058 = vmatprep.mubr.msk.f32.mxu1 %vm1396_vm0, %v1395_v1 }
  0x58   :  { %1011 = vmatprep.mubr.msk.f32.mxu0 %vm1396_vm0, %v1395_v1  ;;  %1271 = vmatpush3.bf16.msra.mxu1 %v1270_v32 }
  0x59   :  { %1012 = vmatmul.mubr.f32.gmra.mrb[8].mxu0 %v67_v11  ;;  %1272 = vmatprep.subr.bf16.mxu1 %v1394_v0 }
  0x5a   :  { %1250 = vmatpush3.bf16.msra.mxu0 %v1249_v10  ;;  %1059 = vmatmul.mubr.f32.gmra.mrb[8].mxu1 %v67_v11 }
  0x5b   :  { %1251 = vmatprep.subr.bf16.mxu0 %v1394_v0  ;;  %1093 = vmatprep.mubr.msk.f32.mxu0 %vm1396_vm0, %v1395_v1 }
  0x5c   :  { %1140 = vmatprep.mubr.msk.f32.mxu1 %vm1396_vm0, %v1395_v1  ;;  %1274 = vmatpush3.bf16.msra.mxu1 %v1273_v35 }
  0x5d   :  { %1275 = vmatprep.subr.bf16.mxu1 %v1394_v0 }
  0x5e   :  { %1253 = vmatpush3.bf16.msra.mxu0 %v1252_v14 }
  0x5f   :  { %1254 = vmatprep.subr.bf16.mxu0 %v1394_v0 }
  0x60   :  { %1277 = vmatpush3.bf16.msra.mxu1 %v1276_v38 }
  0x61   :  { %1278 = vmatprep.subr.bf16.mxu1 %v1394_v0 }
  0x62   :  { %1256 = vmatpush3.bf16.msra.mxu0 %v1255_v17 }
  0x63   :  { %1257 = vmatprep.subr.bf16.mxu0 %v1394_v0 }
  0x64   :  { %1280 = vmatpush3.bf16.msra.mxu1 %v1279_v41 }
  0x65   :  { %1281 = vmatprep.subr.bf16.mxu1 %v1394_v0 }
  0x66   :  { %1259 = vmatpush3.bf16.msra.mxu0 %v1258_v20 }
  0x67   :  { %1284 = vmatprep.subr.bf16.mxu0 %v1394_v0 }
  0x68   :  { %1283 = vmatpush3.bf16.msra.mxu1 %v1282_v44 }
  0x69   :  { %1094 = vmatmul.mubr.f32.vlgmr.msra.gmra.mrb[10].mxu0 %v1587_v56  ;;  %1143 = vmatprep.subr.mxu1 %v1395_v1 }
  0x6a   :  { %1096 = vmatprep.mubr.msk.f32.mxu0 %vm1396_vm0, %v1395_v1  ;;  %1286 = vmatpush3.bf16.msra.mxu0 %v1261_v23 }
  0x6b   :  { %1287 = vmatprep.subr.bf16.mxu0 %v1394_v0 }
  0x6d   :  { %1097 = vmatmul.mubr.f32.gmra.mrb[12].mxu0 %v64_v61 }
  0x6e   :  { %1099 = vmatprep.mubr.msk.f32.mxu0 %vm1396_vm0, %v1395_v1  ;;  %1289 = vmatpush3.bf16.msra.mxu0 %v1264_v26 }
  0x6f   :  { %1290 = vmatprep.subr.bf16.mxu0 %v1394_v0 }
  0x71   :  { %1100 = vmatmul.mubr.f32.gmra.mrb[14].mxu0 %v65_v3 }
  0x72   :  { %1102 = vmatprep.mubr.msk.f32.mxu0 %vm1396_vm0, %v1395_v1  ;;  %1292 = vmatpush3.bf16.msra.mxu0 %v1267_v29 }
  0x73   :  { %1293 = vmatprep.subr.bf16.mxu0 %v1394_v0 }
  0x75   :  { %1103 = vmatmul.mubr.f32.gmra.mrb[16].mxu0 %v66_v7 }
  0x76   :  { %1105 = vmatprep.mubr.msk.f32.mxu0 %vm1396_vm0, %v1395_v1  ;;  %1295 = vmatpush3.bf16.msra.mxu0 %v1270_v32 }
  0x77   :  { %1296 = vmatprep.subr.bf16.mxu0 %v1394_v0 }
  0x79   :  { %1106 = vmatmul.mubr.f32.gmra.mrb[18].mxu0 %v67_v11 }
  0x7a   :  { %1180 = vmatprep.mubr.msk.f32.mxu0 %vm1396_vm0, %v1395_v1  ;;  %1298 = vmatpush3.bf16.msra.mxu0 %v1273_v35 }
  0x7b   :  { %1299 = vmatprep.subr.bf16.mxu0 %v1394_v0 }
  0x7e   :  { %1301 = vmatpush3.bf16.msra.mxu0 %v1276_v38 }
  0x7f   :  { %1302 = vmatprep.subr.bf16.mxu0 %v1394_v0 }
  0x82   :  { %1304 = vmatpush3.bf16.msra.mxu0 %v1279_v41 }
  0x83   :  { %1305 = vmatprep.subr.bf16.mxu0 %v1394_v0 }
  0x86   :  { %1307 = vmatpush3.bf16.msra.mxu0 %v1282_v44 }
 0x11c   :  { %v150_v45 = vpop.f32.mrb[0].mxu0 }
 0x11d   :  { %v1001_v46 = vpop.f32.mrb[1].mxu0  ;;  %v257_v47 = vpop.f32.mrb[0].mxu1 }
 0x11e   :  { %v1048_v48 = vpop.f32.mrb[1].mxu1  ;;  %v392_v49 = vrot.slane %v257_v47, 1 }
 0x120   :  { %v155_v50 = vpop.f32.mrb[2].mxu0 }
 0x121   :  { %v262_v51 = vpop.f32.mrb[2].mxu1  ;;  %v1004_v52 = vpop.f32.mrb[3].mxu0 }
 0x122   :  { %v393_v53 = vrot.slane %v262_v51, 1  ;;  %v1051_v54 = vpop.f32.mrb[3].mxu1 }
 0x123   :  { %v464_v54 = vld [vmem:[#allocation6] sm:$0xff] }
 0x124   :  { %v394_v55 = vsel %vm391_vm1, %v392_v49, %v393_v53  ;;  %v160_v56 = vpop.f32.mrb[4].mxu0 }
 0x125   :  { %v399_v57 = vadd.f32 %v394_v55, %v150_v45  ;;  %v267_v0 = vpop.f32.mrb[4].mxu1  ;;  %v1007_v58 = vpop.f32.mrb[5].mxu0 }
 0x126   :  { %v395_v59 = vrot.slane %v267_v0, 1  ;;  %v1054_v60 = vpop.f32.mrb[5].mxu1 }
 0x128   :  { %v396_v61 = vsel %vm391_vm1, %v393_v53, %v395_v59  ;;  %v165_v62 = vpop.f32.mrb[6].mxu0 }
 0x129   :  { %v400_v63 = vadd.f32 %v396_v61, %v155_v50  ;;  %v272_v2 = vpop.f32.mrb[6].mxu1  ;;  %v1010_v3 = vpop.f32.mrb[7].mxu0 }
 0x12a   :  { %v416_v4 = vrot.slane %v272_v2, 1  ;;  %v1057_v5 = vpop.f32.mrb[7].mxu1 }
 0x12c   :  { %v417_v6 = vsel %vm391_vm1, %v395_v59, %v416_v4  ;;  %v170_v7 = vpop.f32.mrb[8].mxu0 }
 0x12d   :  { %v423_v8 = vadd.f32 %v417_v6, %v160_v56  ;;  %v277_v9 = vpop.f32.mrb[8].mxu1  ;;  %v1013_v10 = vpop.f32.mrb[9].mxu0 }
 0x12e   :  { %v418_v11 = vrot.slane %v277_v9, 1  ;;  %v1060_v12 = vpop.f32.mrb[9].mxu1 }
 0x130   :  { %v419_v13 = vsel %vm391_vm1, %v416_v4, %v418_v11  ;;  %v425_v14 = vadd.f32 %v418_v11, %v170_v7 }
 0x131   :  { %v424_v15 = vadd.f32 %v419_v13, %v165_v62 }
 0x13c   :  { %v364_v16 = vpop.f32.mrb[10].mxu0 }
 0x13d   :  { %v1095_v17 = vpop.f32.mrb[11].mxu0  ;;  %v405_v19 = vrot.slane %v364_v16, 2 }
 0x140   :  { %v369_v18 = vpop.f32.mrb[12].mxu0 }
 0x141   :  { %v406_v20 = vrot.slane %v369_v18, 2  ;;  %v1098_v21 = vpop.f32.mrb[13].mxu0 }
 0x143   :  { %v407_v22 = vsel %vm404_vm2, %v405_v19, %v406_v20 }
 0x144   :  { %v412_v23 = vadd.f32 %v407_v22, %v399_v57  ;;  %v374_v24 = vpop.f32.mrb[14].mxu0  ;;  %v619_v57 = vlaneseq }
 0x145   :  { %v408_v25 = vrot.slane %v374_v24, 2  ;;  %v1101_v26 = vpop.f32.mrb[15].mxu0 }
 0x146   :  { %v620_v0 = vshrl.u32 %v619_v57, 7 }
 0x147   :  { %v409_v27 = vsel %vm404_vm2, %v406_v20, %v408_v25 }
 0x148   :  { %v413_v28 = vadd.f32 %v409_v27, %v400_v63  ;;  %v379_v29 = vpop.f32.mrb[16].mxu0  ;;  %v621_v58 = vsub.s32 0, %v620_v0  ;;  %v865_v27 = vld [vmem:[%s1778_s3] ss:$0 sm:$0xff] }
 0x149   :  { %v428_v30 = vrot.slane %v379_v29, 2  ;;  %v1104_v31 = vpop.f32.mrb[17].mxu0 }
 0x14a   :  { %v465_v43 = vadd.f32 %v413_v28, %v412_v23 }
 0x14b   :  { %v429_v32 = vsel %vm404_vm2, %v408_v25, %v428_v30 }
 0x14c   :  { %v435_v33 = vadd.f32 %v429_v32, %v423_v8  ;;  %v384_v34 = vpop.f32.mrb[18].mxu0 }
 0x14d   :  { %v430_v35 = vrot.slane %v384_v34, 2  ;;  %v1107_v36 = vpop.f32.mrb[19].mxu0 }
 0x14e   :  { %v441_v41 = vrot.slane %v435_v33, 2 }
 0x14f   :  { %v431_v37 = vsel %vm404_vm2, %v428_v30, %v430_v35  ;;  %v437_v38 = vadd.f32 %v430_v35, %v425_v14 }
 0x150   :  { %v436_v39 = vadd.f32 %v431_v37, %v424_v15 }
 0x151   :  { %v444_v40 = vrot.slane %v437_v38, 2 }
 0x152   :  { %v442_v42 = vrot.slane %v436_v39, 2 }
 0x154   :  { %v443_v44 = vsel %vm404_vm2, %v441_v41, %v442_v42  ;;  %v445_v45 = vsel %vm404_vm2, %v442_v42, %v444_v40 }
 0x155   :  { %v466_v46 = vadd.f32 %v465_v43, %v443_v44 }
 0x157   :  { %v467_v47 = vadd.f32 %v466_v46, %v445_v45 }
 0x159   :  { %v468_v48 = vrot.slane %v467_v47, 4 }
 0x15b   :  { %v469_v49 = vadd.f32 %v468_v48, %v467_v47 }
 0x15d   :  { %v470_v50 = vrot.slane %v469_v49, 2 }
 0x15f   :  { %v471_v51 = vadd.f32 %v470_v50, %v469_v49 }
 0x161   :  { %v472_v52 = vrot.slane %v471_v51, 1 }
 0x163   :  { %v473_v53 = vadd.f32 %v472_v52, %v471_v51 }
 0x165   :  { %1141 = vmatmul.mubr.f32.vlgmr.msra.gmra.mrb[10].mxu1 %v473_v53 }
 0x166   :  { %1144 = vmatpush3.msra.mxu1 %v464_v54  ;;  %1145 = vmatprep.mubr.msk.f32.mxu1 %vm1396_vm0, %v1395_v1 }
 0x167   :  { %1183 = vmatprep.subr.mxu1 %v1395_v1 }
 0x238   :  { %v540_v55 = vpop.f32.mrb[10].mxu1 }
 0x239   :  { %v1142_v56 = vpop.f32.mrb[11].mxu1  ;;  %1146 = vmatmul.mubr.msk.f32.vlgmr.msra.gmra.mrb[12].mxu1 %vm544_vm3, %v540_v55 }
 0x23a   :  { %1184 = vmatpush3.msra.mxu1 %v464_v54  ;;  %1185 = vmatprep.mubr.msk.f32.mxu1 %vm1396_vm0, %v1395_v1 }
 0x30c   :  { %v614_v59 = vpop.f32.mrb[12].mxu1 }
 0x30d   :  { %v618_v60 = vmul.f32 0.001953125, %v614_v59  ;;  %v1147_v61 = vpop.f32.mrb[13].mxu1 }
 0x30f   :  { %v622_v62 = vrot.slane %v618_v60, %v621_v58 }
 0x311   :  { %v623_v63 = vsub.f32 %v412_v23, %v622_v62  ;;  %v624_v2 = vsub.f32 %v413_v28, %v622_v62  ;;  %v625_v3 = vsub.f32 %v443_v44, %v622_v62  ;;  %v626_v4 = vsub.f32 %v445_v45, %v622_v62  ;;  %v784_v23 = vld [vmem:[%s1777_s2] sm:$0x1]  ;;  %s1362_s2 = scalar_lea.vmem %s819_s9, 512 }
 0x312   :  { %p1363_p2 = scmp.ne.s32.totalorder %s819_s9, %s1362_s2  ;;  %p1368_p4 = scmp.lt.s32.totalorder %s1362_s2, %s1362_s2 }
 0x313   :  { %v627_v5 = vmul.f32 %v623_v63, %v623_v63  ;;  %v628_v6 = vmul.f32 %v624_v2, %v624_v2  ;;  %v629_v7 = vmul.f32 %v625_v3, %v625_v3  ;;  %v630_v9 = vmul.f32 %v626_v4, %v626_v4 }
 0x314   :  { %p1369_p5 = por %p1368_p4, %p1367_p3 }
 0x315   :  { %v631_v8 = vadd.f32 %v628_v6, %v627_v5 }
 0x316   :  { %p1370_p6 = pnand %p1369_p5, %p1363_p2 }
 0x317   :  { %v632_v10 = vadd.f32 %v631_v8, %v629_v7 }
 0x319   :  { %v633_v11 = vadd.f32 %v632_v10, %v630_v9 }
 0x31b   :  { %v634_v12 = vrot.slane %v633_v11, 4 }
 0x31d   :  { %v635_v1 = vadd.f32 %v634_v12, %v633_v11 }
 0x31f   :  { %v636_v13 = vrot.slane %v635_v1, 2 }
 0x321   :  { %v637_v14 = vadd.f32 %v636_v13, %v635_v1 }
 0x323   :  { %v638_v15 = vrot.slane %v637_v14, 1 }
 0x325   :  { %v639_v16 = vadd.f32 %v638_v15, %v637_v14 }
 0x327   :  { %1181 = vmatmul.mubr.f32.vlgmr.msra.gmra.mrb[20].mxu0 %v639_v16 }
 0x3fa   :  { %v706_v17 = vpop.f32.mrb[20].mxu0 }
 0x3fb   :  { %v1182_v18 = vpop.f32.mrb[21].mxu0  ;;  %1186 = vmatmul.mubr.msk.f32.vlgmr.msra.gmra.mrb[14].mxu1 %vm544_vm3, %v706_v17 }
 0x4ce   :  { %v779_v19 = vpop.f32.mrb[14].mxu1 }
 0x4cf   :  { %v783_v20 = vmul.f32 0.001953125, %v779_v19  ;;  %v1187_v21 = vpop.f32.mrb[15].mxu1 }
 0x4d1   :  { %v785_v22 = vadd.f32 1e-05, %v783_v20 }
 0x4d3   :  { %1316 = vrsqrt.f32 %v785_v22 }
 0x4dd   :  { %v1317_v24 = vpop.eup %1316 }
 0x4de   :  { %v787_v25 = vmul.f32 %v1317_v24, %v784_v23 }
 0x4e0   :  { %v792_v26 = vrot.slane %v787_v25, %v621_v58 }
 0x4e2   :  { %v794_v28 = vmul.f32 %v792_v26, %v623_v63  ;;  %v795_v29 = vmul.f32 %v792_v26, %v624_v2  ;;  %v796_v30 = vmul.f32 %v792_v26, %v625_v3  ;;  %v797_v31 = vmul.f32 %v792_v26, %v626_v4 }
 0x4e4   :  { %v805_v32 = vadd.f32 %v865_v27, %v794_v28  ;;  %v806_v33 = vadd.f32 %v865_v27, %v795_v29  ;;  %v807_v34 = vadd.f32 %v865_v27, %v796_v30  ;;  %v808_v35 = vadd.f32 %v865_v27, %v797_v31 }
 0x4e6   :  { %809 = vst [vmem:[#allocation8] sm:$0xff] %v805_v32  ;;  %810 = vst [vmem:[#allocation8 + $0x8] sm:$0xff] %v806_v33 }
 0x4e7   :  { %811 = vst [vmem:[#allocation8 + $0x10] sm:$0xff] %v807_v34  ;;  %812 = vst [vmem:[#allocation8 + $0x18] sm:$0xff] %v808_v35 }
 0x4e8   :  { %1373 = shalt.err (!%p1370_p6)
}
 0x4e9   :  { %s1374_s11 = scalar_lea.hbm %s1781_s6, 512 }
 0x4ea   :  { %p1375_p7 = scmp.ne.s32.totalorder %s1781_s6, %s1374_s11  ;;  %p1378_p8 = scmp.lt.u32.totalorder %s1374_s11, %s1781_s6 }
 0x4ec   :  { %p1380_p9 = pnand %p1378_p8, %p1375_p7 }
 0x4ee   :  { %1383 = shalt.err (!%p1380_p9)
}
 0x4ef   :  { %824 = dma.vmem_to_hbm [thread:$0]  %s819_s9, 512, %s1781_s6, [#allocation5], %s1391_s7, %s1391_s7, %s1392_s8  }
 0x4f0   :  { %1388 = dma.done.wait [#allocation5], 512  }
 0x4f1   :  { %1389 = vsyncadd [#allocation5], 4294966784 }
 0x4f2   :  { %828 = vsyncpa [#allocation4], 1 }
 0x4f3   :  { %829 = vsyncpa [#allocation7], 1 }
 0x4f4   :  { %830 = vsyncpa [#allocation5], 1 }

// kernel: branch_1_fun.16
= control target key start
LH: loop header
LB: loop body
LE: loop exit
PB: predicated region body
PF: predicated region fallthrough
CT: control target
= control target key end

     0   :  { %11 = vsyncpa [#allocation4], 0  ;;  %s1728_s0 = inlined_call_operand.vmem [shape: f32[32,128], index: 0, kind: input, shape index: {}]   ;;  %s1729_s1 = inlined_call_operand.vmem [shape: f32[3,128,128], index: 1, kind: input, shape index: {}]   ;;  %s1730_s2 = inlined_call_operand.vmem [shape: f32[1,128], index: 2, kind: input, shape index: {}]   ;;  %s1731_s3 = inlined_call_operand.vmem [shape: f32[1,128], index: 3, kind: input, shape index: {}]   ;;  %s1732_s4 = inlined_call_operand.vmem [shape: f32[128,8], index: 4, kind: input, shape index: {}]   ;;  %s1733_s5 = inlined_call_operand.hbm [shape: f32[8,128], index: 5, kind: input, shape index: {}]   ;;  %s1734_s6 = inlined_call_operand.hbm [shape: f32[32,128], index: 6, kind: output, shape index: {}]  }
   0x1   :  { %12 = vsyncpa [#allocation5], 0  ;;  %s1350_s21 = smov [#allocation3]   ;;  %s1302_s25 = scalar_lea.hbm %s1733_s5, 128 }
   0x2   :  { %s29_s22 = sshll.u32 %s1350_s21, 4  ;;  %p1303_p0 = scmp.ne.s32.totalorder %s1733_s5, %s1302_s25  ;;  %s30_s22 = int_to_ptr.vmem [resolvable:$true] %s29_s22 }
   0x3   :  { %p1306_p1 = scmp.lt.u32.totalorder %s1302_s25, %s1733_s5 }
   0x5   :  { %p1308_p2 = pnand %p1306_p1, %p1303_p0 }
   0x7   :  { %1311 = shalt.err (!%p1308_p2)
}
   0x8   :  { %s1312_s30 = scalar_lea.vmem %s30_s22, 128  ;;  %p1317_p4 = scmp.lt.s32.totalorder %s30_s22, %s30_s22 }
   0x9   :  { %p1313_p3 = scmp.ne.s32.totalorder %s30_s22, %s1312_s30  ;;  %p1318_p5 = scmp.lt.s32.totalorder %s1312_s30, %s1312_s30 }
   0xb   :  { %p1319_p6 = por %p1318_p5, %p1317_p4 }
   0xd   :  { %p1320_p7 = pnand %p1319_p6, %p1313_p3 }
   0xf   :  { %1323 = shalt.err (!%p1320_p7)
}
  0x10   :  { %32 = dma.hbm_to_vmem [thread:$0]  %s1733_s5, 128, %s30_s22, [#allocation4]  }
  0x11   :  { %1346 = dma.done.wait [#allocation4], 128  }
  0x12   :  { %1347 = vsyncadd [#allocation4], 4294967168  ;;  %v1351_v0 = vmov 0.0|0.0   ;;  %v1352_v1 = vmov 0.0   ;;  %vm1353_vm0 = vmmov 0   ;;  %v54_v2 = vld [vmem:[%s1729_s1] sm:$0xff] }
  0x13   :  { %1173 = vmatprep.subr.bf16.mxu0 %v1351_v0  ;;  %1197 = vmatprep.subr.bf16.mxu1 %v1351_v0  ;;  %36 = vst [vmem:[#allocation2] sm:$0xff] %v1352_v1  ;;  %37 = vst [vmem:[#allocation2 + $0x8] sm:$0xff] %v1352_v1  ;;  %v55_v3 = vld [vmem:[%s1729_s1 + $0x8] sm:$0xff]  ;;  %v816_v4 = vld [vmem:[%s1729_s1 + $0x80] sm:$0xff]  ;;  %vm377_vm1 = vcmask 1046528   ;;  %vm390_vm2 = vcmask 1045504  }
  0x14   :  { %38 = vst [vmem:[#allocation2 + $0x10] sm:$0xff] %v1352_v1  ;;  %39 = vst [vmem:[#allocation2 + $0x18] sm:$0xff] %v1352_v1  ;;  %984 = vmatprep.mubr.msk.f32.mxu0 %vm1353_vm0, %v1352_v1  ;;  %1031 = vmatprep.mubr.msk.f32.mxu1 %vm1353_vm0, %v1352_v1  ;;  %v1174_v5 = vpack.c.bf16 %v55_v3, %v54_v2  ;;  %v817_v6 = vld [vmem:[%s1729_s1 + $0x88] sm:$0xff]  ;;  %v56_v7 = vld [vmem:[%s1729_s1 + $0x10] sm:$0xff]  ;;  %vm530_vm3 = vcmask 64512   ;;  %s1354_s16 = smov [#allocation6]  }
  0x15   :  { %40 = vst [vmem:[#allocation2 + $0x20] sm:$0xf] %v1352_v1  ;;  %v57_v8 = vld [vmem:[%s1729_s1 + $0x18] sm:$0xff]  ;;  %v1198_v9 = vpack.c.bf16 %v817_v6, %v816_v4  ;;  %v818_v10 = vld [vmem:[%s1729_s1 + $0x90] sm:$0xff]  ;;  %v58_v14 = vld [vmem:[%s1729_s1 + $0x20] sm:$0xff]  ;;  %s804_s17 = sshll.u32 %s1354_s16, 4  ;;  %s805_s17 = int_to_ptr.vmem [resolvable:$true] %s804_s17 }
  0x16   :  { %v819_v11 = vld [vmem:[%s1729_s1 + $0x98] sm:$0xff]  ;;  %1175 = vmatpush3.bf16.msra.mxu0 %v1174_v5  ;;  %v1177_v12 = vpack.c.bf16 %v57_v8, %v56_v7  ;;  %v59_v15 = vld [vmem:[%s1729_s1 + $0x28] sm:$0xff]  ;;  %v820_v16 = vld [vmem:[%s1729_s1 + $0xa0] sm:$0xff]  ;;  %p1329_p9 = scmp.lt.s32.totalorder %s805_s17, %s805_s17 }
  0x17   :  { %1199 = vmatpush3.bf16.msra.mxu1 %v1198_v9  ;;  %1176 = vmatprep.subr.bf16.mxu0 %v1351_v0  ;;  %v1201_v13 = vpack.c.bf16 %v819_v11, %v818_v10  ;;  %v821_v17 = vld [vmem:[%s1729_s1 + $0xa8] sm:$0xff]  ;;  %v1180_v18 = vpack.c.bf16 %v59_v15, %v58_v14  ;;  %v60_v20 = vld [vmem:[%s1729_s1 + $0x30] sm:$0xff]  ;;  %v61_v21 = vld [vmem:[%s1729_s1 + $0x38] sm:$0xff] }
  0x18   :  { %1200 = vmatprep.subr.bf16.mxu1 %v1351_v0  ;;  %v1204_v19 = vpack.c.bf16 %v821_v17, %v820_v16  ;;  %v822_v22 = vld [vmem:[%s1729_s1 + $0xb0] sm:$0xff]  ;;  %v823_v23 = vld [vmem:[%s1729_s1 + $0xb8] sm:$0xff]  ;;  %v41_v24 = vld [vmem:[%s1728_s0] sm:$0xff]  ;;  %v1183_v25 = vpack.c.bf16 %v61_v21, %v60_v20 }
  0x19   :  { %43 = vst [vmem:[#allocation2 + $0x1] sm:$0xff] %v41_v24  ;;  %v42_v26 = vld [vmem:[%s1728_s0 + $0x8] sm:$0xff]  ;;  %v1207_v27 = vpack.c.bf16 %v823_v23, %v822_v22  ;;  %v62_v28 = vld [vmem:[%s1729_s1 + $0x40] sm:$0xff]  ;;  %v45_v32 = vld [vmem:[%s1728_s0 + $0x10] sm:$0xff] }
  0x1a   :  { %1178 = vmatpush3.bf16.msra.mxu0 %v1177_v12  ;;  %v63_v29 = vld [vmem:[%s1729_s1 + $0x48] sm:$0xff]  ;;  %44 = vst [vmem:[#allocation2 + $0x9] sm:$0xff] %v42_v26  ;;  %v824_v30 = vld [vmem:[%s1729_s1 + $0xc0] sm:$0xff]  ;;  %47 = vst [vmem:[#allocation2 + $0x13] sm:$0xff] %v45_v32 }
  0x1b   :  { %1202 = vmatpush3.bf16.msra.mxu1 %v1201_v13  ;;  %1179 = vmatprep.subr.bf16.mxu0 %v1351_v0  ;;  %v825_v31 = vld [vmem:[%s1729_s1 + $0xc8] sm:$0xff]  ;;  %v46_v33 = vld [vmem:[%s1728_s0 + $0x18] sm:$0xff]  ;;  %v1186_v34 = vpack.c.bf16 %v63_v29, %v62_v28  ;;  %v64_v36 = vld [vmem:[%s1729_s1 + $0x50] sm:$0xff] }
  0x1c   :  { %1203 = vmatprep.subr.bf16.mxu1 %v1351_v0  ;;  %48 = vst [vmem:[#allocation2 + $0x1b] sm:$0xff] %v46_v33  ;;  %v1210_v35 = vpack.c.bf16 %v825_v31, %v824_v30  ;;  %v65_v37 = vld [vmem:[%s1729_s1 + $0x58] sm:$0xff]  ;;  %v826_v38 = vld [vmem:[%s1729_s1 + $0xd0] sm:$0xff]  ;;  %v66_v42 = vld [vmem:[%s1729_s1 + $0x60] sm:$0xff] }
  0x1d   :  { %v827_v39 = vld [vmem:[%s1729_s1 + $0xd8] sm:$0xff]  ;;  %v1189_v40 = vpack.c.bf16 %v65_v37, %v64_v36  ;;  %v67_v43 = vld [vmem:[%s1729_s1 + $0x68] sm:$0xff]  ;;  %v828_v44 = vld [vmem:[%s1729_s1 + $0xe0] sm:$0xff] }
  0x1e   :  { %1181 = vmatpush3.bf16.msra.mxu0 %v1180_v18  ;;  %v1213_v41 = vpack.c.bf16 %v827_v39, %v826_v38  ;;  %v829_v45 = vld [vmem:[%s1729_s1 + $0xe8] sm:$0xff]  ;;  %v1192_v46 = vpack.c.bf16 %v67_v43, %v66_v42  ;;  %v68_v48 = vld [vmem:[%s1729_s1 + $0x70] sm:$0xff]  ;;  %v69_v49 = vld [vmem:[%s1729_s1 + $0x78] sm:$0xff] }
  0x1f   :  { %1205 = vmatpush3.bf16.msra.mxu1 %v1204_v19  ;;  %1182 = vmatprep.subr.bf16.mxu0 %v1351_v0  ;;  %v1216_v47 = vpack.c.bf16 %v829_v45, %v828_v44  ;;  %v830_v50 = vld [vmem:[%s1729_s1 + $0xf0] sm:$0xff]  ;;  %v831_v51 = vld [vmem:[%s1729_s1 + $0xf8] sm:$0xff]  ;;  %v1195_v52 = vpack.c.bf16 %v69_v49, %v68_v48  ;;  %v832_v54 = vld [vmem:[%s1729_s1 + $0x100] sm:$0xff] }
  0x20   :  { %1206 = vmatprep.subr.bf16.mxu1 %v1351_v0  ;;  %v1219_v53 = vpack.c.bf16 %v831_v51, %v830_v50  ;;  %v833_v55 = vld [vmem:[%s1729_s1 + $0x108] sm:$0xff]  ;;  %v1543_v56 = vld [vmem:[#allocation2] sm:$0xff]  ;;  %v834_v58 = vld [vmem:[%s1729_s1 + $0x110] sm:$0xff] }
  0x21   :  { %v1222_v57 = vpack.c.bf16 %v833_v55, %v832_v54  ;;  %v835_v59 = vld [vmem:[%s1729_s1 + $0x118] sm:$0xff]  ;;  %v50_v61 = vld [vmem:[#allocation2 + $0x8] sm:$0xff]  ;;  %v836_v62 = vld [vmem:[%s1729_s1 + $0x120] sm:$0xff] }
  0x22   :  { %1184 = vmatpush3.bf16.msra.mxu0 %v1183_v25  ;;  %v1225_v60 = vpack.c.bf16 %v835_v59, %v834_v58  ;;  %v837_v63 = vld [vmem:[%s1729_s1 + $0x128] sm:$0xff]  ;;  %v51_v3 = vld [vmem:[#allocation2 + $0x10] sm:$0xff]  ;;  %v839_v5 = vld [vmem:[%s1729_s1 + $0x138] sm:$0xff] }
  0x23   :  { %1208 = vmatpush3.bf16.msra.mxu1 %v1207_v27  ;;  %1185 = vmatprep.subr.bf16.mxu0 %v1351_v0  ;;  %v1228_v2 = vpack.c.bf16 %v837_v63, %v836_v62  ;;  %v838_v4 = vld [vmem:[%s1729_s1 + $0x130] sm:$0xff]  ;;  %v52_v7 = vld [vmem:[#allocation2 + $0x18] sm:$0xff]  ;;  %v840_v8 = vld [vmem:[%s1729_s1 + $0x140] sm:$0xff] }
  0x24   :  { %1209 = vmatprep.subr.bf16.mxu1 %v1351_v0  ;;  %v1231_v6 = vpack.c.bf16 %v839_v5, %v838_v4  ;;  %v841_v9 = vld [vmem:[%s1729_s1 + $0x148] sm:$0xff]  ;;  %v53_v11 = vld [vmem:[#allocation2 + $0x20] sm:$0xf]  ;;  %v842_v12 = vld [vmem:[%s1729_s1 + $0x150] sm:$0xff] }
  0x25   :  { %v1234_v10 = vpack.c.bf16 %v841_v9, %v840_v8  ;;  %v843_v13 = vld [vmem:[%s1729_s1 + $0x158] sm:$0xff]  ;;  %v844_v15 = vld [vmem:[%s1729_s1 + $0x160] sm:$0xff]  ;;  %v845_v16 = vld [vmem:[%s1729_s1 + $0x168] sm:$0xff] }
  0x26   :  { %1187 = vmatpush3.bf16.msra.mxu0 %v1186_v34  ;;  %v1237_v14 = vpack.c.bf16 %v843_v13, %v842_v12  ;;  %v1240_v17 = vpack.c.bf16 %v845_v16, %v844_v15  ;;  %v846_v18 = vld [vmem:[%s1729_s1 + $0x170] sm:$0xff]  ;;  %v847_v19 = vld [vmem:[%s1729_s1 + $0x178] sm:$0xff]  ;;  %v434_v21 = vld [vmem:[%s1732_s4] sm:$0xff] }
  0x27   :  { %1211 = vmatpush3.bf16.msra.mxu1 %v1210_v35  ;;  %1188 = vmatprep.subr.bf16.mxu0 %v1351_v0  ;;  %v1243_v20 = vpack.c.bf16 %v847_v19, %v846_v18  ;;  %v435_v22 = vld [vmem:[%s1732_s4 + $0x8] sm:$0xff]  ;;  %v436_v24 = vld [vmem:[%s1732_s4 + $0x10] sm:$0xff]  ;;  %v437_v25 = vld [vmem:[%s1732_s4 + $0x18] sm:$0xff] }
  0x28   :  { %1212 = vmatprep.subr.bf16.mxu1 %v1351_v0  ;;  %v1246_v23 = vpack.c.bf16 %v435_v22, %v434_v21  ;;  %v1249_v26 = vpack.c.bf16 %v437_v25, %v436_v24  ;;  %v438_v27 = vld [vmem:[%s1732_s4 + $0x20] sm:$0xff]  ;;  %v439_v28 = vld [vmem:[%s1732_s4 + $0x28] sm:$0xff]  ;;  %v440_v30 = vld [vmem:[%s1732_s4 + $0x30] sm:$0xff] }
  0x29   :  { %v1252_v29 = vpack.c.bf16 %v439_v28, %v438_v27  ;;  %v441_v31 = vld [vmem:[%s1732_s4 + $0x38] sm:$0xff]  ;;  %v442_v33 = vld [vmem:[%s1732_s4 + $0x40] sm:$0xff]  ;;  %v443_v34 = vld [vmem:[%s1732_s4 + $0x48] sm:$0xff] }
  0x2a   :  { %1190 = vmatpush3.bf16.msra.mxu0 %v1189_v40  ;;  %v1255_v32 = vpack.c.bf16 %v441_v31, %v440_v30  ;;  %v1258_v35 = vpack.c.bf16 %v443_v34, %v442_v33  ;;  %v444_v36 = vld [vmem:[%s1732_s4 + $0x50] sm:$0xff]  ;;  %v445_v37 = vld [vmem:[%s1732_s4 + $0x58] sm:$0xff]  ;;  %v446_v39 = vld [vmem:[%s1732_s4 + $0x60] sm:$0xff] }
  0x2b   :  { %1214 = vmatpush3.bf16.msra.mxu1 %v1213_v41  ;;  %1191 = vmatprep.subr.bf16.mxu0 %v1351_v0  ;;  %v1261_v38 = vpack.c.bf16 %v445_v37, %v444_v36  ;;  %v447_v40 = vld [vmem:[%s1732_s4 + $0x68] sm:$0xff]  ;;  %v448_v42 = vld [vmem:[%s1732_s4 + $0x70] sm:$0xff]  ;;  %v449_v43 = vld [vmem:[%s1732_s4 + $0x78] sm:$0xff] }
  0x2c   :  { %1215 = vmatprep.subr.bf16.mxu1 %v1351_v0  ;;  %v1264_v41 = vpack.c.bf16 %v447_v40, %v446_v39  ;;  %v1267_v44 = vpack.c.bf16 %v449_v43, %v448_v42 }
  0x2e   :  { %1193 = vmatpush3.bf16.msra.mxu0 %v1192_v46 }
  0x2f   :  { %1217 = vmatpush3.bf16.msra.mxu1 %v1216_v47  ;;  %1194 = vmatprep.subr.bf16.mxu0 %v1351_v0 }
  0x30   :  { %1218 = vmatprep.subr.bf16.mxu1 %v1351_v0 }
  0x32   :  { %1196 = vmatpush3.bf16.msra.mxu0 %v1195_v52 }
  0x33   :  { %1220 = vmatpush3.bf16.msra.mxu1 %v1219_v53  ;;  %1221 = vmatprep.subr.bf16.mxu0 %v1351_v0 }
  0x34   :  { %1245 = vmatprep.subr.bf16.mxu1 %v1351_v0 }
  0x35   :  { %985 = vmatmul.mubr.f32.vlgmr.msra.gmra.mrb[0].mxu0 %v1543_v56 }
  0x36   :  { %1032 = vmatmul.mubr.f32.vlgmr.msra.gmra.mrb[0].mxu1 %v1543_v56  ;;  %1223 = vmatpush3.bf16.msra.mxu0 %v1222_v57 }
  0x37   :  { %1034 = vmatprep.mubr.msk.f32.mxu1 %vm1353_vm0, %v1352_v1  ;;  %1224 = vmatprep.subr.bf16.mxu0 %v1351_v0 }
  0x38   :  { %987 = vmatprep.mubr.msk.f32.mxu0 %vm1353_vm0, %v1352_v1  ;;  %1247 = vmatpush3.bf16.msra.mxu1 %v1246_v23 }
  0x39   :  { %988 = vmatmul.mubr.f32.gmra.mrb[2].mxu0 %v50_v61  ;;  %1248 = vmatprep.subr.bf16.mxu1 %v1351_v0 }
  0x3a   :  { %1035 = vmatmul.mubr.f32.gmra.mrb[2].mxu1 %v50_v61  ;;  %1226 = vmatpush3.bf16.msra.mxu0 %v1225_v60 }
  0x3b   :  { %1227 = vmatprep.subr.bf16.mxu0 %v1351_v0  ;;  %1037 = vmatprep.mubr.msk.f32.mxu1 %vm1353_vm0, %v1352_v1 }
  0x3c   :  { %990 = vmatprep.mubr.msk.f32.mxu0 %vm1353_vm0, %v1352_v1  ;;  %1250 = vmatpush3.bf16.msra.mxu1 %v1249_v26 }
  0x3d   :  { %991 = vmatmul.mubr.f32.gmra.mrb[4].mxu0 %v51_v3  ;;  %1251 = vmatprep.subr.bf16.mxu1 %v1351_v0 }
  0x3e   :  { %1229 = vmatpush3.bf16.msra.mxu0 %v1228_v2  ;;  %1038 = vmatmul.mubr.f32.gmra.mrb[4].mxu1 %v51_v3 }
  0x3f   :  { %1230 = vmatprep.subr.bf16.mxu0 %v1351_v0  ;;  %1040 = vmatprep.mubr.msk.f32.mxu1 %vm1353_vm0, %v1352_v1 }
  0x40   :  { %993 = vmatprep.mubr.msk.f32.mxu0 %vm1353_vm0, %v1352_v1  ;;  %1253 = vmatpush3.bf16.msra.mxu1 %v1252_v29 }
  0x41   :  { %994 = vmatmul.mubr.f32.gmra.mrb[6].mxu0 %v52_v7  ;;  %1254 = vmatprep.subr.bf16.mxu1 %v1351_v0 }
  0x42   :  { %1232 = vmatpush3.bf16.msra.mxu0 %v1231_v6  ;;  %1041 = vmatmul.mubr.f32.gmra.mrb[6].mxu1 %v52_v7 }
  0x43   :  { %1233 = vmatprep.subr.bf16.mxu0 %v1351_v0  ;;  %1043 = vmatprep.mubr.msk.f32.mxu1 %vm1353_vm0, %v1352_v1 }
  0x44   :  { %996 = vmatprep.mubr.msk.f32.mxu0 %vm1353_vm0, %v1352_v1  ;;  %1256 = vmatpush3.bf16.msra.mxu1 %v1255_v32 }
  0x45   :  { %997 = vmatmul.mubr.f32.gmra.mrb[8].mxu0 %v53_v11  ;;  %1257 = vmatprep.subr.bf16.mxu1 %v1351_v0 }
  0x46   :  { %1235 = vmatpush3.bf16.msra.mxu0 %v1234_v10  ;;  %1044 = vmatmul.mubr.f32.gmra.mrb[8].mxu1 %v53_v11 }
  0x47   :  { %1236 = vmatprep.subr.bf16.mxu0 %v1351_v0  ;;  %1078 = vmatprep.mubr.msk.f32.mxu0 %vm1353_vm0, %v1352_v1 }
  0x48   :  { %1125 = vmatprep.mubr.msk.f32.mxu1 %vm1353_vm0, %v1352_v1  ;;  %1259 = vmatpush3.bf16.msra.mxu1 %v1258_v35 }
  0x49   :  { %1260 = vmatprep.subr.bf16.mxu1 %v1351_v0 }
  0x4a   :  { %1238 = vmatpush3.bf16.msra.mxu0 %v1237_v14 }
  0x4b   :  { %1239 = vmatprep.subr.bf16.mxu0 %v1351_v0 }
  0x4c   :  { %1262 = vmatpush3.bf16.msra.mxu1 %v1261_v38 }
  0x4d   :  { %1263 = vmatprep.subr.bf16.mxu1 %v1351_v0 }
  0x4e   :  { %1241 = vmatpush3.bf16.msra.mxu0 %v1240_v17 }
  0x4f   :  { %1242 = vmatprep.subr.bf16.mxu0 %v1351_v0 }
  0x50   :  { %1265 = vmatpush3.bf16.msra.mxu1 %v1264_v41 }
  0x51   :  { %1266 = vmatprep.subr.bf16.mxu1 %v1351_v0 }
  0x52   :  { %1244 = vmatpush3.bf16.msra.mxu0 %v1243_v20 }
  0x53   :  { %1269 = vmatprep.subr.bf16.mxu0 %v1351_v0 }
  0x54   :  { %1268 = vmatpush3.bf16.msra.mxu1 %v1267_v44 }
  0x55   :  { %1079 = vmatmul.mubr.f32.vlgmr.msra.gmra.mrb[10].mxu0 %v1543_v56  ;;  %1128 = vmatprep.subr.mxu1 %v1352_v1 }
  0x56   :  { %1081 = vmatprep.mubr.msk.f32.mxu0 %vm1353_vm0, %v1352_v1  ;;  %1271 = vmatpush3.bf16.msra.mxu0 %v1246_v23 }
  0x57   :  { %1272 = vmatprep.subr.bf16.mxu0 %v1351_v0 }
  0x59   :  { %1082 = vmatmul.mubr.f32.gmra.mrb[12].mxu0 %v50_v61 }
  0x5a   :  { %1084 = vmatprep.mubr.msk.f32.mxu0 %vm1353_vm0, %v1352_v1  ;;  %1274 = vmatpush3.bf16.msra.mxu0 %v1249_v26 }
  0x5b   :  { %1275 = vmatprep.subr.bf16.mxu0 %v1351_v0 }
  0x5d   :  { %1085 = vmatmul.mubr.f32.gmra.mrb[14].mxu0 %v51_v3 }
  0x5e   :  { %1087 = vmatprep.mubr.msk.f32.mxu0 %vm1353_vm0, %v1352_v1  ;;  %1277 = vmatpush3.bf16.msra.mxu0 %v1252_v29 }
  0x5f   :  { %1278 = vmatprep.subr.bf16.mxu0 %v1351_v0 }
  0x61   :  { %1088 = vmatmul.mubr.f32.gmra.mrb[16].mxu0 %v52_v7 }
  0x62   :  { %1090 = vmatprep.mubr.msk.f32.mxu0 %vm1353_vm0, %v1352_v1  ;;  %1280 = vmatpush3.bf16.msra.mxu0 %v1255_v32 }
  0x63   :  { %1281 = vmatprep.subr.bf16.mxu0 %v1351_v0 }
  0x65   :  { %1091 = vmatmul.mubr.f32.gmra.mrb[18].mxu0 %v53_v11 }
  0x66   :  { %1165 = vmatprep.mubr.msk.f32.mxu0 %vm1353_vm0, %v1352_v1  ;;  %1283 = vmatpush3.bf16.msra.mxu0 %v1258_v35 }
  0x67   :  { %1284 = vmatprep.subr.bf16.mxu0 %v1351_v0 }
  0x6a   :  { %1286 = vmatpush3.bf16.msra.mxu0 %v1261_v38 }
  0x6b   :  { %1287 = vmatprep.subr.bf16.mxu0 %v1351_v0 }
  0x6e   :  { %1289 = vmatpush3.bf16.msra.mxu0 %v1264_v41 }
  0x6f   :  { %1290 = vmatprep.subr.bf16.mxu0 %v1351_v0 }
  0x72   :  { %1292 = vmatpush3.bf16.msra.mxu0 %v1267_v44 }
 0x108   :  { %v136_v45 = vpop.f32.mrb[0].mxu0 }
 0x109   :  { %v986_v46 = vpop.f32.mrb[1].mxu0  ;;  %v243_v47 = vpop.f32.mrb[0].mxu1 }
 0x10a   :  { %v1033_v48 = vpop.f32.mrb[1].mxu1  ;;  %v378_v49 = vrot.slane %v243_v47, 1 }
 0x10c   :  { %v141_v50 = vpop.f32.mrb[2].mxu0 }
 0x10d   :  { %v248_v51 = vpop.f32.mrb[2].mxu1  ;;  %v989_v52 = vpop.f32.mrb[3].mxu0 }
 0x10e   :  { %v379_v53 = vrot.slane %v248_v51, 1  ;;  %v1036_v54 = vpop.f32.mrb[3].mxu1 }
 0x10f   :  { %v450_v54 = vld [vmem:[#allocation3] sm:$0xff] }
 0x110   :  { %v380_v55 = vsel %vm377_vm1, %v378_v49, %v379_v53  ;;  %v146_v56 = vpop.f32.mrb[4].mxu0 }
 0x111   :  { %v385_v57 = vadd.f32 %v380_v55, %v136_v45  ;;  %v253_v0 = vpop.f32.mrb[4].mxu1  ;;  %v992_v58 = vpop.f32.mrb[5].mxu0 }
 0x112   :  { %v381_v59 = vrot.slane %v253_v0, 1  ;;  %v1039_v60 = vpop.f32.mrb[5].mxu1 }
 0x114   :  { %v382_v61 = vsel %vm377_vm1, %v379_v53, %v381_v59  ;;  %v151_v62 = vpop.f32.mrb[6].mxu0 }
 0x115   :  { %v386_v63 = vadd.f32 %v382_v61, %v141_v50  ;;  %v258_v2 = vpop.f32.mrb[6].mxu1  ;;  %v995_v3 = vpop.f32.mrb[7].mxu0 }
 0x116   :  { %v402_v4 = vrot.slane %v258_v2, 1  ;;  %v1042_v5 = vpop.f32.mrb[7].mxu1 }
 0x118   :  { %v403_v6 = vsel %vm377_vm1, %v381_v59, %v402_v4  ;;  %v156_v7 = vpop.f32.mrb[8].mxu0 }
 0x119   :  { %v409_v8 = vadd.f32 %v403_v6, %v146_v56  ;;  %v263_v9 = vpop.f32.mrb[8].mxu1  ;;  %v998_v10 = vpop.f32.mrb[9].mxu0 }
 0x11a   :  { %v404_v11 = vrot.slane %v263_v9, 1  ;;  %v1045_v12 = vpop.f32.mrb[9].mxu1 }
 0x11c   :  { %v405_v13 = vsel %vm377_vm1, %v402_v4, %v404_v11  ;;  %v411_v14 = vadd.f32 %v404_v11, %v156_v7 }
 0x11d   :  { %v410_v15 = vadd.f32 %v405_v13, %v151_v62 }
 0x128   :  { %v350_v16 = vpop.f32.mrb[10].mxu0 }
 0x129   :  { %v1080_v17 = vpop.f32.mrb[11].mxu0  ;;  %v391_v19 = vrot.slane %v350_v16, 2 }
 0x12c   :  { %v355_v18 = vpop.f32.mrb[12].mxu0 }
 0x12d   :  { %v392_v20 = vrot.slane %v355_v18, 2  ;;  %v1083_v21 = vpop.f32.mrb[13].mxu0 }
 0x12f   :  { %v393_v22 = vsel %vm390_vm2, %v391_v19, %v392_v20 }
 0x130   :  { %v398_v23 = vadd.f32 %v393_v22, %v385_v57  ;;  %v360_v24 = vpop.f32.mrb[14].mxu0  ;;  %v605_v57 = vlaneseq }
 0x131   :  { %v394_v25 = vrot.slane %v360_v24, 2  ;;  %v1086_v26 = vpop.f32.mrb[15].mxu0 }
 0x132   :  { %v606_v0 = vshrl.u32 %v605_v57, 7 }
 0x133   :  { %v395_v27 = vsel %vm390_vm2, %v392_v20, %v394_v25 }
 0x134   :  { %v399_v28 = vadd.f32 %v395_v27, %v386_v63  ;;  %v365_v29 = vpop.f32.mrb[16].mxu0  ;;  %v607_v58 = vsub.s32 0, %v606_v0  ;;  %v850_v27 = vld [vmem:[%s1731_s3] ss:$0 sm:$0xff] }
 0x135   :  { %v414_v30 = vrot.slane %v365_v29, 2  ;;  %v1089_v31 = vpop.f32.mrb[17].mxu0 }
 0x136   :  { %v451_v43 = vadd.f32 %v399_v28, %v398_v23 }
 0x137   :  { %v415_v32 = vsel %vm390_vm2, %v394_v25, %v414_v30 }
 0x138   :  { %v421_v33 = vadd.f32 %v415_v32, %v409_v8  ;;  %v370_v34 = vpop.f32.mrb[18].mxu0 }
 0x139   :  { %v416_v35 = vrot.slane %v370_v34, 2  ;;  %v1092_v36 = vpop.f32.mrb[19].mxu0 }
 0x13a   :  { %v427_v41 = vrot.slane %v421_v33, 2 }
 0x13b   :  { %v417_v37 = vsel %vm390_vm2, %v414_v30, %v416_v35  ;;  %v423_v38 = vadd.f32 %v416_v35, %v411_v14 }
 0x13c   :  { %v422_v39 = vadd.f32 %v417_v37, %v410_v15 }
 0x13d   :  { %v430_v40 = vrot.slane %v423_v38, 2 }
 0x13e   :  { %v428_v42 = vrot.slane %v422_v39, 2 }
 0x140   :  { %v429_v44 = vsel %vm390_vm2, %v427_v41, %v428_v42  ;;  %v431_v45 = vsel %vm390_vm2, %v428_v42, %v430_v40 }
 0x141   :  { %v452_v46 = vadd.f32 %v451_v43, %v429_v44 }
 0x143   :  { %v453_v47 = vadd.f32 %v452_v46, %v431_v45 }
 0x145   :  { %v454_v48 = vrot.slane %v453_v47, 4 }
 0x147   :  { %v455_v49 = vadd.f32 %v454_v48, %v453_v47 }
 0x149   :  { %v456_v50 = vrot.slane %v455_v49, 2 }
 0x14b   :  { %v457_v51 = vadd.f32 %v456_v50, %v455_v49 }
 0x14d   :  { %v458_v52 = vrot.slane %v457_v51, 1 }
 0x14f   :  { %v459_v53 = vadd.f32 %v458_v52, %v457_v51 }
 0x151   :  { %1126 = vmatmul.mubr.f32.vlgmr.msra.gmra.mrb[10].mxu1 %v459_v53 }
 0x152   :  { %1129 = vmatpush3.msra.mxu1 %v450_v54  ;;  %1130 = vmatprep.mubr.msk.f32.mxu1 %vm1353_vm0, %v1352_v1 }
 0x153   :  { %1168 = vmatprep.subr.mxu1 %v1352_v1 }
 0x224   :  { %v526_v55 = vpop.f32.mrb[10].mxu1 }
 0x225   :  { %v1127_v56 = vpop.f32.mrb[11].mxu1  ;;  %1131 = vmatmul.mubr.msk.f32.vlgmr.msra.gmra.mrb[12].mxu1 %vm530_vm3, %v526_v55 }
 0x226   :  { %1169 = vmatpush3.msra.mxu1 %v450_v54  ;;  %1170 = vmatprep.mubr.msk.f32.mxu1 %vm1353_vm0, %v1352_v1 }
 0x2f8   :  { %v600_v59 = vpop.f32.mrb[12].mxu1 }
 0x2f9   :  { %v604_v60 = vmul.f32 0.001953125, %v600_v59  ;;  %v1132_v61 = vpop.f32.mrb[13].mxu1 }
 0x2fb   :  { %v608_v62 = vrot.slane %v604_v60, %v607_v58 }
 0x2fd   :  { %v609_v63 = vsub.f32 %v398_v23, %v608_v62  ;;  %v610_v2 = vsub.f32 %v399_v28, %v608_v62  ;;  %v611_v3 = vsub.f32 %v429_v44, %v608_v62  ;;  %v612_v4 = vsub.f32 %v431_v45, %v608_v62  ;;  %v770_v23 = vld [vmem:[%s1730_s2] sm:$0x1]  ;;  %s1324_s2 = scalar_lea.vmem %s805_s17, 512 }
 0x2fe   :  { %p1325_p8 = scmp.ne.s32.totalorder %s805_s17, %s1324_s2  ;;  %p1330_p10 = scmp.lt.s32.totalorder %s1324_s2, %s1324_s2 }
 0x2ff   :  { %v613_v5 = vmul.f32 %v609_v63, %v609_v63  ;;  %v614_v6 = vmul.f32 %v610_v2, %v610_v2  ;;  %v615_v7 = vmul.f32 %v611_v3, %v611_v3  ;;  %v616_v9 = vmul.f32 %v612_v4, %v612_v4 }
 0x300   :  { %p1331_p11 = por %p1330_p10, %p1329_p9 }
 0x301   :  { %v617_v8 = vadd.f32 %v614_v6, %v613_v5 }
 0x302   :  { %p1332_p12 = pnand %p1331_p11, %p1325_p8 }
 0x303   :  { %v618_v10 = vadd.f32 %v617_v8, %v615_v7 }
 0x305   :  { %v619_v11 = vadd.f32 %v618_v10, %v616_v9 }
 0x307   :  { %v620_v12 = vrot.slane %v619_v11, 4 }
 0x309   :  { %v621_v1 = vadd.f32 %v620_v12, %v619_v11 }
 0x30b   :  { %v622_v13 = vrot.slane %v621_v1, 2 }
 0x30d   :  { %v623_v14 = vadd.f32 %v622_v13, %v621_v1 }
 0x30f   :  { %v624_v15 = vrot.slane %v623_v14, 1 }
 0x311   :  { %v625_v16 = vadd.f32 %v624_v15, %v623_v14 }
 0x313   :  { %1166 = vmatmul.mubr.f32.vlgmr.msra.gmra.mrb[20].mxu0 %v625_v16 }
 0x3e6   :  { %v692_v17 = vpop.f32.mrb[20].mxu0 }
 0x3e7   :  { %v1167_v18 = vpop.f32.mrb[21].mxu0  ;;  %1171 = vmatmul.mubr.msk.f32.vlgmr.msra.gmra.mrb[14].mxu1 %vm530_vm3, %v692_v17 }
 0x4ba   :  { %v765_v19 = vpop.f32.mrb[14].mxu1 }
 0x4bb   :  { %v769_v20 = vmul.f32 0.001953125, %v765_v19  ;;  %v1172_v21 = vpop.f32.mrb[15].mxu1 }
 0x4bd   :  { %v771_v22 = vadd.f32 1e-05, %v769_v20 }
 0x4bf   :  { %1300 = vrsqrt.f32 %v771_v22 }
 0x4c9   :  { %v1301_v24 = vpop.eup %1300 }
 0x4ca   :  { %v773_v25 = vmul.f32 %v1301_v24, %v770_v23 }
 0x4cc   :  { %v778_v26 = vrot.slane %v773_v25, %v607_v58 }
 0x4ce   :  { %v780_v28 = vmul.f32 %v778_v26, %v609_v63  ;;  %v781_v29 = vmul.f32 %v778_v26, %v610_v2  ;;  %v782_v30 = vmul.f32 %v778_v26, %v611_v3  ;;  %v783_v31 = vmul.f32 %v778_v26, %v612_v4 }
 0x4d0   :  { %v791_v32 = vadd.f32 %v850_v27, %v780_v28  ;;  %v792_v33 = vadd.f32 %v850_v27, %v781_v29  ;;  %v793_v34 = vadd.f32 %v850_v27, %v782_v30  ;;  %v794_v35 = vadd.f32 %v850_v27, %v783_v31 }
 0x4d2   :  { %795 = vst [vmem:[#allocation6] sm:$0xff] %v791_v32  ;;  %796 = vst [vmem:[#allocation6 + $0x8] sm:$0xff] %v792_v33 }
 0x4d3   :  { %797 = vst [vmem:[#allocation6 + $0x10] sm:$0xff] %v793_v34  ;;  %798 = vst [vmem:[#allocation6 + $0x18] sm:$0xff] %v794_v35 }
 0x4d4   :  { %1335 = shalt.err (!%p1332_p12)
}
 0x4d5   :  { %s1336_s19 = scalar_lea.hbm %s1734_s6, 512 }
 0x4d6   :  { %p1337_p13 = scmp.ne.s32.totalorder %s1734_s6, %s1336_s19  ;;  %p1340_p0 = scmp.lt.u32.totalorder %s1336_s19, %s1734_s6 }
 0x4d8   :  { %p1342_p1 = pnand %p1340_p0, %p1337_p13 }
 0x4da   :  { %1345 = shalt.err (!%p1342_p1)
}
 0x4db   :  { %s1355_s24 = smov 128   ;;  %s1356_s25 = smov 8  }
 0x4dc   :  { %810 = dma.vmem_to_hbm [thread:$0]  %s805_s17, 512, %s1734_s6, [#allocation5], %s1355_s24, %s1355_s24, %s1356_s25  }
 0x4dd   :  { %1348 = dma.done.wait [#allocation5], 512  }
 0x4de   :  { %1349 = vsyncadd [#allocation5], 4294966784 }
 0x4df   :  { %814 = vsyncpa [#allocation4], 1 }
 0x4e0   :  { %815 = vsyncpa [#allocation5], 1 }

// kernel: _forward_impl.5
= control target key start
LH: loop header
LB: loop body
LE: loop exit
PB: predicated region body
PF: predicated region fallthrough
CT: control target
= control target key end

     0   :  { %13 = vsyncpa [#allocation4], 0  ;;  %s1878_s0 = inlined_call_operand.hbm [shape: f32[32,128], index: 0, kind: input, shape index: {}]   ;;  %s1879_s1 = inlined_call_operand.vmem [shape: f32[3,128,128], index: 1, kind: input, shape index: {}]   ;;  %s1880_s2 = inlined_call_operand.vmem [shape: f32[1,128], index: 2, kind: input, shape index: {}]   ;;  %s1881_s3 = inlined_call_operand.vmem [shape: f32[1,128], index: 3, kind: input, shape index: {}]   ;;  %s1882_s4 = inlined_call_operand.vmem [shape: f32[128,8], index: 4, kind: input, shape index: {}]   ;;  %s1883_s5 = inlined_call_operand.hbm [shape: f32[8,128], index: 5, kind: input, shape index: {}]   ;;  %s1884_s6 = inlined_call_operand.vmem [shape: f32[32,128], index: 6, kind: input, shape index: {}]   ;;  %s1885_s7 = inlined_call_operand.hbm [shape: f32[32,128], index: 7, kind: input, shape index: {}]   ;;  %s1886_s8 = inlined_call_operand.hbm [shape: f32[32,128], index: 8, kind: output, shape index: {}]  }
   0x1   :  { %14 = vsyncpa [#allocation7], 0 }
   0x2   :  { %15 = vsyncpa [#allocation5], 0  ;;  %s1448_s27 = smov [#allocation6]   ;;  %s1449_s29 = smov [#allocation3]  }
   0x3   :  { %s42_s28 = sshll.u32 %s1448_s27, 4  ;;  %s21_s30 = sshll.u32 %s1449_s29, 4  ;;  %s43_s28 = int_to_ptr.vmem [resolvable:$true] %s42_s28  ;;  %s1502_s30 = int_to_ptr.vmem [resolvable:$true] %s21_s30 }
   0x4   :  { %s1354_s11 = scalar_lea.hbm %s1883_s5, 128 }
   0x5   :  { %p1355_p0 = scmp.ne.s32.totalorder %s1883_s5, %s1354_s11  ;;  %p1358_p1 = scmp.lt.u32.totalorder %s1354_s11, %s1883_s5 }
   0x7   :  { %p1360_p2 = pnand %p1358_p1, %p1355_p0 }
   0x9   :  { %1363 = shalt.err (!%p1360_p2)
}
   0xa   :  { %s1364_s16 = scalar_lea.vmem %s43_s28, 128  ;;  %p1369_p4 = scmp.lt.s32.totalorder %s43_s28, %s43_s28 }
   0xb   :  { %p1365_p3 = scmp.ne.s32.totalorder %s43_s28, %s1364_s16  ;;  %p1370_p5 = scmp.lt.s32.totalorder %s1364_s16, %s1364_s16 }
   0xd   :  { %p1371_p6 = por %p1370_p5, %p1369_p4 }
   0xf   :  { %p1372_p7 = pnand %p1371_p6, %p1365_p3 }
  0x11   :  { %1375 = shalt.err (!%p1372_p7)
}
  0x12   :  { %45 = dma.hbm_to_vmem [thread:$0]  %s1883_s5, 128, %s43_s28, [#allocation7]  }
  0x13   :  { %s1376_s21 = scalar_lea.hbm %s1878_s0, 512 }
  0x14   :  { %p1377_p8 = scmp.ne.s32.totalorder %s1878_s0, %s1376_s21  ;;  %p1380_p9 = scmp.lt.u32.totalorder %s1376_s21, %s1878_s0 }
  0x16   :  { %p1382_p10 = pnand %p1380_p9, %p1377_p8 }
  0x18   :  { %1385 = shalt.err (!%p1382_p10)
}
  0x19   :  { %s1386_s26 = scalar_lea.vmem %s1502_s30, 512  ;;  %p1391_p12 = scmp.lt.s32.totalorder %s1502_s30, %s1502_s30 }
  0x1a   :  { %p1387_p11 = scmp.ne.s32.totalorder %s1502_s30, %s1386_s26  ;;  %p1392_p13 = scmp.lt.s32.totalorder %s1386_s26, %s1386_s26 }
  0x1c   :  { %p1393_p0 = por %p1392_p13, %p1391_p12 }
  0x1e   :  { %p1394_p1 = pnand %p1393_p0, %p1387_p11 }
  0x20   :  { %1397 = shalt.err (!%p1394_p1)
}
  0x21   :  { %s1450_s5 = smov 128   ;;  %s1451_s27 = smov 8  }
  0x22   :  { %27 = dma.hbm_to_vmem [thread:$0]  %s1878_s0, 512, %s1502_s30, [#allocation4], %s1450_s5, %s1450_s5, %s1451_s27  }
  0x23   :  { %s1452_s9 = smov [#allocation8]   ;;  %s1398_s13 = scalar_lea.hbm %s1885_s7, 512 }
  0x24   :  { %s53_s10 = sshll.u32 %s1452_s9, 4  ;;  %p1399_p2 = scmp.ne.s32.totalorder %s1885_s7, %s1398_s13  ;;  %s54_s10 = int_to_ptr.vmem [resolvable:$true] %s53_s10 }
  0x25   :  { %p1402_p3 = scmp.lt.u32.totalorder %s1398_s13, %s1885_s7 }
  0x27   :  { %p1404_p4 = pnand %p1402_p3, %p1399_p2 }
  0x29   :  { %1407 = shalt.err (!%p1404_p4)
}
  0x2a   :  { %s1408_s18 = scalar_lea.vmem %s54_s10, 512  ;;  %p1413_p6 = scmp.lt.s32.totalorder %s54_s10, %s54_s10 }
  0x2b   :  { %p1409_p5 = scmp.ne.s32.totalorder %s54_s10, %s1408_s18  ;;  %p1414_p7 = scmp.lt.s32.totalorder %s1408_s18, %s1408_s18 }
  0x2d   :  { %p1415_p8 = por %p1414_p7, %p1413_p6 }
  0x2f   :  { %p1416_p9 = pnand %p1415_p8, %p1409_p5 }
  0x31   :  { %1419 = shalt.err (!%p1416_p9)
}
  0x32   :  { %59 = dma.hbm_to_vmem [thread:$0]  %s1885_s7, 512, %s54_s10, [#allocation7], %s1450_s5, %s1450_s5, %s1451_s27  }
  0x33   :  { %1442 = dma.done.wait [#allocation4], 512  }
  0x34   :  { %1443 = vsyncadd [#allocation4], 4294966784 }
  0x35   :  { %1444 = dma.done.wait [#allocation7], 640  }
  0x36   :  { %1445 = vsyncadd [#allocation7], 4294966656  ;;  %v1453_v0 = vmov 0.0|0.0   ;;  %v1454_v1 = vmov 0.0   ;;  %vm1455_vm0 = vmmov 0   ;;  %v87_v2 = vld [vmem:[%s1879_s1] sm:$0xff] }
  0x37   :  { %1223 = vmatprep.subr.bf16.mxu0 %v1453_v0  ;;  %1247 = vmatprep.subr.bf16.mxu1 %v1453_v0  ;;  %69 = vst [vmem:[#allocation2] sm:$0xff] %v1454_v1  ;;  %70 = vst [vmem:[#allocation2 + $0x8] sm:$0xff] %v1454_v1  ;;  %v88_v3 = vld [vmem:[%s1879_s1 + $0x8] sm:$0xff]  ;;  %v866_v4 = vld [vmem:[%s1879_s1 + $0x80] sm:$0xff]  ;;  %vm410_vm1 = vcmask 1046528   ;;  %vm423_vm2 = vcmask 1045504  }
  0x38   :  { %71 = vst [vmem:[#allocation2 + $0x10] sm:$0xff] %v1454_v1  ;;  %72 = vst [vmem:[#allocation2 + $0x18] sm:$0xff] %v1454_v1  ;;  %1034 = vmatprep.mubr.msk.f32.mxu0 %vm1455_vm0, %v1454_v1  ;;  %1081 = vmatprep.mubr.msk.f32.mxu1 %vm1455_vm0, %v1454_v1  ;;  %v1224_v5 = vpack.c.bf16 %v88_v3, %v87_v2  ;;  %v867_v6 = vld [vmem:[%s1879_s1 + $0x88] sm:$0xff]  ;;  %v89_v7 = vld [vmem:[%s1879_s1 + $0x10] sm:$0xff]  ;;  %vm563_vm3 = vcmask 64512  }
  0x39   :  { %73 = vst [vmem:[#allocation2 + $0x20] sm:$0xf] %v1454_v1  ;;  %v90_v8 = vld [vmem:[%s1879_s1 + $0x18] sm:$0xff]  ;;  %v1248_v9 = vpack.c.bf16 %v867_v6, %v866_v4  ;;  %v868_v10 = vld [vmem:[%s1879_s1 + $0x90] sm:$0xff]  ;;  %v91_v14 = vld [vmem:[%s1879_s1 + $0x20] sm:$0xff] }
  0x3a   :  { %v869_v11 = vld [vmem:[%s1879_s1 + $0x98] sm:$0xff]  ;;  %1225 = vmatpush3.bf16.msra.mxu0 %v1224_v5  ;;  %v1227_v12 = vpack.c.bf16 %v90_v8, %v89_v7  ;;  %v92_v15 = vld [vmem:[%s1879_s1 + $0x28] sm:$0xff]  ;;  %v870_v16 = vld [vmem:[%s1879_s1 + $0xa0] sm:$0xff] }
  0x3b   :  { %1249 = vmatpush3.bf16.msra.mxu1 %v1248_v9  ;;  %1226 = vmatprep.subr.bf16.mxu0 %v1453_v0  ;;  %v1251_v13 = vpack.c.bf16 %v869_v11, %v868_v10  ;;  %v871_v17 = vld [vmem:[%s1879_s1 + $0xa8] sm:$0xff]  ;;  %v1230_v18 = vpack.c.bf16 %v92_v15, %v91_v14  ;;  %v93_v20 = vld [vmem:[%s1879_s1 + $0x30] sm:$0xff]  ;;  %v94_v21 = vld [vmem:[%s1879_s1 + $0x38] sm:$0xff] }
  0x3c   :  { %1250 = vmatprep.subr.bf16.mxu1 %v1453_v0  ;;  %v1254_v19 = vpack.c.bf16 %v871_v17, %v870_v16  ;;  %v872_v22 = vld [vmem:[%s1879_s1 + $0xb0] sm:$0xff]  ;;  %v873_v23 = vld [vmem:[%s1879_s1 + $0xb8] sm:$0xff]  ;;  %v74_v24 = vld [vmem:[#allocation3] sm:$0xff]  ;;  %v1233_v25 = vpack.c.bf16 %v94_v21, %v93_v20 }
  0x3d   :  { %76 = vst [vmem:[#allocation2 + $0x1] sm:$0xff] %v74_v24  ;;  %v75_v26 = vld [vmem:[#allocation3 + $0x8] sm:$0xff]  ;;  %v1257_v27 = vpack.c.bf16 %v873_v23, %v872_v22  ;;  %v95_v28 = vld [vmem:[%s1879_s1 + $0x40] sm:$0xff]  ;;  %v96_v29 = vld [vmem:[%s1879_s1 + $0x48] sm:$0xff] }
  0x3e   :  { %1228 = vmatpush3.bf16.msra.mxu0 %v1227_v12  ;;  %77 = vst [vmem:[#allocation2 + $0x9] sm:$0xff] %v75_v26  ;;  %v874_v30 = vld [vmem:[%s1879_s1 + $0xc0] sm:$0xff]  ;;  %v875_v31 = vld [vmem:[%s1879_s1 + $0xc8] sm:$0xff]  ;;  %v78_v32 = vld [vmem:[#allocation3 + $0x10] sm:$0xff]  ;;  %v1236_v34 = vpack.c.bf16 %v96_v29, %v95_v28 }
  0x3f   :  { %1252 = vmatpush3.bf16.msra.mxu1 %v1251_v13  ;;  %1229 = vmatprep.subr.bf16.mxu0 %v1453_v0  ;;  %80 = vst [vmem:[#allocation2 + $0x13] sm:$0xff] %v78_v32  ;;  %v79_v33 = vld [vmem:[#allocation3 + $0x18] sm:$0xff]  ;;  %v1260_v35 = vpack.c.bf16 %v875_v31, %v874_v30  ;;  %v97_v36 = vld [vmem:[%s1879_s1 + $0x50] sm:$0xff]  ;;  %v98_v37 = vld [vmem:[%s1879_s1 + $0x58] sm:$0xff] }
  0x40   :  { %1253 = vmatprep.subr.bf16.mxu1 %v1453_v0  ;;  %81 = vst [vmem:[#allocation2 + $0x1b] sm:$0xff] %v79_v33  ;;  %v876_v38 = vld [vmem:[%s1879_s1 + $0xd0] sm:$0xff]  ;;  %v877_v39 = vld [vmem:[%s1879_s1 + $0xd8] sm:$0xff]  ;;  %v1239_v40 = vpack.c.bf16 %v98_v37, %v97_v36  ;;  %v99_v42 = vld [vmem:[%s1879_s1 + $0x60] sm:$0xff] }
  0x41   :  { %v1263_v41 = vpack.c.bf16 %v877_v39, %v876_v38  ;;  %v100_v43 = vld [vmem:[%s1879_s1 + $0x68] sm:$0xff]  ;;  %v878_v44 = vld [vmem:[%s1879_s1 + $0xe0] sm:$0xff]  ;;  %v101_v48 = vld [vmem:[%s1879_s1 + $0x70] sm:$0xff] }
  0x42   :  { %1231 = vmatpush3.bf16.msra.mxu0 %v1230_v18  ;;  %v879_v45 = vld [vmem:[%s1879_s1 + $0xe8] sm:$0xff]  ;;  %v1242_v46 = vpack.c.bf16 %v100_v43, %v99_v42  ;;  %v102_v49 = vld [vmem:[%s1879_s1 + $0x78] sm:$0xff]  ;;  %v880_v50 = vld [vmem:[%s1879_s1 + $0xf0] sm:$0xff] }
  0x43   :  { %1255 = vmatpush3.bf16.msra.mxu1 %v1254_v19  ;;  %1232 = vmatprep.subr.bf16.mxu0 %v1453_v0  ;;  %v1266_v47 = vpack.c.bf16 %v879_v45, %v878_v44  ;;  %v881_v51 = vld [vmem:[%s1879_s1 + $0xf8] sm:$0xff]  ;;  %v1245_v52 = vpack.c.bf16 %v102_v49, %v101_v48  ;;  %v882_v54 = vld [vmem:[%s1879_s1 + $0x100] sm:$0xff]  ;;  %v883_v55 = vld [vmem:[%s1879_s1 + $0x108] sm:$0xff] }
  0x44   :  { %1256 = vmatprep.subr.bf16.mxu1 %v1453_v0  ;;  %v1269_v53 = vpack.c.bf16 %v881_v51, %v880_v50  ;;  %v1678_v56 = vld [vmem:[#allocation2] sm:$0xff]  ;;  %v1272_v57 = vpack.c.bf16 %v883_v55, %v882_v54  ;;  %v884_v58 = vld [vmem:[%s1879_s1 + $0x110] sm:$0xff]  ;;  %v885_v59 = vld [vmem:[%s1879_s1 + $0x118] sm:$0xff] }
  0x45   :  { %v1275_v60 = vpack.c.bf16 %v885_v59, %v884_v58  ;;  %v83_v61 = vld [vmem:[#allocation2 + $0x8] sm:$0xff]  ;;  %v886_v62 = vld [vmem:[%s1879_s1 + $0x120] sm:$0xff]  ;;  %v888_v4 = vld [vmem:[%s1879_s1 + $0x130] sm:$0xff] }
  0x46   :  { %1234 = vmatpush3.bf16.msra.mxu0 %v1233_v25  ;;  %v887_v63 = vld [vmem:[%s1879_s1 + $0x128] sm:$0xff]  ;;  %v84_v3 = vld [vmem:[#allocation2 + $0x10] sm:$0xff]  ;;  %v889_v5 = vld [vmem:[%s1879_s1 + $0x138] sm:$0xff] }
  0x47   :  { %1258 = vmatpush3.bf16.msra.mxu1 %v1257_v27  ;;  %1235 = vmatprep.subr.bf16.mxu0 %v1453_v0  ;;  %v1278_v2 = vpack.c.bf16 %v887_v63, %v886_v62  ;;  %v1281_v6 = vpack.c.bf16 %v889_v5, %v888_v4  ;;  %v85_v7 = vld [vmem:[#allocation2 + $0x18] sm:$0xff]  ;;  %v890_v8 = vld [vmem:[%s1879_s1 + $0x140] sm:$0xff]  ;;  %v891_v9 = vld [vmem:[%s1879_s1 + $0x148] sm:$0xff] }
  0x48   :  { %1259 = vmatprep.subr.bf16.mxu1 %v1453_v0  ;;  %v1284_v10 = vpack.c.bf16 %v891_v9, %v890_v8  ;;  %v86_v11 = vld [vmem:[#allocation2 + $0x20] sm:$0xf]  ;;  %v892_v12 = vld [vmem:[%s1879_s1 + $0x150] sm:$0xff]  ;;  %v893_v13 = vld [vmem:[%s1879_s1 + $0x158] sm:$0xff] }
  0x49   :  { %v1287_v14 = vpack.c.bf16 %v893_v13, %v892_v12  ;;  %v894_v15 = vld [vmem:[%s1879_s1 + $0x160] sm:$0xff]  ;;  %v895_v16 = vld [vmem:[%s1879_s1 + $0x168] sm:$0xff]  ;;  %v896_v18 = vld [vmem:[%s1879_s1 + $0x170] sm:$0xff] }
  0x4a   :  { %1237 = vmatpush3.bf16.msra.mxu0 %v1236_v34  ;;  %v1290_v17 = vpack.c.bf16 %v895_v16, %v894_v15  ;;  %v897_v19 = vld [vmem:[%s1879_s1 + $0x178] sm:$0xff]  ;;  %v467_v21 = vld [vmem:[%s1882_s4] sm:$0xff]  ;;  %v468_v22 = vld [vmem:[%s1882_s4 + $0x8] sm:$0xff] }
  0x4b   :  { %1261 = vmatpush3.bf16.msra.mxu1 %v1260_v35  ;;  %1238 = vmatprep.subr.bf16.mxu0 %v1453_v0  ;;  %v1293_v20 = vpack.c.bf16 %v897_v19, %v896_v18  ;;  %v1296_v23 = vpack.c.bf16 %v468_v22, %v467_v21  ;;  %v469_v24 = vld [vmem:[%s1882_s4 + $0x10] sm:$0xff]  ;;  %v470_v25 = vld [vmem:[%s1882_s4 + $0x18] sm:$0xff]  ;;  %v471_v27 = vld [vmem:[%s1882_s4 + $0x20] sm:$0xff] }
  0x4c   :  { %1262 = vmatprep.subr.bf16.mxu1 %v1453_v0  ;;  %v1299_v26 = vpack.c.bf16 %v470_v25, %v469_v24  ;;  %v472_v28 = vld [vmem:[%s1882_s4 + $0x28] sm:$0xff]  ;;  %v473_v30 = vld [vmem:[%s1882_s4 + $0x30] sm:$0xff]  ;;  %v474_v31 = vld [vmem:[%s1882_s4 + $0x38] sm:$0xff] }
  0x4d   :  { %v1302_v29 = vpack.c.bf16 %v472_v28, %v471_v27  ;;  %v1305_v32 = vpack.c.bf16 %v474_v31, %v473_v30  ;;  %v475_v33 = vld [vmem:[%s1882_s4 + $0x40] sm:$0xff]  ;;  %v476_v34 = vld [vmem:[%s1882_s4 + $0x48] sm:$0xff]  ;;  %v477_v36 = vld [vmem:[%s1882_s4 + $0x50] sm:$0xff] }
  0x4e   :  { %1240 = vmatpush3.bf16.msra.mxu0 %v1239_v40  ;;  %v1308_v35 = vpack.c.bf16 %v476_v34, %v475_v33  ;;  %v478_v37 = vld [vmem:[%s1882_s4 + $0x58] sm:$0xff]  ;;  %v479_v39 = vld [vmem:[%s1882_s4 + $0x60] sm:$0xff]  ;;  %v480_v40 = vld [vmem:[%s1882_s4 + $0x68] sm:$0xff] }
  0x4f   :  { %1264 = vmatpush3.bf16.msra.mxu1 %v1263_v41  ;;  %1241 = vmatprep.subr.bf16.mxu0 %v1453_v0  ;;  %v1311_v38 = vpack.c.bf16 %v478_v37, %v477_v36  ;;  %v1314_v41 = vpack.c.bf16 %v480_v40, %v479_v39  ;;  %v481_v42 = vld [vmem:[%s1882_s4 + $0x70] sm:$0xff]  ;;  %v482_v43 = vld [vmem:[%s1882_s4 + $0x78] sm:$0xff] }
  0x50   :  { %1265 = vmatprep.subr.bf16.mxu1 %v1453_v0  ;;  %v1317_v44 = vpack.c.bf16 %v482_v43, %v481_v42 }
  0x52   :  { %1243 = vmatpush3.bf16.msra.mxu0 %v1242_v46 }
  0x53   :  { %1267 = vmatpush3.bf16.msra.mxu1 %v1266_v47  ;;  %1244 = vmatprep.subr.bf16.mxu0 %v1453_v0 }
  0x54   :  { %1268 = vmatprep.subr.bf16.mxu1 %v1453_v0 }
  0x56   :  { %1246 = vmatpush3.bf16.msra.mxu0 %v1245_v52 }
  0x57   :  { %1270 = vmatpush3.bf16.msra.mxu1 %v1269_v53  ;;  %1271 = vmatprep.subr.bf16.mxu0 %v1453_v0 }
  0x58   :  { %1295 = vmatprep.subr.bf16.mxu1 %v1453_v0 }
  0x59   :  { %1035 = vmatmul.mubr.f32.vlgmr.msra.gmra.mrb[0].mxu0 %v1678_v56 }
  0x5a   :  { %1082 = vmatmul.mubr.f32.vlgmr.msra.gmra.mrb[0].mxu1 %v1678_v56  ;;  %1273 = vmatpush3.bf16.msra.mxu0 %v1272_v57 }
  0x5b   :  { %1084 = vmatprep.mubr.msk.f32.mxu1 %vm1455_vm0, %v1454_v1  ;;  %1274 = vmatprep.subr.bf16.mxu0 %v1453_v0 }
  0x5c   :  { %1037 = vmatprep.mubr.msk.f32.mxu0 %vm1455_vm0, %v1454_v1  ;;  %1297 = vmatpush3.bf16.msra.mxu1 %v1296_v23 }
  0x5d   :  { %1038 = vmatmul.mubr.f32.gmra.mrb[2].mxu0 %v83_v61  ;;  %1298 = vmatprep.subr.bf16.mxu1 %v1453_v0 }
  0x5e   :  { %1085 = vmatmul.mubr.f32.gmra.mrb[2].mxu1 %v83_v61  ;;  %1276 = vmatpush3.bf16.msra.mxu0 %v1275_v60 }
  0x5f   :  { %1277 = vmatprep.subr.bf16.mxu0 %v1453_v0  ;;  %1087 = vmatprep.mubr.msk.f32.mxu1 %vm1455_vm0, %v1454_v1 }
  0x60   :  { %1040 = vmatprep.mubr.msk.f32.mxu0 %vm1455_vm0, %v1454_v1  ;;  %1300 = vmatpush3.bf16.msra.mxu1 %v1299_v26 }
  0x61   :  { %1041 = vmatmul.mubr.f32.gmra.mrb[4].mxu0 %v84_v3  ;;  %1301 = vmatprep.subr.bf16.mxu1 %v1453_v0 }
  0x62   :  { %1279 = vmatpush3.bf16.msra.mxu0 %v1278_v2  ;;  %1088 = vmatmul.mubr.f32.gmra.mrb[4].mxu1 %v84_v3 }
  0x63   :  { %1280 = vmatprep.subr.bf16.mxu0 %v1453_v0  ;;  %1090 = vmatprep.mubr.msk.f32.mxu1 %vm1455_vm0, %v1454_v1 }
  0x64   :  { %1043 = vmatprep.mubr.msk.f32.mxu0 %vm1455_vm0, %v1454_v1  ;;  %1303 = vmatpush3.bf16.msra.mxu1 %v1302_v29 }
  0x65   :  { %1044 = vmatmul.mubr.f32.gmra.mrb[6].mxu0 %v85_v7  ;;  %1304 = vmatprep.subr.bf16.mxu1 %v1453_v0 }
  0x66   :  { %1282 = vmatpush3.bf16.msra.mxu0 %v1281_v6  ;;  %1091 = vmatmul.mubr.f32.gmra.mrb[6].mxu1 %v85_v7 }
  0x67   :  { %1283 = vmatprep.subr.bf16.mxu0 %v1453_v0  ;;  %1093 = vmatprep.mubr.msk.f32.mxu1 %vm1455_vm0, %v1454_v1 }
  0x68   :  { %1046 = vmatprep.mubr.msk.f32.mxu0 %vm1455_vm0, %v1454_v1  ;;  %1306 = vmatpush3.bf16.msra.mxu1 %v1305_v32 }
  0x69   :  { %1047 = vmatmul.mubr.f32.gmra.mrb[8].mxu0 %v86_v11  ;;  %1307 = vmatprep.subr.bf16.mxu1 %v1453_v0 }
  0x6a   :  { %1285 = vmatpush3.bf16.msra.mxu0 %v1284_v10  ;;  %1094 = vmatmul.mubr.f32.gmra.mrb[8].mxu1 %v86_v11 }
  0x6b   :  { %1286 = vmatprep.subr.bf16.mxu0 %v1453_v0  ;;  %1128 = vmatprep.mubr.msk.f32.mxu0 %vm1455_vm0, %v1454_v1 }
  0x6c   :  { %1175 = vmatprep.mubr.msk.f32.mxu1 %vm1455_vm0, %v1454_v1  ;;  %1309 = vmatpush3.bf16.msra.mxu1 %v1308_v35 }
  0x6d   :  { %1310 = vmatprep.subr.bf16.mxu1 %v1453_v0 }
  0x6e   :  { %1288 = vmatpush3.bf16.msra.mxu0 %v1287_v14 }
  0x6f   :  { %1289 = vmatprep.subr.bf16.mxu0 %v1453_v0 }
  0x70   :  { %1312 = vmatpush3.bf16.msra.mxu1 %v1311_v38 }
  0x71   :  { %1313 = vmatprep.subr.bf16.mxu1 %v1453_v0 }
  0x72   :  { %1291 = vmatpush3.bf16.msra.mxu0 %v1290_v17 }
  0x73   :  { %1292 = vmatprep.subr.bf16.mxu0 %v1453_v0 }
  0x74   :  { %1315 = vmatpush3.bf16.msra.mxu1 %v1314_v41 }
  0x75   :  { %1316 = vmatprep.subr.bf16.mxu1 %v1453_v0 }
  0x76   :  { %1294 = vmatpush3.bf16.msra.mxu0 %v1293_v20 }
  0x77   :  { %1319 = vmatprep.subr.bf16.mxu0 %v1453_v0 }
  0x78   :  { %1318 = vmatpush3.bf16.msra.mxu1 %v1317_v44 }
  0x79   :  { %1129 = vmatmul.mubr.f32.vlgmr.msra.gmra.mrb[10].mxu0 %v1678_v56  ;;  %1178 = vmatprep.subr.mxu1 %v1454_v1 }
  0x7a   :  { %1131 = vmatprep.mubr.msk.f32.mxu0 %vm1455_vm0, %v1454_v1  ;;  %1321 = vmatpush3.bf16.msra.mxu0 %v1296_v23 }
  0x7b   :  { %1322 = vmatprep.subr.bf16.mxu0 %v1453_v0 }
  0x7d   :  { %1132 = vmatmul.mubr.f32.gmra.mrb[12].mxu0 %v83_v61 }
  0x7e   :  { %1134 = vmatprep.mubr.msk.f32.mxu0 %vm1455_vm0, %v1454_v1  ;;  %1324 = vmatpush3.bf16.msra.mxu0 %v1299_v26 }
  0x7f   :  { %1325 = vmatprep.subr.bf16.mxu0 %v1453_v0 }
  0x81   :  { %1135 = vmatmul.mubr.f32.gmra.mrb[14].mxu0 %v84_v3 }
  0x82   :  { %1137 = vmatprep.mubr.msk.f32.mxu0 %vm1455_vm0, %v1454_v1  ;;  %1327 = vmatpush3.bf16.msra.mxu0 %v1302_v29 }
  0x83   :  { %1328 = vmatprep.subr.bf16.mxu0 %v1453_v0 }
  0x85   :  { %1138 = vmatmul.mubr.f32.gmra.mrb[16].mxu0 %v85_v7 }
  0x86   :  { %1140 = vmatprep.mubr.msk.f32.mxu0 %vm1455_vm0, %v1454_v1  ;;  %1330 = vmatpush3.bf16.msra.mxu0 %v1305_v32 }
  0x87   :  { %1331 = vmatprep.subr.bf16.mxu0 %v1453_v0 }
  0x89   :  { %1141 = vmatmul.mubr.f32.gmra.mrb[18].mxu0 %v86_v11 }
  0x8a   :  { %1215 = vmatprep.mubr.msk.f32.mxu0 %vm1455_vm0, %v1454_v1  ;;  %1333 = vmatpush3.bf16.msra.mxu0 %v1308_v35 }
  0x8b   :  { %1334 = vmatprep.subr.bf16.mxu0 %v1453_v0 }
  0x8e   :  { %1336 = vmatpush3.bf16.msra.mxu0 %v1311_v38 }
  0x8f   :  { %1337 = vmatprep.subr.bf16.mxu0 %v1453_v0 }
  0x92   :  { %1339 = vmatpush3.bf16.msra.mxu0 %v1314_v41 }
  0x93   :  { %1340 = vmatprep.subr.bf16.mxu0 %v1453_v0 }
  0x96   :  { %1342 = vmatpush3.bf16.msra.mxu0 %v1317_v44 }
 0x12c   :  { %v169_v45 = vpop.f32.mrb[0].mxu0 }
 0x12d   :  { %v1036_v46 = vpop.f32.mrb[1].mxu0  ;;  %v276_v47 = vpop.f32.mrb[0].mxu1 }
 0x12e   :  { %v1083_v48 = vpop.f32.mrb[1].mxu1  ;;  %v411_v49 = vrot.slane %v276_v47, 1 }
 0x130   :  { %v174_v50 = vpop.f32.mrb[2].mxu0 }
 0x131   :  { %v281_v51 = vpop.f32.mrb[2].mxu1  ;;  %v1039_v52 = vpop.f32.mrb[3].mxu0 }
 0x132   :  { %v412_v53 = vrot.slane %v281_v51, 1  ;;  %v1086_v54 = vpop.f32.mrb[3].mxu1 }
 0x133   :  { %v483_v54 = vld [vmem:[#allocation6] sm:$0xff] }
 0x134   :  { %v413_v55 = vsel %vm410_vm1, %v411_v49, %v412_v53  ;;  %v179_v56 = vpop.f32.mrb[4].mxu0 }
 0x135   :  { %v418_v57 = vadd.f32 %v413_v55, %v169_v45  ;;  %v286_v0 = vpop.f32.mrb[4].mxu1  ;;  %v1042_v58 = vpop.f32.mrb[5].mxu0 }
 0x136   :  { %v414_v59 = vrot.slane %v286_v0, 1  ;;  %v1089_v60 = vpop.f32.mrb[5].mxu1 }
 0x138   :  { %v415_v61 = vsel %vm410_vm1, %v412_v53, %v414_v59  ;;  %v184_v62 = vpop.f32.mrb[6].mxu0 }
 0x139   :  { %v419_v63 = vadd.f32 %v415_v61, %v174_v50  ;;  %v291_v2 = vpop.f32.mrb[6].mxu1  ;;  %v1045_v3 = vpop.f32.mrb[7].mxu0 }
 0x13a   :  { %v435_v4 = vrot.slane %v291_v2, 1  ;;  %v1092_v5 = vpop.f32.mrb[7].mxu1 }
 0x13c   :  { %v436_v6 = vsel %vm410_vm1, %v414_v59, %v435_v4  ;;  %v189_v7 = vpop.f32.mrb[8].mxu0 }
 0x13d   :  { %v442_v8 = vadd.f32 %v436_v6, %v179_v56  ;;  %v296_v9 = vpop.f32.mrb[8].mxu1  ;;  %v1048_v10 = vpop.f32.mrb[9].mxu0 }
 0x13e   :  { %v437_v11 = vrot.slane %v296_v9, 1  ;;  %v1095_v12 = vpop.f32.mrb[9].mxu1 }
 0x140   :  { %v438_v13 = vsel %vm410_vm1, %v435_v4, %v437_v11  ;;  %v444_v14 = vadd.f32 %v437_v11, %v189_v7 }
 0x141   :  { %v443_v15 = vadd.f32 %v438_v13, %v184_v62 }
 0x14c   :  { %v383_v16 = vpop.f32.mrb[10].mxu0 }
 0x14d   :  { %v1130_v17 = vpop.f32.mrb[11].mxu0  ;;  %v424_v19 = vrot.slane %v383_v16, 2 }
 0x150   :  { %v388_v18 = vpop.f32.mrb[12].mxu0 }
 0x151   :  { %v425_v20 = vrot.slane %v388_v18, 2  ;;  %v1133_v21 = vpop.f32.mrb[13].mxu0 }
 0x153   :  { %v426_v22 = vsel %vm423_vm2, %v424_v19, %v425_v20 }
 0x154   :  { %v431_v23 = vadd.f32 %v426_v22, %v418_v57  ;;  %v393_v24 = vpop.f32.mrb[14].mxu0  ;;  %v638_v57 = vlaneseq }
 0x155   :  { %v427_v25 = vrot.slane %v393_v24, 2  ;;  %v1136_v26 = vpop.f32.mrb[15].mxu0 }
 0x156   :  { %v639_v0 = vshrl.u32 %v638_v57, 7 }
 0x157   :  { %v428_v27 = vsel %vm423_vm2, %v425_v20, %v427_v25 }
 0x158   :  { %v432_v28 = vadd.f32 %v428_v27, %v419_v63  ;;  %v398_v29 = vpop.f32.mrb[16].mxu0  ;;  %v640_v58 = vsub.s32 0, %v639_v0  ;;  %v900_v27 = vld [vmem:[%s1881_s3] ss:$0 sm:$0xff]  ;;  %s1456_s3 = smov [#allocation9]  }
 0x159   :  { %v447_v30 = vrot.slane %v398_v29, 2  ;;  %v1139_v31 = vpop.f32.mrb[17].mxu0  ;;  %s853_s0 = sshll.u32 %s1456_s3, 4  ;;  %s854_s0 = int_to_ptr.vmem [resolvable:$true] %s853_s0 }
 0x15a   :  { %v484_v43 = vadd.f32 %v432_v28, %v431_v23  ;;  %p1425_p11 = scmp.lt.s32.totalorder %s854_s0, %s854_s0 }
 0x15b   :  { %v448_v32 = vsel %vm423_vm2, %v427_v25, %v447_v30 }
 0x15c   :  { %v454_v33 = vadd.f32 %v448_v32, %v442_v8  ;;  %v403_v34 = vpop.f32.mrb[18].mxu0  ;;  %v828_v32 = vld [vmem:[%s1884_s6] sm:$0xff] }
 0x15d   :  { %v449_v35 = vrot.slane %v403_v34, 2  ;;  %v1142_v36 = vpop.f32.mrb[19].mxu0  ;;  %v830_v34 = vld [vmem:[%s1884_s6 + $0x10] sm:$0xff] }
 0x15e   :  { %v460_v41 = vrot.slane %v454_v33, 2  ;;  %v829_v33 = vld [vmem:[%s1884_s6 + $0x8] sm:$0xff] }
 0x15f   :  { %v450_v37 = vsel %vm423_vm2, %v447_v30, %v449_v35  ;;  %v456_v38 = vadd.f32 %v449_v35, %v444_v14  ;;  %v831_v35 = vld [vmem:[%s1884_s6 + $0x18] sm:$0xff]  ;;  %s1420_s6 = scalar_lea.vmem %s854_s0, 512 }
 0x160   :  { %v455_v39 = vadd.f32 %v450_v37, %v443_v15  ;;  %p1421_p10 = scmp.ne.s32.totalorder %s854_s0, %s1420_s6  ;;  %p1426_p12 = scmp.lt.s32.totalorder %s1420_s6, %s1420_s6 }
 0x161   :  { %v463_v40 = vrot.slane %v456_v38, 2 }
 0x162   :  { %v461_v42 = vrot.slane %v455_v39, 2  ;;  %p1427_p13 = por %p1426_p12, %p1425_p11 }
 0x164   :  { %v462_v44 = vsel %vm423_vm2, %v460_v41, %v461_v42  ;;  %v464_v45 = vsel %vm423_vm2, %v461_v42, %v463_v40  ;;  %v836_v40 = vld [vmem:[#allocation8] sm:$0xff]  ;;  %v837_v41 = vld [vmem:[#allocation8 + $0x8] sm:$0xff]  ;;  %v838_v42 = vld [vmem:[#allocation8 + $0x10] sm:$0xff]  ;;  %p1428_p0 = pnand %p1427_p13, %p1421_p10 }
 0x165   :  { %v485_v46 = vadd.f32 %v484_v43, %v462_v44  ;;  %v839_v43 = vld [vmem:[#allocation8 + $0x18] sm:$0xff] }
 0x167   :  { %v486_v47 = vadd.f32 %v485_v46, %v464_v45 }
 0x169   :  { %v487_v48 = vrot.slane %v486_v47, 4 }
 0x16b   :  { %v488_v49 = vadd.f32 %v487_v48, %v486_v47 }
 0x16d   :  { %v489_v50 = vrot.slane %v488_v49, 2 }
 0x16f   :  { %v490_v51 = vadd.f32 %v489_v50, %v488_v49 }
 0x171   :  { %v491_v52 = vrot.slane %v490_v51, 1 }
 0x173   :  { %v492_v53 = vadd.f32 %v491_v52, %v490_v51 }
 0x175   :  { %1176 = vmatmul.mubr.f32.vlgmr.msra.gmra.mrb[10].mxu1 %v492_v53 }
 0x176   :  { %1179 = vmatpush3.msra.mxu1 %v483_v54  ;;  %1180 = vmatprep.mubr.msk.f32.mxu1 %vm1455_vm0, %v1454_v1 }
 0x177   :  { %1218 = vmatprep.subr.mxu1 %v1454_v1 }
 0x248   :  { %v559_v55 = vpop.f32.mrb[10].mxu1 }
 0x249   :  { %v1177_v56 = vpop.f32.mrb[11].mxu1  ;;  %1181 = vmatmul.mubr.msk.f32.vlgmr.msra.gmra.mrb[12].mxu1 %vm563_vm3, %v559_v55 }
 0x24a   :  { %1219 = vmatpush3.msra.mxu1 %v483_v54  ;;  %1220 = vmatprep.mubr.msk.f32.mxu1 %vm1455_vm0, %v1454_v1 }
 0x31c   :  { %v633_v59 = vpop.f32.mrb[12].mxu1 }
 0x31d   :  { %v637_v60 = vmul.f32 0.001953125, %v633_v59  ;;  %v1182_v61 = vpop.f32.mrb[13].mxu1 }
 0x31f   :  { %v641_v62 = vrot.slane %v637_v60, %v640_v58 }
 0x321   :  { %v642_v63 = vsub.f32 %v431_v23, %v641_v62  ;;  %v643_v2 = vsub.f32 %v432_v28, %v641_v62  ;;  %v644_v3 = vsub.f32 %v462_v44, %v641_v62  ;;  %v645_v4 = vsub.f32 %v464_v45, %v641_v62  ;;  %v803_v23 = vld [vmem:[%s1880_s2] sm:$0x1] }
 0x323   :  { %v646_v5 = vmul.f32 %v642_v63, %v642_v63  ;;  %v647_v6 = vmul.f32 %v643_v2, %v643_v2  ;;  %v648_v7 = vmul.f32 %v644_v3, %v644_v3  ;;  %v649_v9 = vmul.f32 %v645_v4, %v645_v4 }
 0x325   :  { %v650_v8 = vadd.f32 %v647_v6, %v646_v5 }
 0x327   :  { %v651_v10 = vadd.f32 %v650_v8, %v648_v7 }
 0x329   :  { %v652_v11 = vadd.f32 %v651_v10, %v649_v9 }
 0x32b   :  { %v653_v12 = vrot.slane %v652_v11, 4 }
 0x32d   :  { %v654_v1 = vadd.f32 %v653_v12, %v652_v11 }
 0x32f   :  { %v655_v13 = vrot.slane %v654_v1, 2 }
 0x331   :  { %v656_v14 = vadd.f32 %v655_v13, %v654_v1 }
 0x333   :  { %v657_v15 = vrot.slane %v656_v14, 1 }
 0x335   :  { %v658_v16 = vadd.f32 %v657_v15, %v656_v14 }
 0x337   :  { %1216 = vmatmul.mubr.f32.vlgmr.msra.gmra.mrb[20].mxu0 %v658_v16 }
 0x40a   :  { %v725_v17 = vpop.f32.mrb[20].mxu0 }
 0x40b   :  { %v1217_v18 = vpop.f32.mrb[21].mxu0  ;;  %1221 = vmatmul.mubr.msk.f32.vlgmr.msra.gmra.mrb[14].mxu1 %vm563_vm3, %v725_v17 }
 0x4de   :  { %v798_v19 = vpop.f32.mrb[14].mxu1 }
 0x4df   :  { %v802_v20 = vmul.f32 0.001953125, %v798_v19  ;;  %v1222_v21 = vpop.f32.mrb[15].mxu1 }
 0x4e1   :  { %v804_v22 = vadd.f32 1e-05, %v802_v20 }
 0x4e3   :  { %1352 = vrsqrt.f32 %v804_v22 }
 0x4ed   :  { %v1353_v24 = vpop.eup %1352 }
 0x4ee   :  { %v806_v25 = vmul.f32 %v1353_v24, %v803_v23 }
 0x4f0   :  { %v811_v26 = vrot.slane %v806_v25, %v640_v58 }
 0x4f2   :  { %v813_v28 = vmul.f32 %v811_v26, %v642_v63  ;;  %v814_v29 = vmul.f32 %v811_v26, %v643_v2  ;;  %v815_v30 = vmul.f32 %v811_v26, %v644_v3  ;;  %v816_v31 = vmul.f32 %v811_v26, %v645_v4 }
 0x4f4   :  { %v824_v36 = vadd.f32 %v900_v27, %v813_v28  ;;  %v825_v37 = vadd.f32 %v900_v27, %v814_v29  ;;  %v826_v38 = vadd.f32 %v900_v27, %v815_v30  ;;  %v827_v39 = vadd.f32 %v900_v27, %v816_v31 }
 0x4f6   :  { %v832_v44 = vadd.f32 %v828_v32, %v824_v36  ;;  %v833_v45 = vadd.f32 %v829_v33, %v825_v37  ;;  %v834_v46 = vadd.f32 %v830_v34, %v826_v38  ;;  %v835_v47 = vadd.f32 %v831_v35, %v827_v39 }
 0x4f8   :  { %v840_v48 = vadd.f32 %v836_v40, %v832_v44  ;;  %v841_v49 = vadd.f32 %v837_v41, %v833_v45  ;;  %v842_v50 = vadd.f32 %v838_v42, %v834_v46  ;;  %v843_v51 = vadd.f32 %v839_v43, %v835_v47 }
 0x4fa   :  { %844 = vst [vmem:[#allocation9] sm:$0xff] %v840_v48  ;;  %845 = vst [vmem:[#allocation9 + $0x8] sm:$0xff] %v841_v49 }
 0x4fb   :  { %846 = vst [vmem:[#allocation9 + $0x10] sm:$0xff] %v842_v50  ;;  %847 = vst [vmem:[#allocation9 + $0x18] sm:$0xff] %v843_v51 }
 0x4fc   :  { %1431 = shalt.err (!%p1428_p0)
}
 0x4fd   :  { %s1432_s19 = scalar_lea.hbm %s1886_s8, 512 }
 0x4fe   :  { %p1433_p1 = scmp.ne.s32.totalorder %s1886_s8, %s1432_s19  ;;  %p1436_p2 = scmp.lt.u32.totalorder %s1432_s19, %s1886_s8 }
 0x500   :  { %p1438_p3 = pnand %p1436_p2, %p1433_p1 }
 0x502   :  { %1441 = shalt.err (!%p1438_p3)
}
 0x503   :  { %859 = dma.vmem_to_hbm [thread:$0]  %s854_s0, 512, %s1886_s8, [#allocation5], %s1450_s5, %s1450_s5, %s1451_s27  }
 0x504   :  { %1446 = dma.done.wait [#allocation5], 512  }
 0x505   :  { %1447 = vsyncadd [#allocation5], 4294966784 }
 0x506   :  { %863 = vsyncpa [#allocation4], 1 }
 0x507   :  { %864 = vsyncpa [#allocation7], 1 }
 0x508   :  { %865 = vsyncpa [#allocation5], 1 }

// kernel: _forward_impl.6
= control target key start
LH: loop header
LB: loop body
LE: loop exit
PB: predicated region body
PF: predicated region fallthrough
CT: control target
= control target key end

     0   :  { %12 = vsyncpa [#allocation4], 0  ;;  %s1803_s0 = inlined_call_operand.hbm [shape: f32[32,128], index: 0, kind: input, shape index: {}]   ;;  %s1804_s1 = inlined_call_operand.vmem [shape: f32[3,128,128], index: 1, kind: input, shape index: {}]   ;;  %s1805_s2 = inlined_call_operand.vmem [shape: f32[1,128], index: 2, kind: input, shape index: {}]   ;;  %s1806_s3 = inlined_call_operand.vmem [shape: f32[1,128], index: 3, kind: input, shape index: {}]   ;;  %s1807_s4 = inlined_call_operand.vmem [shape: f32[128,8], index: 4, kind: input, shape index: {}]   ;;  %s1808_s5 = inlined_call_operand.hbm [shape: f32[8,128], index: 5, kind: input, shape index: {}]   ;;  %s1809_s6 = inlined_call_operand.vmem [shape: f32[32,128], index: 6, kind: input, shape index: {}]   ;;  %s1810_s7 = inlined_call_operand.hbm [shape: f32[32,128], index: 7, kind: output, shape index: {}]  }
   0x1   :  { %13 = vsyncpa [#allocation7], 0 }
   0x2   :  { %14 = vsyncpa [#allocation5], 0  ;;  %s1401_s24 = smov [#allocation3]   ;;  %s1329_s28 = scalar_lea.hbm %s1803_s0, 512 }
   0x3   :  { %s20_s25 = sshll.u32 %s1401_s24, 4  ;;  %p1330_p0 = scmp.ne.s32.totalorder %s1803_s0, %s1329_s28  ;;  %s21_s25 = int_to_ptr.vmem [resolvable:$true] %s20_s25 }
   0x4   :  { %p1333_p1 = scmp.lt.u32.totalorder %s1329_s28, %s1803_s0 }
   0x6   :  { %p1335_p2 = pnand %p1333_p1, %p1330_p0 }
   0x8   :  { %1338 = shalt.err (!%p1335_p2)
}
   0x9   :  { %s1339_s10 = scalar_lea.vmem %s21_s25, 512  ;;  %p1344_p4 = scmp.lt.s32.totalorder %s21_s25, %s21_s25 }
   0xa   :  { %p1340_p3 = scmp.ne.s32.totalorder %s21_s25, %s1339_s10  ;;  %p1345_p5 = scmp.lt.s32.totalorder %s1339_s10, %s1339_s10 }
   0xc   :  { %p1346_p6 = por %p1345_p5, %p1344_p4 }
   0xe   :  { %p1347_p7 = pnand %p1346_p6, %p1340_p3 }
  0x10   :  { %1350 = shalt.err (!%p1347_p7)
}
  0x11   :  { %s1402_s11 = smov 128   ;;  %s1403_s12 = smov 8  }
  0x12   :  { %26 = dma.hbm_to_vmem [thread:$0]  %s1803_s0, 512, %s21_s25, [#allocation4], %s1402_s11, %s1402_s11, %s1403_s12  }
  0x13   :  { %s1404_s15 = smov [#allocation6]   ;;  %s1351_s19 = scalar_lea.hbm %s1808_s5, 128 }
  0x14   :  { %s41_s16 = sshll.u32 %s1404_s15, 4  ;;  %p1352_p8 = scmp.ne.s32.totalorder %s1808_s5, %s1351_s19  ;;  %s42_s16 = int_to_ptr.vmem [resolvable:$true] %s41_s16 }
  0x15   :  { %p1355_p9 = scmp.lt.u32.totalorder %s1351_s19, %s1808_s5 }
  0x17   :  { %p1357_p10 = pnand %p1355_p9, %p1352_p8 }
  0x19   :  { %1360 = shalt.err (!%p1357_p10)
}
  0x1a   :  { %s1361_s24 = scalar_lea.vmem %s42_s16, 128  ;;  %p1366_p12 = scmp.lt.s32.totalorder %s42_s16, %s42_s16 }
  0x1b   :  { %p1362_p11 = scmp.ne.s32.totalorder %s42_s16, %s1361_s24  ;;  %p1367_p13 = scmp.lt.s32.totalorder %s1361_s24, %s1361_s24 }
  0x1d   :  { %p1368_p0 = por %p1367_p13, %p1366_p12 }
  0x1f   :  { %p1369_p1 = pnand %p1368_p0, %p1362_p11 }
  0x21   :  { %1372 = shalt.err (!%p1369_p1)
}
  0x22   :  { %44 = dma.hbm_to_vmem [thread:$0]  %s1808_s5, 128, %s42_s16, [#allocation7]  }
  0x23   :  { %1395 = dma.done.wait [#allocation4], 512  }
  0x24   :  { %1396 = vsyncadd [#allocation4], 4294966784 }
  0x25   :  { %1397 = dma.done.wait [#allocation7], 128  }
  0x26   :  { %1398 = vsyncadd [#allocation7], 4294967168  ;;  %v1405_v0 = vmov 0.0|0.0   ;;  %v1406_v1 = vmov 0.0   ;;  %vm1407_vm0 = vmmov 0   ;;  %v71_v2 = vld [vmem:[%s1804_s1] sm:$0xff] }
  0x27   :  { %1199 = vmatprep.subr.bf16.mxu0 %v1405_v0  ;;  %1223 = vmatprep.subr.bf16.mxu1 %v1405_v0  ;;  %53 = vst [vmem:[#allocation2] sm:$0xff] %v1406_v1  ;;  %54 = vst [vmem:[#allocation2 + $0x8] sm:$0xff] %v1406_v1  ;;  %v72_v3 = vld [vmem:[%s1804_s1 + $0x8] sm:$0xff]  ;;  %v842_v4 = vld [vmem:[%s1804_s1 + $0x80] sm:$0xff]  ;;  %vm394_vm1 = vcmask 1046528   ;;  %vm407_vm2 = vcmask 1045504  }
  0x28   :  { %55 = vst [vmem:[#allocation2 + $0x10] sm:$0xff] %v1406_v1  ;;  %56 = vst [vmem:[#allocation2 + $0x18] sm:$0xff] %v1406_v1  ;;  %1010 = vmatprep.mubr.msk.f32.mxu0 %vm1407_vm0, %v1406_v1  ;;  %1057 = vmatprep.mubr.msk.f32.mxu1 %vm1407_vm0, %v1406_v1  ;;  %v1200_v5 = vpack.c.bf16 %v72_v3, %v71_v2  ;;  %v843_v6 = vld [vmem:[%s1804_s1 + $0x88] sm:$0xff]  ;;  %v73_v7 = vld [vmem:[%s1804_s1 + $0x10] sm:$0xff]  ;;  %vm547_vm3 = vcmask 64512  }
  0x29   :  { %57 = vst [vmem:[#allocation2 + $0x20] sm:$0xf] %v1406_v1  ;;  %v74_v8 = vld [vmem:[%s1804_s1 + $0x18] sm:$0xff]  ;;  %v1224_v9 = vpack.c.bf16 %v843_v6, %v842_v4  ;;  %v844_v10 = vld [vmem:[%s1804_s1 + $0x90] sm:$0xff]  ;;  %v75_v14 = vld [vmem:[%s1804_s1 + $0x20] sm:$0xff] }
  0x2a   :  { %v845_v11 = vld [vmem:[%s1804_s1 + $0x98] sm:$0xff]  ;;  %1201 = vmatpush3.bf16.msra.mxu0 %v1200_v5  ;;  %v1203_v12 = vpack.c.bf16 %v74_v8, %v73_v7  ;;  %v76_v15 = vld [vmem:[%s1804_s1 + $0x28] sm:$0xff]  ;;  %v846_v16 = vld [vmem:[%s1804_s1 + $0xa0] sm:$0xff] }
  0x2b   :  { %1225 = vmatpush3.bf16.msra.mxu1 %v1224_v9  ;;  %1202 = vmatprep.subr.bf16.mxu0 %v1405_v0  ;;  %v1227_v13 = vpack.c.bf16 %v845_v11, %v844_v10  ;;  %v847_v17 = vld [vmem:[%s1804_s1 + $0xa8] sm:$0xff]  ;;  %v1206_v18 = vpack.c.bf16 %v76_v15, %v75_v14  ;;  %v77_v20 = vld [vmem:[%s1804_s1 + $0x30] sm:$0xff]  ;;  %v78_v21 = vld [vmem:[%s1804_s1 + $0x38] sm:$0xff] }
  0x2c   :  { %1226 = vmatprep.subr.bf16.mxu1 %v1405_v0  ;;  %v1230_v19 = vpack.c.bf16 %v847_v17, %v846_v16  ;;  %v848_v22 = vld [vmem:[%s1804_s1 + $0xb0] sm:$0xff]  ;;  %v849_v23 = vld [vmem:[%s1804_s1 + $0xb8] sm:$0xff]  ;;  %v58_v24 = vld [vmem:[#allocation3] sm:$0xff]  ;;  %v1209_v25 = vpack.c.bf16 %v78_v21, %v77_v20 }
  0x2d   :  { %60 = vst [vmem:[#allocation2 + $0x1] sm:$0xff] %v58_v24  ;;  %v59_v26 = vld [vmem:[#allocation3 + $0x8] sm:$0xff]  ;;  %v1233_v27 = vpack.c.bf16 %v849_v23, %v848_v22  ;;  %v79_v28 = vld [vmem:[%s1804_s1 + $0x40] sm:$0xff]  ;;  %v80_v29 = vld [vmem:[%s1804_s1 + $0x48] sm:$0xff] }
  0x2e   :  { %1204 = vmatpush3.bf16.msra.mxu0 %v1203_v12  ;;  %61 = vst [vmem:[#allocation2 + $0x9] sm:$0xff] %v59_v26  ;;  %v850_v30 = vld [vmem:[%s1804_s1 + $0xc0] sm:$0xff]  ;;  %v851_v31 = vld [vmem:[%s1804_s1 + $0xc8] sm:$0xff]  ;;  %v62_v32 = vld [vmem:[#allocation3 + $0x10] sm:$0xff]  ;;  %v1212_v34 = vpack.c.bf16 %v80_v29, %v79_v28 }
  0x2f   :  { %1228 = vmatpush3.bf16.msra.mxu1 %v1227_v13  ;;  %1205 = vmatprep.subr.bf16.mxu0 %v1405_v0  ;;  %64 = vst [vmem:[#allocation2 + $0x13] sm:$0xff] %v62_v32  ;;  %v63_v33 = vld [vmem:[#allocation3 + $0x18] sm:$0xff]  ;;  %v1236_v35 = vpack.c.bf16 %v851_v31, %v850_v30  ;;  %v81_v36 = vld [vmem:[%s1804_s1 + $0x50] sm:$0xff]  ;;  %v82_v37 = vld [vmem:[%s1804_s1 + $0x58] sm:$0xff] }
  0x30   :  { %1229 = vmatprep.subr.bf16.mxu1 %v1405_v0  ;;  %65 = vst [vmem:[#allocation2 + $0x1b] sm:$0xff] %v63_v33  ;;  %v852_v38 = vld [vmem:[%s1804_s1 + $0xd0] sm:$0xff]  ;;  %v853_v39 = vld [vmem:[%s1804_s1 + $0xd8] sm:$0xff]  ;;  %v1215_v40 = vpack.c.bf16 %v82_v37, %v81_v36  ;;  %v83_v42 = vld [vmem:[%s1804_s1 + $0x60] sm:$0xff] }
  0x31   :  { %v1239_v41 = vpack.c.bf16 %v853_v39, %v852_v38  ;;  %v84_v43 = vld [vmem:[%s1804_s1 + $0x68] sm:$0xff]  ;;  %v854_v44 = vld [vmem:[%s1804_s1 + $0xe0] sm:$0xff]  ;;  %v85_v48 = vld [vmem:[%s1804_s1 + $0x70] sm:$0xff] }
  0x32   :  { %1207 = vmatpush3.bf16.msra.mxu0 %v1206_v18  ;;  %v855_v45 = vld [vmem:[%s1804_s1 + $0xe8] sm:$0xff]  ;;  %v1218_v46 = vpack.c.bf16 %v84_v43, %v83_v42  ;;  %v86_v49 = vld [vmem:[%s1804_s1 + $0x78] sm:$0xff]  ;;  %v856_v50 = vld [vmem:[%s1804_s1 + $0xf0] sm:$0xff] }
  0x33   :  { %1231 = vmatpush3.bf16.msra.mxu1 %v1230_v19  ;;  %1208 = vmatprep.subr.bf16.mxu0 %v1405_v0  ;;  %v1242_v47 = vpack.c.bf16 %v855_v45, %v854_v44  ;;  %v857_v51 = vld [vmem:[%s1804_s1 + $0xf8] sm:$0xff]  ;;  %v1221_v52 = vpack.c.bf16 %v86_v49, %v85_v48  ;;  %v858_v54 = vld [vmem:[%s1804_s1 + $0x100] sm:$0xff]  ;;  %v859_v55 = vld [vmem:[%s1804_s1 + $0x108] sm:$0xff] }
  0x34   :  { %1232 = vmatprep.subr.bf16.mxu1 %v1405_v0  ;;  %v1245_v53 = vpack.c.bf16 %v857_v51, %v856_v50  ;;  %v1603_v56 = vld [vmem:[#allocation2] sm:$0xff]  ;;  %v1248_v57 = vpack.c.bf16 %v859_v55, %v858_v54  ;;  %v860_v58 = vld [vmem:[%s1804_s1 + $0x110] sm:$0xff]  ;;  %v861_v59 = vld [vmem:[%s1804_s1 + $0x118] sm:$0xff] }
  0x35   :  { %v1251_v60 = vpack.c.bf16 %v861_v59, %v860_v58  ;;  %v67_v61 = vld [vmem:[#allocation2 + $0x8] sm:$0xff]  ;;  %v862_v62 = vld [vmem:[%s1804_s1 + $0x120] sm:$0xff]  ;;  %v864_v4 = vld [vmem:[%s1804_s1 + $0x130] sm:$0xff] }
  0x36   :  { %1210 = vmatpush3.bf16.msra.mxu0 %v1209_v25  ;;  %v863_v63 = vld [vmem:[%s1804_s1 + $0x128] sm:$0xff]  ;;  %v68_v3 = vld [vmem:[#allocation2 + $0x10] sm:$0xff]  ;;  %v865_v5 = vld [vmem:[%s1804_s1 + $0x138] sm:$0xff] }
  0x37   :  { %1234 = vmatpush3.bf16.msra.mxu1 %v1233_v27  ;;  %1211 = vmatprep.subr.bf16.mxu0 %v1405_v0  ;;  %v1254_v2 = vpack.c.bf16 %v863_v63, %v862_v62  ;;  %v1257_v6 = vpack.c.bf16 %v865_v5, %v864_v4  ;;  %v69_v7 = vld [vmem:[#allocation2 + $0x18] sm:$0xff]  ;;  %v866_v8 = vld [vmem:[%s1804_s1 + $0x140] sm:$0xff]  ;;  %v867_v9 = vld [vmem:[%s1804_s1 + $0x148] sm:$0xff] }
  0x38   :  { %1235 = vmatprep.subr.bf16.mxu1 %v1405_v0  ;;  %v1260_v10 = vpack.c.bf16 %v867_v9, %v866_v8  ;;  %v70_v11 = vld [vmem:[#allocation2 + $0x20] sm:$0xf]  ;;  %v868_v12 = vld [vmem:[%s1804_s1 + $0x150] sm:$0xff]  ;;  %v869_v13 = vld [vmem:[%s1804_s1 + $0x158] sm:$0xff] }
  0x39   :  { %v1263_v14 = vpack.c.bf16 %v869_v13, %v868_v12  ;;  %v870_v15 = vld [vmem:[%s1804_s1 + $0x160] sm:$0xff]  ;;  %v871_v16 = vld [vmem:[%s1804_s1 + $0x168] sm:$0xff]  ;;  %v872_v18 = vld [vmem:[%s1804_s1 + $0x170] sm:$0xff] }
  0x3a   :  { %1213 = vmatpush3.bf16.msra.mxu0 %v1212_v34  ;;  %v1266_v17 = vpack.c.bf16 %v871_v16, %v870_v15  ;;  %v873_v19 = vld [vmem:[%s1804_s1 + $0x178] sm:$0xff]  ;;  %v451_v21 = vld [vmem:[%s1807_s4] sm:$0xff]  ;;  %v452_v22 = vld [vmem:[%s1807_s4 + $0x8] sm:$0xff] }
  0x3b   :  { %1237 = vmatpush3.bf16.msra.mxu1 %v1236_v35  ;;  %1214 = vmatprep.subr.bf16.mxu0 %v1405_v0  ;;  %v1269_v20 = vpack.c.bf16 %v873_v19, %v872_v18  ;;  %v1272_v23 = vpack.c.bf16 %v452_v22, %v451_v21  ;;  %v453_v24 = vld [vmem:[%s1807_s4 + $0x10] sm:$0xff]  ;;  %v454_v25 = vld [vmem:[%s1807_s4 + $0x18] sm:$0xff]  ;;  %v455_v27 = vld [vmem:[%s1807_s4 + $0x20] sm:$0xff] }
  0x3c   :  { %1238 = vmatprep.subr.bf16.mxu1 %v1405_v0  ;;  %v1275_v26 = vpack.c.bf16 %v454_v25, %v453_v24  ;;  %v456_v28 = vld [vmem:[%s1807_s4 + $0x28] sm:$0xff]  ;;  %v457_v30 = vld [vmem:[%s1807_s4 + $0x30] sm:$0xff]  ;;  %v458_v31 = vld [vmem:[%s1807_s4 + $0x38] sm:$0xff] }
  0x3d   :  { %v1278_v29 = vpack.c.bf16 %v456_v28, %v455_v27  ;;  %v1281_v32 = vpack.c.bf16 %v458_v31, %v457_v30  ;;  %v459_v33 = vld [vmem:[%s1807_s4 + $0x40] sm:$0xff]  ;;  %v460_v34 = vld [vmem:[%s1807_s4 + $0x48] sm:$0xff]  ;;  %v461_v36 = vld [vmem:[%s1807_s4 + $0x50] sm:$0xff] }
  0x3e   :  { %1216 = vmatpush3.bf16.msra.mxu0 %v1215_v40  ;;  %v1284_v35 = vpack.c.bf16 %v460_v34, %v459_v33  ;;  %v462_v37 = vld [vmem:[%s1807_s4 + $0x58] sm:$0xff]  ;;  %v463_v39 = vld [vmem:[%s1807_s4 + $0x60] sm:$0xff]  ;;  %v464_v40 = vld [vmem:[%s1807_s4 + $0x68] sm:$0xff] }
  0x3f   :  { %1240 = vmatpush3.bf16.msra.mxu1 %v1239_v41  ;;  %1217 = vmatprep.subr.bf16.mxu0 %v1405_v0  ;;  %v1287_v38 = vpack.c.bf16 %v462_v37, %v461_v36  ;;  %v1290_v41 = vpack.c.bf16 %v464_v40, %v463_v39  ;;  %v465_v42 = vld [vmem:[%s1807_s4 + $0x70] sm:$0xff]  ;;  %v466_v43 = vld [vmem:[%s1807_s4 + $0x78] sm:$0xff] }
  0x40   :  { %1241 = vmatprep.subr.bf16.mxu1 %v1405_v0  ;;  %v1293_v44 = vpack.c.bf16 %v466_v43, %v465_v42 }
  0x42   :  { %1219 = vmatpush3.bf16.msra.mxu0 %v1218_v46 }
  0x43   :  { %1243 = vmatpush3.bf16.msra.mxu1 %v1242_v47  ;;  %1220 = vmatprep.subr.bf16.mxu0 %v1405_v0 }
  0x44   :  { %1244 = vmatprep.subr.bf16.mxu1 %v1405_v0 }
  0x46   :  { %1222 = vmatpush3.bf16.msra.mxu0 %v1221_v52 }
  0x47   :  { %1246 = vmatpush3.bf16.msra.mxu1 %v1245_v53  ;;  %1247 = vmatprep.subr.bf16.mxu0 %v1405_v0 }
  0x48   :  { %1271 = vmatprep.subr.bf16.mxu1 %v1405_v0 }
  0x49   :  { %1011 = vmatmul.mubr.f32.vlgmr.msra.gmra.mrb[0].mxu0 %v1603_v56 }
  0x4a   :  { %1058 = vmatmul.mubr.f32.vlgmr.msra.gmra.mrb[0].mxu1 %v1603_v56  ;;  %1249 = vmatpush3.bf16.msra.mxu0 %v1248_v57 }
  0x4b   :  { %1060 = vmatprep.mubr.msk.f32.mxu1 %vm1407_vm0, %v1406_v1  ;;  %1250 = vmatprep.subr.bf16.mxu0 %v1405_v0 }
  0x4c   :  { %1013 = vmatprep.mubr.msk.f32.mxu0 %vm1407_vm0, %v1406_v1  ;;  %1273 = vmatpush3.bf16.msra.mxu1 %v1272_v23 }
  0x4d   :  { %1014 = vmatmul.mubr.f32.gmra.mrb[2].mxu0 %v67_v61  ;;  %1274 = vmatprep.subr.bf16.mxu1 %v1405_v0 }
  0x4e   :  { %1061 = vmatmul.mubr.f32.gmra.mrb[2].mxu1 %v67_v61  ;;  %1252 = vmatpush3.bf16.msra.mxu0 %v1251_v60 }
  0x4f   :  { %1253 = vmatprep.subr.bf16.mxu0 %v1405_v0  ;;  %1063 = vmatprep.mubr.msk.f32.mxu1 %vm1407_vm0, %v1406_v1 }
  0x50   :  { %1016 = vmatprep.mubr.msk.f32.mxu0 %vm1407_vm0, %v1406_v1  ;;  %1276 = vmatpush3.bf16.msra.mxu1 %v1275_v26 }
  0x51   :  { %1017 = vmatmul.mubr.f32.gmra.mrb[4].mxu0 %v68_v3  ;;  %1277 = vmatprep.subr.bf16.mxu1 %v1405_v0 }
  0x52   :  { %1255 = vmatpush3.bf16.msra.mxu0 %v1254_v2  ;;  %1064 = vmatmul.mubr.f32.gmra.mrb[4].mxu1 %v68_v3 }
  0x53   :  { %1256 = vmatprep.subr.bf16.mxu0 %v1405_v0  ;;  %1066 = vmatprep.mubr.msk.f32.mxu1 %vm1407_vm0, %v1406_v1 }
  0x54   :  { %1019 = vmatprep.mubr.msk.f32.mxu0 %vm1407_vm0, %v1406_v1  ;;  %1279 = vmatpush3.bf16.msra.mxu1 %v1278_v29 }
  0x55   :  { %1020 = vmatmul.mubr.f32.gmra.mrb[6].mxu0 %v69_v7  ;;  %1280 = vmatprep.subr.bf16.mxu1 %v1405_v0 }
  0x56   :  { %1258 = vmatpush3.bf16.msra.mxu0 %v1257_v6  ;;  %1067 = vmatmul.mubr.f32.gmra.mrb[6].mxu1 %v69_v7 }
  0x57   :  { %1259 = vmatprep.subr.bf16.mxu0 %v1405_v0  ;;  %1069 = vmatprep.mubr.msk.f32.mxu1 %vm1407_vm0, %v1406_v1 }
  0x58   :  { %1022 = vmatprep.mubr.msk.f32.mxu0 %vm1407_vm0, %v1406_v1  ;;  %1282 = vmatpush3.bf16.msra.mxu1 %v1281_v32 }
  0x59   :  { %1023 = vmatmul.mubr.f32.gmra.mrb[8].mxu0 %v70_v11  ;;  %1283 = vmatprep.subr.bf16.mxu1 %v1405_v0 }
  0x5a   :  { %1261 = vmatpush3.bf16.msra.mxu0 %v1260_v10  ;;  %1070 = vmatmul.mubr.f32.gmra.mrb[8].mxu1 %v70_v11 }
  0x5b   :  { %1262 = vmatprep.subr.bf16.mxu0 %v1405_v0  ;;  %1104 = vmatprep.mubr.msk.f32.mxu0 %vm1407_vm0, %v1406_v1 }
  0x5c   :  { %1151 = vmatprep.mubr.msk.f32.mxu1 %vm1407_vm0, %v1406_v1  ;;  %1285 = vmatpush3.bf16.msra.mxu1 %v1284_v35 }
  0x5d   :  { %1286 = vmatprep.subr.bf16.mxu1 %v1405_v0 }
  0x5e   :  { %1264 = vmatpush3.bf16.msra.mxu0 %v1263_v14 }
  0x5f   :  { %1265 = vmatprep.subr.bf16.mxu0 %v1405_v0 }
  0x60   :  { %1288 = vmatpush3.bf16.msra.mxu1 %v1287_v38 }
  0x61   :  { %1289 = vmatprep.subr.bf16.mxu1 %v1405_v0 }
  0x62   :  { %1267 = vmatpush3.bf16.msra.mxu0 %v1266_v17 }
  0x63   :  { %1268 = vmatprep.subr.bf16.mxu0 %v1405_v0 }
  0x64   :  { %1291 = vmatpush3.bf16.msra.mxu1 %v1290_v41 }
  0x65   :  { %1292 = vmatprep.subr.bf16.mxu1 %v1405_v0 }
  0x66   :  { %1270 = vmatpush3.bf16.msra.mxu0 %v1269_v20 }
  0x67   :  { %1295 = vmatprep.subr.bf16.mxu0 %v1405_v0 }
  0x68   :  { %1294 = vmatpush3.bf16.msra.mxu1 %v1293_v44 }
  0x69   :  { %1105 = vmatmul.mubr.f32.vlgmr.msra.gmra.mrb[10].mxu0 %v1603_v56  ;;  %1154 = vmatprep.subr.mxu1 %v1406_v1 }
  0x6a   :  { %1107 = vmatprep.mubr.msk.f32.mxu0 %vm1407_vm0, %v1406_v1  ;;  %1297 = vmatpush3.bf16.msra.mxu0 %v1272_v23 }
  0x6b   :  { %1298 = vmatprep.subr.bf16.mxu0 %v1405_v0 }
  0x6d   :  { %1108 = vmatmul.mubr.f32.gmra.mrb[12].mxu0 %v67_v61 }
  0x6e   :  { %1110 = vmatprep.mubr.msk.f32.mxu0 %vm1407_vm0, %v1406_v1  ;;  %1300 = vmatpush3.bf16.msra.mxu0 %v1275_v26 }
  0x6f   :  { %1301 = vmatprep.subr.bf16.mxu0 %v1405_v0 }
  0x71   :  { %1111 = vmatmul.mubr.f32.gmra.mrb[14].mxu0 %v68_v3 }
  0x72   :  { %1113 = vmatprep.mubr.msk.f32.mxu0 %vm1407_vm0, %v1406_v1  ;;  %1303 = vmatpush3.bf16.msra.mxu0 %v1278_v29 }
  0x73   :  { %1304 = vmatprep.subr.bf16.mxu0 %v1405_v0 }
  0x75   :  { %1114 = vmatmul.mubr.f32.gmra.mrb[16].mxu0 %v69_v7 }
  0x76   :  { %1116 = vmatprep.mubr.msk.f32.mxu0 %vm1407_vm0, %v1406_v1  ;;  %1306 = vmatpush3.bf16.msra.mxu0 %v1281_v32 }
  0x77   :  { %1307 = vmatprep.subr.bf16.mxu0 %v1405_v0 }
  0x79   :  { %1117 = vmatmul.mubr.f32.gmra.mrb[18].mxu0 %v70_v11 }
  0x7a   :  { %1191 = vmatprep.mubr.msk.f32.mxu0 %vm1407_vm0, %v1406_v1  ;;  %1309 = vmatpush3.bf16.msra.mxu0 %v1284_v35 }
  0x7b   :  { %1310 = vmatprep.subr.bf16.mxu0 %v1405_v0 }
  0x7e   :  { %1312 = vmatpush3.bf16.msra.mxu0 %v1287_v38 }
  0x7f   :  { %1313 = vmatprep.subr.bf16.mxu0 %v1405_v0 }
  0x82   :  { %1315 = vmatpush3.bf16.msra.mxu0 %v1290_v41 }
  0x83   :  { %1316 = vmatprep.subr.bf16.mxu0 %v1405_v0 }
  0x86   :  { %1318 = vmatpush3.bf16.msra.mxu0 %v1293_v44 }
 0x11c   :  { %v153_v45 = vpop.f32.mrb[0].mxu0 }
 0x11d   :  { %v1012_v46 = vpop.f32.mrb[1].mxu0  ;;  %v260_v47 = vpop.f32.mrb[0].mxu1 }
 0x11e   :  { %v1059_v48 = vpop.f32.mrb[1].mxu1  ;;  %v395_v49 = vrot.slane %v260_v47, 1 }
 0x120   :  { %v158_v50 = vpop.f32.mrb[2].mxu0 }
 0x121   :  { %v265_v51 = vpop.f32.mrb[2].mxu1  ;;  %v1015_v52 = vpop.f32.mrb[3].mxu0 }
 0x122   :  { %v396_v53 = vrot.slane %v265_v51, 1  ;;  %v1062_v54 = vpop.f32.mrb[3].mxu1 }
 0x123   :  { %v467_v54 = vld [vmem:[#allocation6] sm:$0xff] }
 0x124   :  { %v397_v55 = vsel %vm394_vm1, %v395_v49, %v396_v53  ;;  %v163_v56 = vpop.f32.mrb[4].mxu0 }
 0x125   :  { %v402_v57 = vadd.f32 %v397_v55, %v153_v45  ;;  %v270_v0 = vpop.f32.mrb[4].mxu1  ;;  %v1018_v58 = vpop.f32.mrb[5].mxu0 }
 0x126   :  { %v398_v59 = vrot.slane %v270_v0, 1  ;;  %v1065_v60 = vpop.f32.mrb[5].mxu1 }
 0x128   :  { %v399_v61 = vsel %vm394_vm1, %v396_v53, %v398_v59  ;;  %v168_v62 = vpop.f32.mrb[6].mxu0 }
 0x129   :  { %v403_v63 = vadd.f32 %v399_v61, %v158_v50  ;;  %v275_v2 = vpop.f32.mrb[6].mxu1  ;;  %v1021_v3 = vpop.f32.mrb[7].mxu0 }
 0x12a   :  { %v419_v4 = vrot.slane %v275_v2, 1  ;;  %v1068_v5 = vpop.f32.mrb[7].mxu1 }
 0x12c   :  { %v420_v6 = vsel %vm394_vm1, %v398_v59, %v419_v4  ;;  %v173_v7 = vpop.f32.mrb[8].mxu0 }
 0x12d   :  { %v426_v8 = vadd.f32 %v420_v6, %v163_v56  ;;  %v280_v9 = vpop.f32.mrb[8].mxu1  ;;  %v1024_v10 = vpop.f32.mrb[9].mxu0 }
 0x12e   :  { %v421_v11 = vrot.slane %v280_v9, 1  ;;  %v1071_v12 = vpop.f32.mrb[9].mxu1 }
 0x130   :  { %v422_v13 = vsel %vm394_vm1, %v419_v4, %v421_v11  ;;  %v428_v14 = vadd.f32 %v421_v11, %v173_v7 }
 0x131   :  { %v427_v15 = vadd.f32 %v422_v13, %v168_v62 }
 0x13c   :  { %v367_v16 = vpop.f32.mrb[10].mxu0 }
 0x13d   :  { %v1106_v17 = vpop.f32.mrb[11].mxu0  ;;  %v408_v19 = vrot.slane %v367_v16, 2 }
 0x140   :  { %v372_v18 = vpop.f32.mrb[12].mxu0 }
 0x141   :  { %v409_v20 = vrot.slane %v372_v18, 2  ;;  %v1109_v21 = vpop.f32.mrb[13].mxu0 }
 0x143   :  { %v410_v22 = vsel %vm407_vm2, %v408_v19, %v409_v20 }
 0x144   :  { %v415_v23 = vadd.f32 %v410_v22, %v402_v57  ;;  %v377_v24 = vpop.f32.mrb[14].mxu0  ;;  %v622_v57 = vlaneseq }
 0x145   :  { %v411_v25 = vrot.slane %v377_v24, 2  ;;  %v1112_v26 = vpop.f32.mrb[15].mxu0 }
 0x146   :  { %v623_v0 = vshrl.u32 %v622_v57, 7 }
 0x147   :  { %v412_v27 = vsel %vm407_vm2, %v409_v20, %v411_v25 }
 0x148   :  { %v416_v28 = vadd.f32 %v412_v27, %v403_v63  ;;  %v382_v29 = vpop.f32.mrb[16].mxu0  ;;  %v624_v58 = vsub.s32 0, %v623_v0  ;;  %v876_v27 = vld [vmem:[%s1806_s3] ss:$0 sm:$0xff]  ;;  %s1408_s3 = smov [#allocation8]  }
 0x149   :  { %v431_v30 = vrot.slane %v382_v29, 2  ;;  %v1115_v31 = vpop.f32.mrb[17].mxu0  ;;  %s829_s0 = sshll.u32 %s1408_s3, 4  ;;  %s830_s0 = int_to_ptr.vmem [resolvable:$true] %s829_s0 }
 0x14a   :  { %v468_v43 = vadd.f32 %v416_v28, %v415_v23  ;;  %s1373_s25 = scalar_lea.vmem %s830_s0, 512  ;;  %p1378_p3 = scmp.lt.s32.totalorder %s830_s0, %s830_s0 }
 0x14b   :  { %v432_v32 = vsel %vm407_vm2, %v411_v25, %v431_v30  ;;  %p1374_p2 = scmp.ne.s32.totalorder %s830_s0, %s1373_s25  ;;  %p1379_p4 = scmp.lt.s32.totalorder %s1373_s25, %s1373_s25 }
 0x14c   :  { %v438_v33 = vadd.f32 %v432_v32, %v426_v8  ;;  %v387_v34 = vpop.f32.mrb[18].mxu0  ;;  %v812_v32 = vld [vmem:[%s1809_s6] sm:$0xff] }
 0x14d   :  { %v433_v35 = vrot.slane %v387_v34, 2  ;;  %v1118_v36 = vpop.f32.mrb[19].mxu0  ;;  %v814_v34 = vld [vmem:[%s1809_s6 + $0x10] sm:$0xff]  ;;  %p1380_p5 = por %p1379_p4, %p1378_p3 }
 0x14e   :  { %v444_v41 = vrot.slane %v438_v33, 2  ;;  %v813_v33 = vld [vmem:[%s1809_s6 + $0x8] sm:$0xff] }
 0x14f   :  { %v434_v37 = vsel %vm407_vm2, %v431_v30, %v433_v35  ;;  %v440_v38 = vadd.f32 %v433_v35, %v428_v14  ;;  %v815_v35 = vld [vmem:[%s1809_s6 + $0x18] sm:$0xff]  ;;  %p1381_p6 = pnand %p1380_p5, %p1374_p2 }
 0x150   :  { %v439_v39 = vadd.f32 %v434_v37, %v427_v15 }
 0x151   :  { %v447_v40 = vrot.slane %v440_v38, 2 }
 0x152   :  { %v445_v42 = vrot.slane %v439_v39, 2 }
 0x154   :  { %v446_v44 = vsel %vm407_vm2, %v444_v41, %v445_v42  ;;  %v448_v45 = vsel %vm407_vm2, %v445_v42, %v447_v40 }
 0x155   :  { %v469_v46 = vadd.f32 %v468_v43, %v446_v44 }
 0x157   :  { %v470_v47 = vadd.f32 %v469_v46, %v448_v45 }
 0x159   :  { %v471_v48 = vrot.slane %v470_v47, 4 }
 0x15b   :  { %v472_v49 = vadd.f32 %v471_v48, %v470_v47 }
 0x15d   :  { %v473_v50 = vrot.slane %v472_v49, 2 }
 0x15f   :  { %v474_v51 = vadd.f32 %v473_v50, %v472_v49 }
 0x161   :  { %v475_v52 = vrot.slane %v474_v51, 1 }
 0x163   :  { %v476_v53 = vadd.f32 %v475_v52, %v474_v51 }
 0x165   :  { %1152 = vmatmul.mubr.f32.vlgmr.msra.gmra.mrb[10].mxu1 %v476_v53 }
 0x166   :  { %1155 = vmatpush3.msra.mxu1 %v467_v54  ;;  %1156 = vmatprep.mubr.msk.f32.mxu1 %vm1407_vm0, %v1406_v1 }
 0x167   :  { %1194 = vmatprep.subr.mxu1 %v1406_v1 }
 0x238   :  { %v543_v55 = vpop.f32.mrb[10].mxu1 }
 0x239   :  { %v1153_v56 = vpop.f32.mrb[11].mxu1  ;;  %1157 = vmatmul.mubr.msk.f32.vlgmr.msra.gmra.mrb[12].mxu1 %vm547_vm3, %v543_v55 }
 0x23a   :  { %1195 = vmatpush3.msra.mxu1 %v467_v54  ;;  %1196 = vmatprep.mubr.msk.f32.mxu1 %vm1407_vm0, %v1406_v1 }
 0x30c   :  { %v617_v59 = vpop.f32.mrb[12].mxu1 }
 0x30d   :  { %v621_v60 = vmul.f32 0.001953125, %v617_v59  ;;  %v1158_v61 = vpop.f32.mrb[13].mxu1 }
 0x30f   :  { %v625_v62 = vrot.slane %v621_v60, %v624_v58 }
 0x311   :  { %v626_v63 = vsub.f32 %v415_v23, %v625_v62  ;;  %v627_v2 = vsub.f32 %v416_v28, %v625_v62  ;;  %v628_v3 = vsub.f32 %v446_v44, %v625_v62  ;;  %v629_v4 = vsub.f32 %v448_v45, %v625_v62  ;;  %v787_v23 = vld [vmem:[%s1805_s2] sm:$0x1] }
 0x313   :  { %v630_v5 = vmul.f32 %v626_v63, %v626_v63  ;;  %v631_v6 = vmul.f32 %v627_v2, %v627_v2  ;;  %v632_v7 = vmul.f32 %v628_v3, %v628_v3  ;;  %v633_v9 = vmul.f32 %v629_v4, %v629_v4 }
 0x315   :  { %v634_v8 = vadd.f32 %v631_v6, %v630_v5 }
 0x317   :  { %v635_v10 = vadd.f32 %v634_v8, %v632_v7 }
 0x319   :  { %v636_v11 = vadd.f32 %v635_v10, %v633_v9 }
 0x31b   :  { %v637_v12 = vrot.slane %v636_v11, 4 }
 0x31d   :  { %v638_v1 = vadd.f32 %v637_v12, %v636_v11 }
 0x31f   :  { %v639_v13 = vrot.slane %v638_v1, 2 }
 0x321   :  { %v640_v14 = vadd.f32 %v639_v13, %v638_v1 }
 0x323   :  { %v641_v15 = vrot.slane %v640_v14, 1 }
 0x325   :  { %v642_v16 = vadd.f32 %v641_v15, %v640_v14 }
 0x327   :  { %1192 = vmatmul.mubr.f32.vlgmr.msra.gmra.mrb[20].mxu0 %v642_v16 }
 0x3fa   :  { %v709_v17 = vpop.f32.mrb[20].mxu0 }
 0x3fb   :  { %v1193_v18 = vpop.f32.mrb[21].mxu0  ;;  %1197 = vmatmul.mubr.msk.f32.vlgmr.msra.gmra.mrb[14].mxu1 %vm547_vm3, %v709_v17 }
 0x4ce   :  { %v782_v19 = vpop.f32.mrb[14].mxu1 }
 0x4cf   :  { %v786_v20 = vmul.f32 0.001953125, %v782_v19  ;;  %v1198_v21 = vpop.f32.mrb[15].mxu1 }
 0x4d1   :  { %v788_v22 = vadd.f32 1e-05, %v786_v20 }
 0x4d3   :  { %1327 = vrsqrt.f32 %v788_v22 }
 0x4dd   :  { %v1328_v24 = vpop.eup %1327 }
 0x4de   :  { %v790_v25 = vmul.f32 %v1328_v24, %v787_v23 }
 0x4e0   :  { %v795_v26 = vrot.slane %v790_v25, %v624_v58 }
 0x4e2   :  { %v797_v28 = vmul.f32 %v795_v26, %v626_v63  ;;  %v798_v29 = vmul.f32 %v795_v26, %v627_v2  ;;  %v799_v30 = vmul.f32 %v795_v26, %v628_v3  ;;  %v800_v31 = vmul.f32 %v795_v26, %v629_v4 }
 0x4e4   :  { %v808_v36 = vadd.f32 %v876_v27, %v797_v28  ;;  %v809_v37 = vadd.f32 %v876_v27, %v798_v29  ;;  %v810_v38 = vadd.f32 %v876_v27, %v799_v30  ;;  %v811_v39 = vadd.f32 %v876_v27, %v800_v31 }
 0x4e6   :  { %v816_v40 = vadd.f32 %v812_v32, %v808_v36  ;;  %v817_v41 = vadd.f32 %v813_v33, %v809_v37  ;;  %v818_v42 = vadd.f32 %v814_v34, %v810_v38  ;;  %v819_v43 = vadd.f32 %v815_v35, %v811_v39 }
 0x4e8   :  { %820 = vst [vmem:[#allocation8] sm:$0xff] %v816_v40  ;;  %821 = vst [vmem:[#allocation8 + $0x8] sm:$0xff] %v817_v41 }
 0x4e9   :  { %822 = vst [vmem:[#allocation8 + $0x10] sm:$0xff] %v818_v42  ;;  %823 = vst [vmem:[#allocation8 + $0x18] sm:$0xff] %v819_v43 }
 0x4ea   :  { %1384 = shalt.err (!%p1381_p6)
}
 0x4eb   :  { %s1385_s26 = scalar_lea.hbm %s1810_s7, 512 }
 0x4ec   :  { %p1386_p7 = scmp.ne.s32.totalorder %s1810_s7, %s1385_s26  ;;  %p1389_p8 = scmp.lt.u32.totalorder %s1385_s26, %s1810_s7 }
 0x4ee   :  { %p1391_p9 = pnand %p1389_p8, %p1386_p7 }
 0x4f0   :  { %1394 = shalt.err (!%p1391_p9)
}
 0x4f1   :  { %835 = dma.vmem_to_hbm [thread:$0]  %s830_s0, 512, %s1810_s7, [#allocation5], %s1402_s11, %s1402_s11, %s1403_s12  }
 0x4f2   :  { %1399 = dma.done.wait [#allocation5], 512  }
 0x4f3   :  { %1400 = vsyncadd [#allocation5], 4294966784 }
 0x4f4   :  { %839 = vsyncpa [#allocation4], 1 }
 0x4f5   :  { %840 = vsyncpa [#allocation7], 1 }
 0x4f6   :  { %841 = vsyncpa [#allocation5], 1 }

// kernel: _forward_impl.7
= control target key start
LH: loop header
LB: loop body
LE: loop exit
PB: predicated region body
PF: predicated region fallthrough
CT: control target
= control target key end

     0   :  { %13 = vsyncpa [#allocation4], 0  ;;  %s1830_s0 = inlined_call_operand.hbm [shape: f32[32,128], index: 0, kind: input, shape index: {}]   ;;  %s1831_s1 = inlined_call_operand.vmem [shape: f32[3,128,128], index: 1, kind: input, shape index: {}]   ;;  %s1832_s2 = inlined_call_operand.vmem [shape: f32[1,128], index: 2, kind: input, shape index: {}]   ;;  %s1833_s3 = inlined_call_operand.vmem [shape: f32[1,128], index: 3, kind: input, shape index: {}]   ;;  %s1834_s4 = inlined_call_operand.vmem [shape: f32[128,8], index: 4, kind: input, shape index: {}]   ;;  %s1835_s5 = inlined_call_operand.hbm [shape: f32[8,128], index: 5, kind: input, shape index: {}]   ;;  %s1836_s6 = inlined_call_operand.vmem [shape: f32[32,128], index: 6, kind: input, shape index: {}]   ;;  %s1837_s7 = inlined_call_operand.hbm [shape: f32[32,128], index: 7, kind: input, shape index: {}]   ;;  %s1838_s8 = inlined_call_operand.vmem [shape: f32[32,128], index: 8, kind: output, shape index: {}]  }
   0x1   :  { %14 = vsyncpa [#allocation6], 0  ;;  %s1410_s27 = smov [#allocation5]   ;;  %s1411_s29 = smov [#allocation3]  }
   0x2   :  { %s41_s28 = sshll.u32 %s1410_s27, 4  ;;  %s20_s30 = sshll.u32 %s1411_s29, 4  ;;  %s42_s28 = int_to_ptr.vmem [resolvable:$true] %s41_s28  ;;  %s1463_s30 = int_to_ptr.vmem [resolvable:$true] %s20_s30 }
   0x3   :  { %s1340_s11 = scalar_lea.hbm %s1835_s5, 128 }
   0x4   :  { %p1341_p0 = scmp.ne.s32.totalorder %s1835_s5, %s1340_s11  ;;  %p1344_p1 = scmp.lt.u32.totalorder %s1340_s11, %s1835_s5 }
   0x6   :  { %p1346_p2 = pnand %p1344_p1, %p1341_p0 }
   0x8   :  { %1349 = shalt.err (!%p1346_p2)
}
   0x9   :  { %s1350_s16 = scalar_lea.vmem %s42_s28, 128  ;;  %p1355_p4 = scmp.lt.s32.totalorder %s42_s28, %s42_s28 }
   0xa   :  { %p1351_p3 = scmp.ne.s32.totalorder %s42_s28, %s1350_s16  ;;  %p1356_p5 = scmp.lt.s32.totalorder %s1350_s16, %s1350_s16 }
   0xc   :  { %p1357_p6 = por %p1356_p5, %p1355_p4 }
   0xe   :  { %p1358_p7 = pnand %p1357_p6, %p1351_p3 }
  0x10   :  { %1361 = shalt.err (!%p1358_p7)
}
  0x11   :  { %44 = dma.hbm_to_vmem [thread:$0]  %s1835_s5, 128, %s42_s28, [#allocation6]  }
  0x12   :  { %s1362_s21 = scalar_lea.hbm %s1830_s0, 512 }
  0x13   :  { %p1363_p8 = scmp.ne.s32.totalorder %s1830_s0, %s1362_s21  ;;  %p1366_p9 = scmp.lt.u32.totalorder %s1362_s21, %s1830_s0 }
  0x15   :  { %p1368_p10 = pnand %p1366_p9, %p1363_p8 }
  0x17   :  { %1371 = shalt.err (!%p1368_p10)
}
  0x18   :  { %s1372_s26 = scalar_lea.vmem %s1463_s30, 512  ;;  %p1377_p12 = scmp.lt.s32.totalorder %s1463_s30, %s1463_s30 }
  0x19   :  { %p1373_p11 = scmp.ne.s32.totalorder %s1463_s30, %s1372_s26  ;;  %p1378_p13 = scmp.lt.s32.totalorder %s1372_s26, %s1372_s26 }
  0x1b   :  { %p1379_p0 = por %p1378_p13, %p1377_p12 }
  0x1d   :  { %p1380_p1 = pnand %p1379_p0, %p1373_p11 }
  0x1f   :  { %1383 = shalt.err (!%p1380_p1)
}
  0x20   :  { %s1412_s5 = smov 128   ;;  %s1413_s27 = smov 8  }
  0x21   :  { %26 = dma.hbm_to_vmem [thread:$0]  %s1830_s0, 512, %s1463_s30, [#allocation4], %s1412_s5, %s1412_s5, %s1413_s27  }
  0x22   :  { %s1414_s9 = smov [#allocation7]   ;;  %s1384_s13 = scalar_lea.hbm %s1837_s7, 512 }
  0x23   :  { %s52_s10 = sshll.u32 %s1414_s9, 4  ;;  %p1385_p2 = scmp.ne.s32.totalorder %s1837_s7, %s1384_s13  ;;  %s53_s10 = int_to_ptr.vmem [resolvable:$true] %s52_s10 }
  0x24   :  { %p1388_p3 = scmp.lt.u32.totalorder %s1384_s13, %s1837_s7 }
  0x26   :  { %p1390_p4 = pnand %p1388_p3, %p1385_p2 }
  0x28   :  { %1393 = shalt.err (!%p1390_p4)
}
  0x29   :  { %s1394_s18 = scalar_lea.vmem %s53_s10, 512  ;;  %p1399_p6 = scmp.lt.s32.totalorder %s53_s10, %s53_s10 }
  0x2a   :  { %p1395_p5 = scmp.ne.s32.totalorder %s53_s10, %s1394_s18  ;;  %p1400_p7 = scmp.lt.s32.totalorder %s1394_s18, %s1394_s18 }
  0x2c   :  { %p1401_p8 = por %p1400_p7, %p1399_p6 }
  0x2e   :  { %p1402_p9 = pnand %p1401_p8, %p1395_p5 }
  0x30   :  { %1405 = shalt.err (!%p1402_p9)
}
  0x31   :  { %58 = dma.hbm_to_vmem [thread:$0]  %s1837_s7, 512, %s53_s10, [#allocation6], %s1412_s5, %s1412_s5, %s1413_s27  }
  0x32   :  { %1406 = dma.done.wait [#allocation4], 512  }
  0x33   :  { %1407 = vsyncadd [#allocation4], 4294966784 }
  0x34   :  { %1408 = dma.done.wait [#allocation6], 640  }
  0x35   :  { %1409 = vsyncadd [#allocation6], 4294966656  ;;  %v1415_v0 = vmov 0.0|0.0   ;;  %v1416_v1 = vmov 0.0   ;;  %vm1417_vm0 = vmmov 0   ;;  %v86_v2 = vld [vmem:[%s1831_s1] sm:$0xff] }
  0x36   :  { %1210 = vmatprep.subr.bf16.mxu0 %v1415_v0  ;;  %1234 = vmatprep.subr.bf16.mxu1 %v1415_v0  ;;  %68 = vst [vmem:[#allocation2] sm:$0xff] %v1416_v1  ;;  %69 = vst [vmem:[#allocation2 + $0x8] sm:$0xff] %v1416_v1  ;;  %v87_v3 = vld [vmem:[%s1831_s1 + $0x8] sm:$0xff]  ;;  %v853_v4 = vld [vmem:[%s1831_s1 + $0x80] sm:$0xff]  ;;  %vm409_vm1 = vcmask 1046528   ;;  %vm422_vm2 = vcmask 1045504  }
  0x37   :  { %70 = vst [vmem:[#allocation2 + $0x10] sm:$0xff] %v1416_v1  ;;  %71 = vst [vmem:[#allocation2 + $0x18] sm:$0xff] %v1416_v1  ;;  %1021 = vmatprep.mubr.msk.f32.mxu0 %vm1417_vm0, %v1416_v1  ;;  %1068 = vmatprep.mubr.msk.f32.mxu1 %vm1417_vm0, %v1416_v1  ;;  %v1211_v5 = vpack.c.bf16 %v87_v3, %v86_v2  ;;  %v854_v6 = vld [vmem:[%s1831_s1 + $0x88] sm:$0xff]  ;;  %v88_v7 = vld [vmem:[%s1831_s1 + $0x10] sm:$0xff]  ;;  %vm562_vm3 = vcmask 64512  }
  0x38   :  { %72 = vst [vmem:[#allocation2 + $0x20] sm:$0xf] %v1416_v1  ;;  %v89_v8 = vld [vmem:[%s1831_s1 + $0x18] sm:$0xff]  ;;  %v1235_v9 = vpack.c.bf16 %v854_v6, %v853_v4  ;;  %v855_v10 = vld [vmem:[%s1831_s1 + $0x90] sm:$0xff]  ;;  %v90_v14 = vld [vmem:[%s1831_s1 + $0x20] sm:$0xff] }
  0x39   :  { %v856_v11 = vld [vmem:[%s1831_s1 + $0x98] sm:$0xff]  ;;  %1212 = vmatpush3.bf16.msra.mxu0 %v1211_v5  ;;  %v1214_v12 = vpack.c.bf16 %v89_v8, %v88_v7  ;;  %v91_v15 = vld [vmem:[%s1831_s1 + $0x28] sm:$0xff]  ;;  %v857_v16 = vld [vmem:[%s1831_s1 + $0xa0] sm:$0xff] }
  0x3a   :  { %1236 = vmatpush3.bf16.msra.mxu1 %v1235_v9  ;;  %1213 = vmatprep.subr.bf16.mxu0 %v1415_v0  ;;  %v1238_v13 = vpack.c.bf16 %v856_v11, %v855_v10  ;;  %v858_v17 = vld [vmem:[%s1831_s1 + $0xa8] sm:$0xff]  ;;  %v1217_v18 = vpack.c.bf16 %v91_v15, %v90_v14  ;;  %v92_v20 = vld [vmem:[%s1831_s1 + $0x30] sm:$0xff]  ;;  %v93_v21 = vld [vmem:[%s1831_s1 + $0x38] sm:$0xff] }
  0x3b   :  { %1237 = vmatprep.subr.bf16.mxu1 %v1415_v0  ;;  %v1241_v19 = vpack.c.bf16 %v858_v17, %v857_v16  ;;  %v859_v22 = vld [vmem:[%s1831_s1 + $0xb0] sm:$0xff]  ;;  %v860_v23 = vld [vmem:[%s1831_s1 + $0xb8] sm:$0xff]  ;;  %v73_v24 = vld [vmem:[#allocation3] sm:$0xff]  ;;  %v1220_v25 = vpack.c.bf16 %v93_v21, %v92_v20 }
  0x3c   :  { %75 = vst [vmem:[#allocation2 + $0x1] sm:$0xff] %v73_v24  ;;  %v74_v26 = vld [vmem:[#allocation3 + $0x8] sm:$0xff]  ;;  %v1244_v27 = vpack.c.bf16 %v860_v23, %v859_v22  ;;  %v94_v28 = vld [vmem:[%s1831_s1 + $0x40] sm:$0xff]  ;;  %v95_v29 = vld [vmem:[%s1831_s1 + $0x48] sm:$0xff] }
  0x3d   :  { %1215 = vmatpush3.bf16.msra.mxu0 %v1214_v12  ;;  %76 = vst [vmem:[#allocation2 + $0x9] sm:$0xff] %v74_v26  ;;  %v861_v30 = vld [vmem:[%s1831_s1 + $0xc0] sm:$0xff]  ;;  %v862_v31 = vld [vmem:[%s1831_s1 + $0xc8] sm:$0xff]  ;;  %v77_v32 = vld [vmem:[#allocation3 + $0x10] sm:$0xff]  ;;  %v1223_v34 = vpack.c.bf16 %v95_v29, %v94_v28 }
  0x3e   :  { %1239 = vmatpush3.bf16.msra.mxu1 %v1238_v13  ;;  %1216 = vmatprep.subr.bf16.mxu0 %v1415_v0  ;;  %79 = vst [vmem:[#allocation2 + $0x13] sm:$0xff] %v77_v32  ;;  %v78_v33 = vld [vmem:[#allocation3 + $0x18] sm:$0xff]  ;;  %v1247_v35 = vpack.c.bf16 %v862_v31, %v861_v30  ;;  %v96_v36 = vld [vmem:[%s1831_s1 + $0x50] sm:$0xff]  ;;  %v97_v37 = vld [vmem:[%s1831_s1 + $0x58] sm:$0xff] }
  0x3f   :  { %1240 = vmatprep.subr.bf16.mxu1 %v1415_v0  ;;  %80 = vst [vmem:[#allocation2 + $0x1b] sm:$0xff] %v78_v33  ;;  %v863_v38 = vld [vmem:[%s1831_s1 + $0xd0] sm:$0xff]  ;;  %v864_v39 = vld [vmem:[%s1831_s1 + $0xd8] sm:$0xff]  ;;  %v1226_v40 = vpack.c.bf16 %v97_v37, %v96_v36  ;;  %v98_v42 = vld [vmem:[%s1831_s1 + $0x60] sm:$0xff] }
  0x40   :  { %v1250_v41 = vpack.c.bf16 %v864_v39, %v863_v38  ;;  %v99_v43 = vld [vmem:[%s1831_s1 + $0x68] sm:$0xff]  ;;  %v865_v44 = vld [vmem:[%s1831_s1 + $0xe0] sm:$0xff]  ;;  %v100_v48 = vld [vmem:[%s1831_s1 + $0x70] sm:$0xff] }
  0x41   :  { %1218 = vmatpush3.bf16.msra.mxu0 %v1217_v18  ;;  %v866_v45 = vld [vmem:[%s1831_s1 + $0xe8] sm:$0xff]  ;;  %v1229_v46 = vpack.c.bf16 %v99_v43, %v98_v42  ;;  %v101_v49 = vld [vmem:[%s1831_s1 + $0x78] sm:$0xff]  ;;  %v867_v50 = vld [vmem:[%s1831_s1 + $0xf0] sm:$0xff] }
  0x42   :  { %1242 = vmatpush3.bf16.msra.mxu1 %v1241_v19  ;;  %1219 = vmatprep.subr.bf16.mxu0 %v1415_v0  ;;  %v1253_v47 = vpack.c.bf16 %v866_v45, %v865_v44  ;;  %v868_v51 = vld [vmem:[%s1831_s1 + $0xf8] sm:$0xff]  ;;  %v1232_v52 = vpack.c.bf16 %v101_v49, %v100_v48  ;;  %v869_v54 = vld [vmem:[%s1831_s1 + $0x100] sm:$0xff]  ;;  %v870_v55 = vld [vmem:[%s1831_s1 + $0x108] sm:$0xff] }
  0x43   :  { %1243 = vmatprep.subr.bf16.mxu1 %v1415_v0  ;;  %v1256_v53 = vpack.c.bf16 %v868_v51, %v867_v50  ;;  %v1633_v56 = vld [vmem:[#allocation2] sm:$0xff]  ;;  %v1259_v57 = vpack.c.bf16 %v870_v55, %v869_v54  ;;  %v871_v58 = vld [vmem:[%s1831_s1 + $0x110] sm:$0xff]  ;;  %v872_v59 = vld [vmem:[%s1831_s1 + $0x118] sm:$0xff] }
  0x44   :  { %v1262_v60 = vpack.c.bf16 %v872_v59, %v871_v58  ;;  %v82_v61 = vld [vmem:[#allocation2 + $0x8] sm:$0xff]  ;;  %v873_v62 = vld [vmem:[%s1831_s1 + $0x120] sm:$0xff]  ;;  %v875_v4 = vld [vmem:[%s1831_s1 + $0x130] sm:$0xff] }
  0x45   :  { %1221 = vmatpush3.bf16.msra.mxu0 %v1220_v25  ;;  %v874_v63 = vld [vmem:[%s1831_s1 + $0x128] sm:$0xff]  ;;  %v83_v3 = vld [vmem:[#allocation2 + $0x10] sm:$0xff]  ;;  %v876_v5 = vld [vmem:[%s1831_s1 + $0x138] sm:$0xff] }
  0x46   :  { %1245 = vmatpush3.bf16.msra.mxu1 %v1244_v27  ;;  %1222 = vmatprep.subr.bf16.mxu0 %v1415_v0  ;;  %v1265_v2 = vpack.c.bf16 %v874_v63, %v873_v62  ;;  %v1268_v6 = vpack.c.bf16 %v876_v5, %v875_v4  ;;  %v84_v7 = vld [vmem:[#allocation2 + $0x18] sm:$0xff]  ;;  %v877_v8 = vld [vmem:[%s1831_s1 + $0x140] sm:$0xff]  ;;  %v878_v9 = vld [vmem:[%s1831_s1 + $0x148] sm:$0xff] }
  0x47   :  { %1246 = vmatprep.subr.bf16.mxu1 %v1415_v0  ;;  %v1271_v10 = vpack.c.bf16 %v878_v9, %v877_v8  ;;  %v85_v11 = vld [vmem:[#allocation2 + $0x20] sm:$0xf]  ;;  %v879_v12 = vld [vmem:[%s1831_s1 + $0x150] sm:$0xff]  ;;  %v880_v13 = vld [vmem:[%s1831_s1 + $0x158] sm:$0xff] }
  0x48   :  { %v1274_v14 = vpack.c.bf16 %v880_v13, %v879_v12  ;;  %v881_v15 = vld [vmem:[%s1831_s1 + $0x160] sm:$0xff]  ;;  %v882_v16 = vld [vmem:[%s1831_s1 + $0x168] sm:$0xff]  ;;  %v883_v18 = vld [vmem:[%s1831_s1 + $0x170] sm:$0xff] }
  0x49   :  { %1224 = vmatpush3.bf16.msra.mxu0 %v1223_v34  ;;  %v1277_v17 = vpack.c.bf16 %v882_v16, %v881_v15  ;;  %v884_v19 = vld [vmem:[%s1831_s1 + $0x178] sm:$0xff]  ;;  %v466_v21 = vld [vmem:[%s1834_s4] sm:$0xff]  ;;  %v467_v22 = vld [vmem:[%s1834_s4 + $0x8] sm:$0xff] }
  0x4a   :  { %1248 = vmatpush3.bf16.msra.mxu1 %v1247_v35  ;;  %1225 = vmatprep.subr.bf16.mxu0 %v1415_v0  ;;  %v1280_v20 = vpack.c.bf16 %v884_v19, %v883_v18  ;;  %v1283_v23 = vpack.c.bf16 %v467_v22, %v466_v21  ;;  %v468_v24 = vld [vmem:[%s1834_s4 + $0x10] sm:$0xff]  ;;  %v469_v25 = vld [vmem:[%s1834_s4 + $0x18] sm:$0xff]  ;;  %v470_v27 = vld [vmem:[%s1834_s4 + $0x20] sm:$0xff] }
  0x4b   :  { %1249 = vmatprep.subr.bf16.mxu1 %v1415_v0  ;;  %v1286_v26 = vpack.c.bf16 %v469_v25, %v468_v24  ;;  %v471_v28 = vld [vmem:[%s1834_s4 + $0x28] sm:$0xff]  ;;  %v472_v30 = vld [vmem:[%s1834_s4 + $0x30] sm:$0xff]  ;;  %v473_v31 = vld [vmem:[%s1834_s4 + $0x38] sm:$0xff] }
  0x4c   :  { %v1289_v29 = vpack.c.bf16 %v471_v28, %v470_v27  ;;  %v1292_v32 = vpack.c.bf16 %v473_v31, %v472_v30  ;;  %v474_v33 = vld [vmem:[%s1834_s4 + $0x40] sm:$0xff]  ;;  %v475_v34 = vld [vmem:[%s1834_s4 + $0x48] sm:$0xff]  ;;  %v476_v36 = vld [vmem:[%s1834_s4 + $0x50] sm:$0xff] }
  0x4d   :  { %1227 = vmatpush3.bf16.msra.mxu0 %v1226_v40  ;;  %v1295_v35 = vpack.c.bf16 %v475_v34, %v474_v33  ;;  %v477_v37 = vld [vmem:[%s1834_s4 + $0x58] sm:$0xff]  ;;  %v478_v39 = vld [vmem:[%s1834_s4 + $0x60] sm:$0xff]  ;;  %v479_v40 = vld [vmem:[%s1834_s4 + $0x68] sm:$0xff] }
  0x4e   :  { %1251 = vmatpush3.bf16.msra.mxu1 %v1250_v41  ;;  %1228 = vmatprep.subr.bf16.mxu0 %v1415_v0  ;;  %v1298_v38 = vpack.c.bf16 %v477_v37, %v476_v36  ;;  %v1301_v41 = vpack.c.bf16 %v479_v40, %v478_v39  ;;  %v480_v42 = vld [vmem:[%s1834_s4 + $0x70] sm:$0xff]  ;;  %v481_v43 = vld [vmem:[%s1834_s4 + $0x78] sm:$0xff] }
  0x4f   :  { %1252 = vmatprep.subr.bf16.mxu1 %v1415_v0  ;;  %v1304_v44 = vpack.c.bf16 %v481_v43, %v480_v42 }
  0x51   :  { %1230 = vmatpush3.bf16.msra.mxu0 %v1229_v46 }
  0x52   :  { %1254 = vmatpush3.bf16.msra.mxu1 %v1253_v47  ;;  %1231 = vmatprep.subr.bf16.mxu0 %v1415_v0 }
  0x53   :  { %1255 = vmatprep.subr.bf16.mxu1 %v1415_v0 }
  0x55   :  { %1233 = vmatpush3.bf16.msra.mxu0 %v1232_v52 }
  0x56   :  { %1257 = vmatpush3.bf16.msra.mxu1 %v1256_v53  ;;  %1258 = vmatprep.subr.bf16.mxu0 %v1415_v0 }
  0x57   :  { %1282 = vmatprep.subr.bf16.mxu1 %v1415_v0 }
  0x58   :  { %1022 = vmatmul.mubr.f32.vlgmr.msra.gmra.mrb[0].mxu0 %v1633_v56 }
  0x59   :  { %1069 = vmatmul.mubr.f32.vlgmr.msra.gmra.mrb[0].mxu1 %v1633_v56  ;;  %1260 = vmatpush3.bf16.msra.mxu0 %v1259_v57 }
  0x5a   :  { %1071 = vmatprep.mubr.msk.f32.mxu1 %vm1417_vm0, %v1416_v1  ;;  %1261 = vmatprep.subr.bf16.mxu0 %v1415_v0 }
  0x5b   :  { %1024 = vmatprep.mubr.msk.f32.mxu0 %vm1417_vm0, %v1416_v1  ;;  %1284 = vmatpush3.bf16.msra.mxu1 %v1283_v23 }
  0x5c   :  { %1025 = vmatmul.mubr.f32.gmra.mrb[2].mxu0 %v82_v61  ;;  %1285 = vmatprep.subr.bf16.mxu1 %v1415_v0 }
  0x5d   :  { %1072 = vmatmul.mubr.f32.gmra.mrb[2].mxu1 %v82_v61  ;;  %1263 = vmatpush3.bf16.msra.mxu0 %v1262_v60 }
  0x5e   :  { %1264 = vmatprep.subr.bf16.mxu0 %v1415_v0  ;;  %1074 = vmatprep.mubr.msk.f32.mxu1 %vm1417_vm0, %v1416_v1 }
  0x5f   :  { %1027 = vmatprep.mubr.msk.f32.mxu0 %vm1417_vm0, %v1416_v1  ;;  %1287 = vmatpush3.bf16.msra.mxu1 %v1286_v26 }
  0x60   :  { %1028 = vmatmul.mubr.f32.gmra.mrb[4].mxu0 %v83_v3  ;;  %1288 = vmatprep.subr.bf16.mxu1 %v1415_v0 }
  0x61   :  { %1266 = vmatpush3.bf16.msra.mxu0 %v1265_v2  ;;  %1075 = vmatmul.mubr.f32.gmra.mrb[4].mxu1 %v83_v3 }
  0x62   :  { %1267 = vmatprep.subr.bf16.mxu0 %v1415_v0  ;;  %1077 = vmatprep.mubr.msk.f32.mxu1 %vm1417_vm0, %v1416_v1 }
  0x63   :  { %1030 = vmatprep.mubr.msk.f32.mxu0 %vm1417_vm0, %v1416_v1  ;;  %1290 = vmatpush3.bf16.msra.mxu1 %v1289_v29 }
  0x64   :  { %1031 = vmatmul.mubr.f32.gmra.mrb[6].mxu0 %v84_v7  ;;  %1291 = vmatprep.subr.bf16.mxu1 %v1415_v0 }
  0x65   :  { %1269 = vmatpush3.bf16.msra.mxu0 %v1268_v6  ;;  %1078 = vmatmul.mubr.f32.gmra.mrb[6].mxu1 %v84_v7 }
  0x66   :  { %1270 = vmatprep.subr.bf16.mxu0 %v1415_v0  ;;  %1080 = vmatprep.mubr.msk.f32.mxu1 %vm1417_vm0, %v1416_v1 }
  0x67   :  { %1033 = vmatprep.mubr.msk.f32.mxu0 %vm1417_vm0, %v1416_v1  ;;  %1293 = vmatpush3.bf16.msra.mxu1 %v1292_v32 }
  0x68   :  { %1034 = vmatmul.mubr.f32.gmra.mrb[8].mxu0 %v85_v11  ;;  %1294 = vmatprep.subr.bf16.mxu1 %v1415_v0 }
  0x69   :  { %1272 = vmatpush3.bf16.msra.mxu0 %v1271_v10  ;;  %1081 = vmatmul.mubr.f32.gmra.mrb[8].mxu1 %v85_v11 }
  0x6a   :  { %1273 = vmatprep.subr.bf16.mxu0 %v1415_v0  ;;  %1115 = vmatprep.mubr.msk.f32.mxu0 %vm1417_vm0, %v1416_v1 }
  0x6b   :  { %1162 = vmatprep.mubr.msk.f32.mxu1 %vm1417_vm0, %v1416_v1  ;;  %1296 = vmatpush3.bf16.msra.mxu1 %v1295_v35 }
  0x6c   :  { %1297 = vmatprep.subr.bf16.mxu1 %v1415_v0 }
  0x6d   :  { %1275 = vmatpush3.bf16.msra.mxu0 %v1274_v14 }
  0x6e   :  { %1276 = vmatprep.subr.bf16.mxu0 %v1415_v0 }
  0x6f   :  { %1299 = vmatpush3.bf16.msra.mxu1 %v1298_v38 }
  0x70   :  { %1300 = vmatprep.subr.bf16.mxu1 %v1415_v0 }
  0x71   :  { %1278 = vmatpush3.bf16.msra.mxu0 %v1277_v17 }
  0x72   :  { %1279 = vmatprep.subr.bf16.mxu0 %v1415_v0 }
  0x73   :  { %1302 = vmatpush3.bf16.msra.mxu1 %v1301_v41 }
  0x74   :  { %1303 = vmatprep.subr.bf16.mxu1 %v1415_v0 }
  0x75   :  { %1281 = vmatpush3.bf16.msra.mxu0 %v1280_v20 }
  0x76   :  { %1306 = vmatprep.subr.bf16.mxu0 %v1415_v0 }
  0x77   :  { %1305 = vmatpush3.bf16.msra.mxu1 %v1304_v44 }
  0x78   :  { %1116 = vmatmul.mubr.f32.vlgmr.msra.gmra.mrb[10].mxu0 %v1633_v56  ;;  %1165 = vmatprep.subr.mxu1 %v1416_v1 }
  0x79   :  { %1118 = vmatprep.mubr.msk.f32.mxu0 %vm1417_vm0, %v1416_v1  ;;  %1308 = vmatpush3.bf16.msra.mxu0 %v1283_v23 }
  0x7a   :  { %1309 = vmatprep.subr.bf16.mxu0 %v1415_v0 }
  0x7c   :  { %1119 = vmatmul.mubr.f32.gmra.mrb[12].mxu0 %v82_v61 }
  0x7d   :  { %1121 = vmatprep.mubr.msk.f32.mxu0 %vm1417_vm0, %v1416_v1  ;;  %1311 = vmatpush3.bf16.msra.mxu0 %v1286_v26 }
  0x7e   :  { %1312 = vmatprep.subr.bf16.mxu0 %v1415_v0 }
  0x80   :  { %1122 = vmatmul.mubr.f32.gmra.mrb[14].mxu0 %v83_v3 }
  0x81   :  { %1124 = vmatprep.mubr.msk.f32.mxu0 %vm1417_vm0, %v1416_v1  ;;  %1314 = vmatpush3.bf16.msra.mxu0 %v1289_v29 }
  0x82   :  { %1315 = vmatprep.subr.bf16.mxu0 %v1415_v0 }
  0x84   :  { %1125 = vmatmul.mubr.f32.gmra.mrb[16].mxu0 %v84_v7 }
  0x85   :  { %1127 = vmatprep.mubr.msk.f32.mxu0 %vm1417_vm0, %v1416_v1  ;;  %1317 = vmatpush3.bf16.msra.mxu0 %v1292_v32 }
  0x86   :  { %1318 = vmatprep.subr.bf16.mxu0 %v1415_v0 }
  0x88   :  { %1128 = vmatmul.mubr.f32.gmra.mrb[18].mxu0 %v85_v11 }
  0x89   :  { %1202 = vmatprep.mubr.msk.f32.mxu0 %vm1417_vm0, %v1416_v1  ;;  %1320 = vmatpush3.bf16.msra.mxu0 %v1295_v35 }
  0x8a   :  { %1321 = vmatprep.subr.bf16.mxu0 %v1415_v0 }
  0x8d   :  { %1323 = vmatpush3.bf16.msra.mxu0 %v1298_v38 }
  0x8e   :  { %1324 = vmatprep.subr.bf16.mxu0 %v1415_v0 }
  0x91   :  { %1326 = vmatpush3.bf16.msra.mxu0 %v1301_v41 }
  0x92   :  { %1327 = vmatprep.subr.bf16.mxu0 %v1415_v0 }
  0x95   :  { %1329 = vmatpush3.bf16.msra.mxu0 %v1304_v44 }
 0x12b   :  { %v168_v45 = vpop.f32.mrb[0].mxu0 }
 0x12c   :  { %v1023_v46 = vpop.f32.mrb[1].mxu0  ;;  %v275_v47 = vpop.f32.mrb[0].mxu1 }
 0x12d   :  { %v1070_v48 = vpop.f32.mrb[1].mxu1  ;;  %v410_v49 = vrot.slane %v275_v47, 1 }
 0x12f   :  { %v173_v50 = vpop.f32.mrb[2].mxu0 }
 0x130   :  { %v280_v51 = vpop.f32.mrb[2].mxu1  ;;  %v1026_v52 = vpop.f32.mrb[3].mxu0 }
 0x131   :  { %v411_v53 = vrot.slane %v280_v51, 1  ;;  %v1073_v54 = vpop.f32.mrb[3].mxu1 }
 0x132   :  { %v482_v54 = vld [vmem:[#allocation5] sm:$0xff] }
 0x133   :  { %v412_v55 = vsel %vm409_vm1, %v410_v49, %v411_v53  ;;  %v178_v56 = vpop.f32.mrb[4].mxu0 }
 0x134   :  { %v417_v57 = vadd.f32 %v412_v55, %v168_v45  ;;  %v285_v0 = vpop.f32.mrb[4].mxu1  ;;  %v1029_v58 = vpop.f32.mrb[5].mxu0 }
 0x135   :  { %v413_v59 = vrot.slane %v285_v0, 1  ;;  %v1076_v60 = vpop.f32.mrb[5].mxu1 }
 0x137   :  { %v414_v61 = vsel %vm409_vm1, %v411_v53, %v413_v59  ;;  %v183_v62 = vpop.f32.mrb[6].mxu0 }
 0x138   :  { %v418_v63 = vadd.f32 %v414_v61, %v173_v50  ;;  %v290_v2 = vpop.f32.mrb[6].mxu1  ;;  %v1032_v3 = vpop.f32.mrb[7].mxu0 }
 0x139   :  { %v434_v4 = vrot.slane %v290_v2, 1  ;;  %v1079_v5 = vpop.f32.mrb[7].mxu1 }
 0x13b   :  { %v435_v6 = vsel %vm409_vm1, %v413_v59, %v434_v4  ;;  %v188_v7 = vpop.f32.mrb[8].mxu0 }
 0x13c   :  { %v441_v8 = vadd.f32 %v435_v6, %v178_v56  ;;  %v295_v9 = vpop.f32.mrb[8].mxu1  ;;  %v1035_v10 = vpop.f32.mrb[9].mxu0 }
 0x13d   :  { %v436_v11 = vrot.slane %v295_v9, 1  ;;  %v1082_v12 = vpop.f32.mrb[9].mxu1 }
 0x13f   :  { %v437_v13 = vsel %vm409_vm1, %v434_v4, %v436_v11  ;;  %v443_v14 = vadd.f32 %v436_v11, %v188_v7 }
 0x140   :  { %v442_v15 = vadd.f32 %v437_v13, %v183_v62 }
 0x14b   :  { %v382_v16 = vpop.f32.mrb[10].mxu0 }
 0x14c   :  { %v1117_v17 = vpop.f32.mrb[11].mxu0  ;;  %v423_v19 = vrot.slane %v382_v16, 2 }
 0x14f   :  { %v387_v18 = vpop.f32.mrb[12].mxu0 }
 0x150   :  { %v424_v20 = vrot.slane %v387_v18, 2  ;;  %v1120_v21 = vpop.f32.mrb[13].mxu0 }
 0x152   :  { %v425_v22 = vsel %vm422_vm2, %v423_v19, %v424_v20 }
 0x153   :  { %v430_v23 = vadd.f32 %v425_v22, %v417_v57  ;;  %v392_v24 = vpop.f32.mrb[14].mxu0  ;;  %v637_v57 = vlaneseq }
 0x154   :  { %v426_v25 = vrot.slane %v392_v24, 2  ;;  %v1123_v26 = vpop.f32.mrb[15].mxu0 }
 0x155   :  { %v638_v0 = vshrl.u32 %v637_v57, 7 }
 0x156   :  { %v427_v27 = vsel %vm422_vm2, %v424_v20, %v426_v25 }
 0x157   :  { %v431_v28 = vadd.f32 %v427_v27, %v418_v63  ;;  %v397_v29 = vpop.f32.mrb[16].mxu0  ;;  %v639_v58 = vsub.s32 0, %v638_v0  ;;  %v887_v27 = vld [vmem:[%s1833_s3] ss:$0 sm:$0xff] }
 0x158   :  { %v446_v30 = vrot.slane %v397_v29, 2  ;;  %v1126_v31 = vpop.f32.mrb[17].mxu0 }
 0x159   :  { %v483_v43 = vadd.f32 %v431_v28, %v430_v23 }
 0x15a   :  { %v447_v32 = vsel %vm422_vm2, %v426_v25, %v446_v30 }
 0x15b   :  { %v453_v33 = vadd.f32 %v447_v32, %v441_v8  ;;  %v402_v34 = vpop.f32.mrb[18].mxu0  ;;  %v827_v32 = vld [vmem:[%s1836_s6] sm:$0xff] }
 0x15c   :  { %v448_v35 = vrot.slane %v402_v34, 2  ;;  %v1129_v36 = vpop.f32.mrb[19].mxu0  ;;  %v829_v34 = vld [vmem:[%s1836_s6 + $0x10] sm:$0xff] }
 0x15d   :  { %v459_v41 = vrot.slane %v453_v33, 2  ;;  %v828_v33 = vld [vmem:[%s1836_s6 + $0x8] sm:$0xff] }
 0x15e   :  { %v449_v37 = vsel %vm422_vm2, %v446_v30, %v448_v35  ;;  %v455_v38 = vadd.f32 %v448_v35, %v443_v14  ;;  %v830_v35 = vld [vmem:[%s1836_s6 + $0x18] sm:$0xff] }
 0x15f   :  { %v454_v39 = vadd.f32 %v449_v37, %v442_v15 }
 0x160   :  { %v462_v40 = vrot.slane %v455_v38, 2 }
 0x161   :  { %v460_v42 = vrot.slane %v454_v39, 2 }
 0x163   :  { %v461_v44 = vsel %vm422_vm2, %v459_v41, %v460_v42  ;;  %v463_v45 = vsel %vm422_vm2, %v460_v42, %v462_v40  ;;  %v835_v40 = vld [vmem:[#allocation7] sm:$0xff]  ;;  %v836_v41 = vld [vmem:[#allocation7 + $0x8] sm:$0xff]  ;;  %v837_v42 = vld [vmem:[#allocation7 + $0x10] sm:$0xff] }
 0x164   :  { %v484_v46 = vadd.f32 %v483_v43, %v461_v44  ;;  %v838_v43 = vld [vmem:[#allocation7 + $0x18] sm:$0xff] }
 0x166   :  { %v485_v47 = vadd.f32 %v484_v46, %v463_v45 }
 0x168   :  { %v486_v48 = vrot.slane %v485_v47, 4 }
 0x16a   :  { %v487_v49 = vadd.f32 %v486_v48, %v485_v47 }
 0x16c   :  { %v488_v50 = vrot.slane %v487_v49, 2 }
 0x16e   :  { %v489_v51 = vadd.f32 %v488_v50, %v487_v49 }
 0x170   :  { %v490_v52 = vrot.slane %v489_v51, 1 }
 0x172   :  { %v491_v53 = vadd.f32 %v490_v52, %v489_v51 }
 0x174   :  { %1163 = vmatmul.mubr.f32.vlgmr.msra.gmra.mrb[10].mxu1 %v491_v53 }
 0x175   :  { %1166 = vmatpush3.msra.mxu1 %v482_v54  ;;  %1167 = vmatprep.mubr.msk.f32.mxu1 %vm1417_vm0, %v1416_v1 }
 0x176   :  { %1205 = vmatprep.subr.mxu1 %v1416_v1 }
 0x247   :  { %v558_v55 = vpop.f32.mrb[10].mxu1 }
 0x248   :  { %v1164_v56 = vpop.f32.mrb[11].mxu1  ;;  %1168 = vmatmul.mubr.msk.f32.vlgmr.msra.gmra.mrb[12].mxu1 %vm562_vm3, %v558_v55 }
 0x249   :  { %1206 = vmatpush3.msra.mxu1 %v482_v54  ;;  %1207 = vmatprep.mubr.msk.f32.mxu1 %vm1417_vm0, %v1416_v1 }
 0x31b   :  { %v632_v59 = vpop.f32.mrb[12].mxu1 }
 0x31c   :  { %v636_v60 = vmul.f32 0.001953125, %v632_v59  ;;  %v1169_v61 = vpop.f32.mrb[13].mxu1 }
 0x31e   :  { %v640_v62 = vrot.slane %v636_v60, %v639_v58 }
 0x320   :  { %v641_v63 = vsub.f32 %v430_v23, %v640_v62  ;;  %v642_v2 = vsub.f32 %v431_v28, %v640_v62  ;;  %v643_v3 = vsub.f32 %v461_v44, %v640_v62  ;;  %v644_v4 = vsub.f32 %v463_v45, %v640_v62  ;;  %v802_v23 = vld [vmem:[%s1832_s2] sm:$0x1] }
 0x322   :  { %v645_v5 = vmul.f32 %v641_v63, %v641_v63  ;;  %v646_v6 = vmul.f32 %v642_v2, %v642_v2  ;;  %v647_v7 = vmul.f32 %v643_v3, %v643_v3  ;;  %v648_v9 = vmul.f32 %v644_v4, %v644_v4 }
 0x324   :  { %v649_v8 = vadd.f32 %v646_v6, %v645_v5 }
 0x326   :  { %v650_v10 = vadd.f32 %v649_v8, %v647_v7 }
 0x328   :  { %v651_v11 = vadd.f32 %v650_v10, %v648_v9 }
 0x32a   :  { %v652_v12 = vrot.slane %v651_v11, 4 }
 0x32c   :  { %v653_v1 = vadd.f32 %v652_v12, %v651_v11 }
 0x32e   :  { %v654_v13 = vrot.slane %v653_v1, 2 }
 0x330   :  { %v655_v14 = vadd.f32 %v654_v13, %v653_v1 }
 0x332   :  { %v656_v15 = vrot.slane %v655_v14, 1 }
 0x334   :  { %v657_v16 = vadd.f32 %v656_v15, %v655_v14 }
 0x336   :  { %1203 = vmatmul.mubr.f32.vlgmr.msra.gmra.mrb[20].mxu0 %v657_v16 }
 0x409   :  { %v724_v17 = vpop.f32.mrb[20].mxu0 }
 0x40a   :  { %v1204_v18 = vpop.f32.mrb[21].mxu0  ;;  %1208 = vmatmul.mubr.msk.f32.vlgmr.msra.gmra.mrb[14].mxu1 %vm562_vm3, %v724_v17 }
 0x4dd   :  { %v797_v19 = vpop.f32.mrb[14].mxu1 }
 0x4de   :  { %v801_v20 = vmul.f32 0.001953125, %v797_v19  ;;  %v1209_v21 = vpop.f32.mrb[15].mxu1 }
 0x4e0   :  { %v803_v22 = vadd.f32 1e-05, %v801_v20 }
 0x4e2   :  { %1338 = vrsqrt.f32 %v803_v22 }
 0x4ec   :  { %v1339_v24 = vpop.eup %1338 }
 0x4ed   :  { %v805_v25 = vmul.f32 %v1339_v24, %v802_v23 }
 0x4ef   :  { %v810_v26 = vrot.slane %v805_v25, %v639_v58 }
 0x4f1   :  { %v812_v28 = vmul.f32 %v810_v26, %v641_v63  ;;  %v813_v29 = vmul.f32 %v810_v26, %v642_v2  ;;  %v814_v30 = vmul.f32 %v810_v26, %v643_v3  ;;  %v815_v31 = vmul.f32 %v810_v26, %v644_v4 }
 0x4f3   :  { %v823_v36 = vadd.f32 %v887_v27, %v812_v28  ;;  %v824_v37 = vadd.f32 %v887_v27, %v813_v29  ;;  %v825_v38 = vadd.f32 %v887_v27, %v814_v30  ;;  %v826_v39 = vadd.f32 %v887_v27, %v815_v31 }
 0x4f5   :  { %v831_v44 = vadd.f32 %v827_v32, %v823_v36  ;;  %v832_v45 = vadd.f32 %v828_v33, %v824_v37  ;;  %v833_v46 = vadd.f32 %v829_v34, %v825_v38  ;;  %v834_v47 = vadd.f32 %v830_v35, %v826_v39 }
 0x4f7   :  { %v839_v48 = vadd.f32 %v835_v40, %v831_v44  ;;  %v840_v49 = vadd.f32 %v836_v41, %v832_v45  ;;  %v841_v50 = vadd.f32 %v837_v42, %v833_v46  ;;  %v842_v51 = vadd.f32 %v838_v43, %v834_v47 }
 0x4f9   :  { %843 = vst [vmem:[%s1838_s8] sm:$0xff] %v839_v48  ;;  %844 = vst [vmem:[%s1838_s8 + $0x8] sm:$0xff] %v840_v49 }
 0x4fa   :  { %845 = vst [vmem:[%s1838_s8 + $0x10] sm:$0xff] %v841_v50  ;;  %846 = vst [vmem:[%s1838_s8 + $0x18] sm:$0xff] %v842_v51 }
 0x4fb   :  { %851 = vsyncpa [#allocation4], 1 }
 0x4fc   :  { %852 = vsyncpa [#allocation6], 1 }

</bundles_post_ra>
